<compile_context>
chip_gen: v7x
topology: tpu7x:2x2x1
jax: 0.10.0
libtpu: 0.0.40
codegen_flags: <defaults>
</compile_context>

<pallas_src>
import functools
import math

import jax
import jax.numpy as jnp
import numpy as np
from jax import lax
from jax.experimental import pallas as pl
from jax.experimental.pallas import tpu as pltpu


def _sinkhorn_kernel(x_ref, yT_ref, cost_ref, C_ref, *, epsilon, niter, n, d_chunk):
    """One grid step = one feature chunk.

    Phase 1 (every step): accumulate this chunk's contribution to the L1 cost
      matrix as per-feature (n, n) updates (no 3-D intermediate, VPU only).
    Phase 2 (last step): Sinkhorn iterations on the finished C with the
      exponential hoisted out of the loop, then the transport-cost reduction.
    """
    chunk = pl.program_id(0)
    num_chunks = pl.num_programs(0)

    @pl.when(chunk == 0)
    def _init():
        C_ref[...] = jnp.zeros_like(C_ref)

    # ---- Phase 1: per-feature cost accumulation.
    #   x_ref : (n, d_chunk)  column k -> (n, 1), lane-splat across j
    #   yT_ref: (d_chunk, n)  row k    -> (1, n), sublane-splat across i
    # Static unroll (d_chunk <= 128) keeps every slice offset static.
    # TODO(synk): for very large n, cap the unrolled feature count per grid step
    # (needs dynamic-lane slicing or a sub-grid) to bound generated code size.
    Cc = jnp.zeros((n, n), jnp.float32)
    for k in range(d_chunk):
        xk = x_ref[:, k:k + 1].astype(jnp.float32)   # (n, 1)
        yk = yT_ref[k:k + 1, :].astype(jnp.float32)  # (1, n)
        Cc = Cc + jnp.abs(xk - yk)
    C_ref[...] += Cc

    # ---- Phase 2: Sinkhorn + cost, once the cost matrix is complete.
    @pl.when(chunk == num_chunks - 1)
    def _solve():
        eps = jnp.float32(epsilon)
        inv_eps = jnp.float32(1.0 / epsilon)
        log_mu = jnp.float32(math.log(1.0 / n))   # log of uniform mu (= log nu)

        C = C_ref[...]
        # exp(M(u,v))_ij = K_ij * exp(u_i/eps) * exp(v_j/eps): one n^2 EUP pass
        # here, O(n) transcendentals per iteration below.
        K = jnp.exp(-C * inv_eps)

        def cond(carry):
            _, _, it, err = carry
            return jnp.logical_and(it < niter, err >= jnp.float32(0.1))

        def body(carry):
            u, v, it, _ = carry
            a = jnp.exp(u * inv_eps)                        # (n, 1)
            b = jnp.exp(v * inv_eps)                        # (1, n)
            r = jnp.sum(K * b, axis=1, keepdims=True)       # (n, 1) row sums / a
            u_new = eps * (log_mu - jnp.log(a * r + 1e-6)) + u
            a_new = jnp.exp(u_new * inv_eps)                # (n, 1)
            c = jnp.sum(K * a_new, axis=0, keepdims=True)   # (1, n) col sums / b
            v_new = eps * (log_mu - jnp.log(b * c + 1e-6)) + v
            err = jnp.sum(jnp.abs(u_new - u))
            return u_new, v_new, it + 1, err

        u0 = jnp.zeros((n, 1), jnp.float32)
        v0 = jnp.zeros((1, n), jnp.float32)
        it0 = jnp.zeros((), jnp.int32)
        err0 = jnp.full((), jnp.inf, dtype=jnp.float32)
        u, v, _, _ = lax.while_loop(cond, body, (u0, v0, it0, err0))

        a = jnp.exp(u * inv_eps)
        b = jnp.exp(v * inv_eps)
        # cost = sum_ij (a_i K_ij b_j) * C_ij   — no extra n^2 exp for Gamma.
        w = jnp.sum((K * C) * b, axis=1, keepdims=True)         # (n, 1)
        cost_ref[...] = jnp.sum(a * w, axis=0, keepdims=True)   # (1, 1)


def feature_optimal_loss(output, target, epsilon=100.0, niter=10):
    """output, target: [batch, dims]. Returns scalar Sinkhorn OT cost (float32)."""
    assert output.shape == target.shape and output.ndim == 2
    n, d = output.shape
    x = output
    y = target

    # Feature-dim chunking: <=128 features per grid step (statically unrolled in
    # the kernel).  A single chunk may have any width (block == full array is
    # exempt from the lane-multiple rule); multiple chunks must be 128-wide, so
    # pad d with zero-features (|0-0| = 0 contributes nothing to the L1 cost).
    if d <= 128:
        d_chunk = d
        d_pad = d
    else:
        d_chunk = 128
        d_pad = ((d + 127) // 128) * 128
        if d_pad != d:
            x = jnp.pad(x, ((0, 0), (0, d_pad - d)))
            y = jnp.pad(y, ((0, 0), (0, d_pad - d)))
    num_chunks = d_pad // d_chunk

    # Pre-transpose y so that feature k is a sublane row inside the kernel.
    yT = jnp.transpose(y)   # (d_pad, n)

    itemsize = jnp.dtype(x.dtype).itemsize
    # Honest VMEM footprint: double-buffered per-chunk inputs + C scratch +
    # K and loop temporaries (a handful of n^2 f32 slabs) + headroom.
    est = (2 * 2 * n * d_chunk * itemsize) + (8 * n * n * 4) + (1 << 20)
    vmem_limit = int(min(max(2 * est, 16 << 20), 48 << 20))

    kernel = functools.partial(
        _sinkhorn_kernel,
        epsilon=float(epsilon), niter=int(niter), n=int(n), d_chunk=int(d_chunk),
    )

    cost = pl.pallas_call(
        kernel,
        out_shape=jax.ShapeDtypeStruct((1, 1), jnp.float32),
        grid=(num_chunks,),
        in_specs=[
            pl.BlockSpec((n, d_chunk), lambda c: (0, c)),   # x chunk
            pl.BlockSpec((d_chunk, n), lambda c: (c, 0)),   # yT chunk
        ],
        out_specs=pl.BlockSpec((1, 1), lambda c: (0, 0)),
        scratch_shapes=[pltpu.VMEM((n, n), jnp.float32)],   # persistent C accumulator
        compiler_params=pltpu.CompilerParams(
            dimension_semantics=("arbitrary",),
            vmem_limit_bytes=vmem_limit,
        ),
    )(x, yT)
    # TODO(synk): if this loss is evaluated over many independent (output, target)
    # pairs, add a leading "parallel" grid axis over pairs to use both v7x TCs.
    return cost[0, 0]


def _reference(x, y, epsilon=100.0, niter=10):
    """Pure-numpy re-implementation of the PyTorch forward, for verification."""
    x = np.asarray(x, np.float64)
    y = np.asarray(y, np.float64)
    n = x.shape[0]
    C = np.abs(x[:, None, :] - y[None, :, :]).sum(2)
    log_mu = np.log(1.0 / n)
    u = np.zeros(n)
    v = np.zeros(n)
    for _ in range(niter):
        u1 = u
        M = (-C + u[:, None] + v[None, :]) / epsilon
        u = epsilon * (log_mu - np.log(np.exp(M).sum(1) + 1e-6)) + u
        M = (-C + u[:, None] + v[None, :]) / epsilon
        v = epsilon * (log_mu - np.log(np.exp(M).sum(0) + 1e-6)) + v
        if np.abs(u - u1).sum() < 0.1:
            break
    Gamma = np.exp((-C + u[:, None] + v[None, :]) / epsilon)
    return float((Gamma * C).sum())


if __name__ == "__main__":
    key = jax.random.PRNGKey(0)
    k1, k2 = jax.random.split(key)
    batch, dims = 8, 128
    output = jax.random.normal(k1, (batch, dims), dtype=jnp.float32)
    target = jax.random.normal(k2, (batch, dims), dtype=jnp.float32)

    cost = feature_optimal_loss(output, target, epsilon=100.0, niter=10)
    cost = jax.block_until_ready(cost)

    ref = _reference(np.asarray(output), np.asarray(target), epsilon=100.0, niter=10)
    assert np.isfinite(float(cost))
    np.testing.assert_allclose(float(cost), ref, rtol=5e-3, atol=5e-3)
    print("KERNEL_OK")
</pallas_src>

<mosaic_0001>
module attributes {stable_mosaic.version = 11 : i64} {
  func.func @_sinkhorn_kernel(%arg0: i32, %arg1: memref<8x128xf32, #tpu.memory_space<vmem>>, %arg2: memref<128x8xf32, #tpu.memory_space<vmem>>, %arg3: memref<1x1xf32, #tpu.memory_space<vmem>>, %arg4: memref<8x8xf32, #tpu.memory_space<vmem>>) attributes {dimension_semantics = [#tpu.dimension_semantics<arbitrary>], iteration_bounds = array<i64: 1>, scalar_prefetch = 0 : i64, scratch_operands = 1 : i64, tpu.core_type = #tpu.core_type<tc>, window_params = [{transform_indices = @transform_0, window_bounds = array<i64: 8, 128>}, {transform_indices = @transform_1, window_bounds = array<i64: 128, 8>}, {pipeline_mode = #tpu.pipeline_mode<synchronous>, transform_indices = @transform_2, window_bounds = array<i64: 1, 1>}]} {
    %c0_i32 = arith.constant 0 : i32
    %0 = arith.cmpi eq, %arg0, %c0_i32 : i32
    %1 = arith.extui %0 : i1 to i32
    %c0_i32_0 = arith.constant 0 : i32
    %2 = arith.cmpi ne, %1, %c0_i32_0 : i32
    scf.if %2 {
      %cst_391 = arith.constant 0.000000e+00 : f32
      %906 = vector.broadcast %cst_391 : f32 to vector<8x8xf32>
      %c0_392 = arith.constant 0 : index
      %c0_393 = arith.constant 0 : index
      %907 = vector.load %arg4[%c0_392, %c0_393] : memref<8x8xf32, #tpu.memory_space<vmem>>, vector<8x8xf32>
      tpu.vector_store %arg4[%c0_392, %c0_393], %906 {strides = array<i32>} : memref<8x8xf32, #tpu.memory_space<vmem>>, vector<8x8xf32>,
    } else {
    }
    %cst = arith.constant 0.000000e+00 : f32
    %3 = vector.broadcast %cst : f32 to vector<8x8xf32>
    %c0 = arith.constant 0 : index
    %c0_1 = arith.constant 0 : index
    %4 = vector.load %arg1[%c0, %c0_1] : memref<8x128xf32, #tpu.memory_space<vmem>>, vector<8x1xf32>
    %c0_2 = arith.constant 0 : index
    %c0_3 = arith.constant 0 : index
    %5 = vector.load %arg2[%c0_2, %c0_3] : memref<128x8xf32, #tpu.memory_space<vmem>>, vector<1x8xf32>
    %6 = vector.broadcast %4 : vector<8x1xf32> to vector<8x8xf32>
    %7 = vector.broadcast %5 : vector<1x8xf32> to vector<8x8xf32>
    %8 = arith.subf %6, %7 : vector<8x8xf32>
    %9 = math.absf %8 : vector<8x8xf32>
    %10 = arith.addf %3, %9 : vector<8x8xf32>
    %c0_4 = arith.constant 0 : index
    %c1 = arith.constant 1 : index
    %11 = vector.load %arg1[%c0_4, %c1] : memref<8x128xf32, #tpu.memory_space<vmem>>, vector<8x1xf32>
    %c1_5 = arith.constant 1 : index
    %c0_6 = arith.constant 0 : index
    %12 = vector.load %arg2[%c1_5, %c0_6] : memref<128x8xf32, #tpu.memory_space<vmem>>, vector<1x8xf32>
    %13 = vector.broadcast %11 : vector<8x1xf32> to vector<8x8xf32>
    %14 = vector.broadcast %12 : vector<1x8xf32> to vector<8x8xf32>
    %15 = arith.subf %13, %14 : vector<8x8xf32>
    %16 = math.absf %15 : vector<8x8xf32>
    %17 = arith.addf %10, %16 : vector<8x8xf32>
    %c0_7 = arith.constant 0 : index
    %c2 = arith.constant 2 : index
    %18 = vector.load %arg1[%c0_7, %c2] : memref<8x128xf32, #tpu.memory_space<vmem>>, vector<8x1xf32>
    %c2_8 = arith.constant 2 : index
    %c0_9 = arith.constant 0 : index
    %19 = vector.load %arg2[%c2_8, %c0_9] : memref<128x8xf32, #tpu.memory_space<vmem>>, vector<1x8xf32>
    %20 = vector.broadcast %18 : vector<8x1xf32> to vector<8x8xf32>
    %21 = vector.broadcast %19 : vector<1x8xf32> to vector<8x8xf32>
    %22 = arith.subf %20, %21 : vector<8x8xf32>
    %23 = math.absf %22 : vector<8x8xf32>
    %24 = arith.addf %17, %23 : vector<8x8xf32>
    %c0_10 = arith.constant 0 : index
    %c3 = arith.constant 3 : index
    %25 = vector.load %arg1[%c0_10, %c3] : memref<8x128xf32, #tpu.memory_space<vmem>>, vector<8x1xf32>
    %c3_11 = arith.constant 3 : index
    %c0_12 = arith.constant 0 : index
    %26 = vector.load %arg2[%c3_11, %c0_12] : memref<128x8xf32, #tpu.memory_space<vmem>>, vector<1x8xf32>
    %27 = vector.broadcast %25 : vector<8x1xf32> to vector<8x8xf32>
    %28 = vector.broadcast %26 : vector<1x8xf32> to vector<8x8xf32>
    %29 = arith.subf %27, %28 : vector<8x8xf32>
    %30 = math.absf %29 : vector<8x8xf32>
    %31 = arith.addf %24, %30 : vector<8x8xf32>
    %c0_13 = arith.constant 0 : index
    %c4 = arith.constant 4 : index
    %32 = vector.load %arg1[%c0_13, %c4] : memref<8x128xf32, #tpu.memory_space<vmem>>, vector<8x1xf32>
    %c4_14 = arith.constant 4 : index
    %c0_15 = arith.constant 0 : index
    %33 = vector.load %arg2[%c4_14, %c0_15] : memref<128x8xf32, #tpu.memory_space<vmem>>, vector<1x8xf32>
    %34 = vector.broadcast %32 : vector<8x1xf32> to vector<8x8xf32>
    %35 = vector.broadcast %33 : vector<1x8xf32> to vector<8x8xf32>
    %36 = arith.subf %34, %35 : vector<8x8xf32>
    %37 = math.absf %36 : vector<8x8xf32>
    %38 = arith.addf %31, %37 : vector<8x8xf32>
    %c0_16 = arith.constant 0 : index
    %c5 = arith.constant 5 : index
    %39 = vector.load %arg1[%c0_16, %c5] : memref<8x128xf32, #tpu.memory_space<vmem>>, vector<8x1xf32>
    %c5_17 = arith.constant 5 : index
    %c0_18 = arith.constant 0 : index
    %40 = vector.load %arg2[%c5_17, %c0_18] : memref<128x8xf32, #tpu.memory_space<vmem>>, vector<1x8xf32>
    %41 = vector.broadcast %39 : vector<8x1xf32> to vector<8x8xf32>
    %42 = vector.broadcast %40 : vector<1x8xf32> to vector<8x8xf32>
    %43 = arith.subf %41, %42 : vector<8x8xf32>
    %44 = math.absf %43 : vector<8x8xf32>
    %45 = arith.addf %38, %44 : vector<8x8xf32>
    %c0_19 = arith.constant 0 : index
    %c6 = arith.constant 6 : index
    %46 = vector.load %arg1[%c0_19, %c6] : memref<8x128xf32, #tpu.memory_space<vmem>>, vector<8x1xf32>
    %c6_20 = arith.constant 6 : index
    %c0_21 = arith.constant 0 : index
    %47 = vector.load %arg2[%c6_20, %c0_21] : memref<128x8xf32, #tpu.memory_space<vmem>>, vector<1x8xf32>
    %48 = vector.broadcast %46 : vector<8x1xf32> to vector<8x8xf32>
    %49 = vector.broadcast %47 : vector<1x8xf32> to vector<8x8xf32>
    %50 = arith.subf %48, %49 : vector<8x8xf32>
    %51 = math.absf %50 : vector<8x8xf32>
    %52 = arith.addf %45, %51 : vector<8x8xf32>
    %c0_22 = arith.constant 0 : index
    %c7 = arith.constant 7 : index
    %53 = vector.load %arg1[%c0_22, %c7] : memref<8x128xf32, #tpu.memory_space<vmem>>, vector<8x1xf32>
    %c7_23 = arith.constant 7 : index
    %c0_24 = arith.constant 0 : index
    %54 = vector.load %arg2[%c7_23, %c0_24] : memref<128x8xf32, #tpu.memory_space<vmem>>, vector<1x8xf32>
    %55 = vector.broadcast %53 : vector<8x1xf32> to vector<8x8xf32>
    %56 = vector.broadcast %54 : vector<1x8xf32> to vector<8x8xf32>
    %57 = arith.subf %55, %56 : vector<8x8xf32>
    %58 = math.absf %57 : vector<8x8xf32>
    %59 = arith.addf %52, %58 : vector<8x8xf32>
    %c0_25 = arith.constant 0 : index
    %c8 = arith.constant 8 : index
    %60 = vector.load %arg1[%c0_25, %c8] : memref<8x128xf32, #tpu.memory_space<vmem>>, vector<8x1xf32>
    %c8_26 = arith.constant 8 : index
    %c0_27 = arith.constant 0 : index
    %61 = vector.load %arg2[%c8_26, %c0_27] : memref<128x8xf32, #tpu.memory_space<vmem>>, vector<1x8xf32>
    %62 = vector.broadcast %60 : vector<8x1xf32> to vector<8x8xf32>
    %63 = vector.broadcast %61 : vector<1x8xf32> to vector<8x8xf32>
    %64 = arith.subf %62, %63 : vector<8x8xf32>
    %65 = math.absf %64 : vector<8x8xf32>
    %66 = arith.addf %59, %65 : vector<8x8xf32>
    %c0_28 = arith.constant 0 : index
    %c9 = arith.constant 9 : index
    %67 = vector.load %arg1[%c0_28, %c9] : memref<8x128xf32, #tpu.memory_space<vmem>>, vector<8x1xf32>
    %c9_29 = arith.constant 9 : index
    %c0_30 = arith.constant 0 : index
    %68 = vector.load %arg2[%c9_29, %c0_30] : memref<128x8xf32, #tpu.memory_space<vmem>>, vector<1x8xf32>
    %69 = vector.broadcast %67 : vector<8x1xf32> to vector<8x8xf32>
    %70 = vector.broadcast %68 : vector<1x8xf32> to vector<8x8xf32>
    %71 = arith.subf %69, %70 : vector<8x8xf32>
    %72 = math.absf %71 : vector<8x8xf32>
    %73 = arith.addf %66, %72 : vector<8x8xf32>
    %c0_31 = arith.constant 0 : index
    %c10 = arith.constant 10 : index
    %74 = vector.load %arg1[%c0_31, %c10] : memref<8x128xf32, #tpu.memory_space<vmem>>, vector<8x1xf32>
    %c10_32 = arith.constant 10 : index
    %c0_33 = arith.constant 0 : index
    %75 = vector.load %arg2[%c10_32, %c0_33] : memref<128x8xf32, #tpu.memory_space<vmem>>, vector<1x8xf32>
    %76 = vector.broadcast %74 : vector<8x1xf32> to vector<8x8xf32>
    %77 = vector.broadcast %75 : vector<1x8xf32> to vector<8x8xf32>
    %78 = arith.subf %76, %77 : vector<8x8xf32>
    %79 = math.absf %78 : vector<8x8xf32>
    %80 = arith.addf %73, %79 : vector<8x8xf32>
    %c0_34 = arith.constant 0 : index
    %c11 = arith.constant 11 : index
    %81 = vector.load %arg1[%c0_34, %c11] : memref<8x128xf32, #tpu.memory_space<vmem>>, vector<8x1xf32>
    %c11_35 = arith.constant 11 : index
    %c0_36 = arith.constant 0 : index
    %82 = vector.load %arg2[%c11_35, %c0_36] : memref<128x8xf32, #tpu.memory_space<vmem>>, vector<1x8xf32>
    %83 = vector.broadcast %81 : vector<8x1xf32> to vector<8x8xf32>
    %84 = vector.broadcast %82 : vector<1x8xf32> to vector<8x8xf32>
    %85 = arith.subf %83, %84 : vector<8x8xf32>
    %86 = math.absf %85 : vector<8x8xf32>
    %87 = arith.addf %80, %86 : vector<8x8xf32>
    %c0_37 = arith.constant 0 : index
    %c12 = arith.constant 12 : index
    %88 = vector.load %arg1[%c0_37, %c12] : memref<8x128xf32, #tpu.memory_space<vmem>>, vector<8x1xf32>
    %c12_38 = arith.constant 12 : index
    %c0_39 = arith.constant 0 : index
    %89 = vector.load %arg2[%c12_38, %c0_39] : memref<128x8xf32, #tpu.memory_space<vmem>>, vector<1x8xf32>
    %90 = vector.broadcast %88 : vector<8x1xf32> to vector<8x8xf32>
    %91 = vector.broadcast %89 : vector<1x8xf32> to vector<8x8xf32>
    %92 = arith.subf %90, %91 : vector<8x8xf32>
    %93 = math.absf %92 : vector<8x8xf32>
    %94 = arith.addf %87, %93 : vector<8x8xf32>
    %c0_40 = arith.constant 0 : index
    %c13 = arith.constant 13 : index
    %95 = vector.load %arg1[%c0_40, %c13] : memref<8x128xf32, #tpu.memory_space<vmem>>, vector<8x1xf32>
    %c13_41 = arith.constant 13 : index
    %c0_42 = arith.constant 0 : index
    %96 = vector.load %arg2[%c13_41, %c0_42] : memref<128x8xf32, #tpu.memory_space<vmem>>, vector<1x8xf32>
    %97 = vector.broadcast %95 : vector<8x1xf32> to vector<8x8xf32>
    %98 = vector.broadcast %96 : vector<1x8xf32> to vector<8x8xf32>
    %99 = arith.subf %97, %98 : vector<8x8xf32>
    %100 = math.absf %99 : vector<8x8xf32>
    %101 = arith.addf %94, %100 : vector<8x8xf32>
    %c0_43 = arith.constant 0 : index
    %c14 = arith.constant 14 : index
    %102 = vector.load %arg1[%c0_43, %c14] : memref<8x128xf32, #tpu.memory_space<vmem>>, vector<8x1xf32>
    %c14_44 = arith.constant 14 : index
    %c0_45 = arith.constant 0 : index
    %103 = vector.load %arg2[%c14_44, %c0_45] : memref<128x8xf32, #tpu.memory_space<vmem>>, vector<1x8xf32>
    %104 = vector.broadcast %102 : vector<8x1xf32> to vector<8x8xf32>
    %105 = vector.broadcast %103 : vector<1x8xf32> to vector<8x8xf32>
    %106 = arith.subf %104, %105 : vector<8x8xf32>
    %107 = math.absf %106 : vector<8x8xf32>
    %108 = arith.addf %101, %107 : vector<8x8xf32>
    %c0_46 = arith.constant 0 : index
    %c15 = arith.constant 15 : index
    %109 = vector.load %arg1[%c0_46, %c15] : memref<8x128xf32, #tpu.memory_space<vmem>>, vector<8x1xf32>
    %c15_47 = arith.constant 15 : index
    %c0_48 = arith.constant 0 : index
    %110 = vector.load %arg2[%c15_47, %c0_48] : memref<128x8xf32, #tpu.memory_space<vmem>>, vector<1x8xf32>
    %111 = vector.broadcast %109 : vector<8x1xf32> to vector<8x8xf32>
    %112 = vector.broadcast %110 : vector<1x8xf32> to vector<8x8xf32>
    %113 = arith.subf %111, %112 : vector<8x8xf32>
    %114 = math.absf %113 : vector<8x8xf32>
    %115 = arith.addf %108, %114 : vector<8x8xf32>
    %c0_49 = arith.constant 0 : index
    %c16 = arith.constant 16 : index
    %116 = vector.load %arg1[%c0_49, %c16] : memref<8x128xf32, #tpu.memory_space<vmem>>, vector<8x1xf32>
    %c16_50 = arith.constant 16 : index
    %c0_51 = arith.constant 0 : index
    %117 = vector.load %arg2[%c16_50, %c0_51] : memref<128x8xf32, #tpu.memory_space<vmem>>, vector<1x8xf32>
    %118 = vector.broadcast %116 : vector<8x1xf32> to vector<8x8xf32>
    %119 = vector.broadcast %117 : vector<1x8xf32> to vector<8x8xf32>
    %120 = arith.subf %118, %119 : vector<8x8xf32>
    %121 = math.absf %120 : vector<8x8xf32>
    %122 = arith.addf %115, %121 : vector<8x8xf32>
    %c0_52 = arith.constant 0 : index
    %c17 = arith.constant 17 : index
    %123 = vector.load %arg1[%c0_52, %c17] : memref<8x128xf32, #tpu.memory_space<vmem>>, vector<8x1xf32>
    %c17_53 = arith.constant 17 : index
    %c0_54 = arith.constant 0 : index
    %124 = vector.load %arg2[%c17_53, %c0_54] : memref<128x8xf32, #tpu.memory_space<vmem>>, vector<1x8xf32>
    %125 = vector.broadcast %123 : vector<8x1xf32> to vector<8x8xf32>
    %126 = vector.broadcast %124 : vector<1x8xf32> to vector<8x8xf32>
    %127 = arith.subf %125, %126 : vector<8x8xf32>
    %128 = math.absf %127 : vector<8x8xf32>
    %129 = arith.addf %122, %128 : vector<8x8xf32>
    %c0_55 = arith.constant 0 : index
    %c18 = arith.constant 18 : index
    %130 = vector.load %arg1[%c0_55, %c18] : memref<8x128xf32, #tpu.memory_space<vmem>>, vector<8x1xf32>
    %c18_56 = arith.constant 18 : index
    %c0_57 = arith.constant 0 : index
    %131 = vector.load %arg2[%c18_56, %c0_57] : memref<128x8xf32, #tpu.memory_space<vmem>>, vector<1x8xf32>
    %132 = vector.broadcast %130 : vector<8x1xf32> to vector<8x8xf32>
    %133 = vector.broadcast %131 : vector<1x8xf32> to vector<8x8xf32>
    %134 = arith.subf %132, %133 : vector<8x8xf32>
    %135 = math.absf %134 : vector<8x8xf32>
    %136 = arith.addf %129, %135 : vector<8x8xf32>
    %c0_58 = arith.constant 0 : index
    %c19 = arith.constant 19 : index
    %137 = vector.load %arg1[%c0_58, %c19] : memref<8x128xf32, #tpu.memory_space<vmem>>, vector<8x1xf32>
    %c19_59 = arith.constant 19 : index
    %c0_60 = arith.constant 0 : index
    %138 = vector.load %arg2[%c19_59, %c0_60] : memref<128x8xf32, #tpu.memory_space<vmem>>, vector<1x8xf32>
    %139 = vector.broadcast %137 : vector<8x1xf32> to vector<8x8xf32>
    %140 = vector.broadcast %138 : vector<1x8xf32> to vector<8x8xf32>
    %141 = arith.subf %139, %140 : vector<8x8xf32>
    %142 = math.absf %141 : vector<8x8xf32>
    %143 = arith.addf %136, %142 : vector<8x8xf32>
    %c0_61 = arith.constant 0 : index
    %c20 = arith.constant 20 : index
    %144 = vector.load %arg1[%c0_61, %c20] : memref<8x128xf32, #tpu.memory_space<vmem>>, vector<8x1xf32>
    %c20_62 = arith.constant 20 : index
    %c0_63 = arith.constant 0 : index
    %145 = vector.load %arg2[%c20_62, %c0_63] : memref<128x8xf32, #tpu.memory_space<vmem>>, vector<1x8xf32>
    %146 = vector.broadcast %144 : vector<8x1xf32> to vector<8x8xf32>
    %147 = vector.broadcast %145 : vector<1x8xf32> to vector<8x8xf32>
    %148 = arith.subf %146, %147 : vector<8x8xf32>
    %149 = math.absf %148 : vector<8x8xf32>
    %150 = arith.addf %143, %149 : vector<8x8xf32>
    %c0_64 = arith.constant 0 : index
    %c21 = arith.constant 21 : index
    %151 = vector.load %arg1[%c0_64, %c21] : memref<8x128xf32, #tpu.memory_space<vmem>>, vector<8x1xf32>
    %c21_65 = arith.constant 21 : index
    %c0_66 = arith.constant 0 : index
    %152 = vector.load %arg2[%c21_65, %c0_66] : memref<128x8xf32, #tpu.memory_space<vmem>>, vector<1x8xf32>
    %153 = vector.broadcast %151 : vector<8x1xf32> to vector<8x8xf32>
    %154 = vector.broadcast %152 : vector<1x8xf32> to vector<8x8xf32>
    %155 = arith.subf %153, %154 : vector<8x8xf32>
    %156 = math.absf %155 : vector<8x8xf32>
    %157 = arith.addf %150, %156 : vector<8x8xf32>
    %c0_67 = arith.constant 0 : index
    %c22 = arith.constant 22 : index
    %158 = vector.load %arg1[%c0_67, %c22] : memref<8x128xf32, #tpu.memory_space<vmem>>, vector<8x1xf32>
    %c22_68 = arith.constant 22 : index
    %c0_69 = arith.constant 0 : index
    %159 = vector.load %arg2[%c22_68, %c0_69] : memref<128x8xf32, #tpu.memory_space<vmem>>, vector<1x8xf32>
    %160 = vector.broadcast %158 : vector<8x1xf32> to vector<8x8xf32>
    %161 = vector.broadcast %159 : vector<1x8xf32> to vector<8x8xf32>
    %162 = arith.subf %160, %161 : vector<8x8xf32>
    %163 = math.absf %162 : vector<8x8xf32>
    %164 = arith.addf %157, %163 : vector<8x8xf32>
    %c0_70 = arith.constant 0 : index
    %c23 = arith.constant 23 : index
    %165 = vector.load %arg1[%c0_70, %c23] : memref<8x128xf32, #tpu.memory_space<vmem>>, vector<8x1xf32>
    %c23_71 = arith.constant 23 : index
    %c0_72 = arith.constant 0 : index
    %166 = vector.load %arg2[%c23_71, %c0_72] : memref<128x8xf32, #tpu.memory_space<vmem>>, vector<1x8xf32>
    %167 = vector.broadcast %165 : vector<8x1xf32> to vector<8x8xf32>
    %168 = vector.broadcast %166 : vector<1x8xf32> to vector<8x8xf32>
    %169 = arith.subf %167, %168 : vector<8x8xf32>
    %170 = math.absf %169 : vector<8x8xf32>
    %171 = arith.addf %164, %170 : vector<8x8xf32>
    %c0_73 = arith.constant 0 : index
    %c24 = arith.constant 24 : index
    %172 = vector.load %arg1[%c0_73, %c24] : memref<8x128xf32, #tpu.memory_space<vmem>>, vector<8x1xf32>
    %c24_74 = arith.constant 24 : index
    %c0_75 = arith.constant 0 : index
    %173 = vector.load %arg2[%c24_74, %c0_75] : memref<128x8xf32, #tpu.memory_space<vmem>>, vector<1x8xf32>
    %174 = vector.broadcast %172 : vector<8x1xf32> to vector<8x8xf32>
    %175 = vector.broadcast %173 : vector<1x8xf32> to vector<8x8xf32>
    %176 = arith.subf %174, %175 : vector<8x8xf32>
    %177 = math.absf %176 : vector<8x8xf32>
    %178 = arith.addf %171, %177 : vector<8x8xf32>
    %c0_76 = arith.constant 0 : index
    %c25 = arith.constant 25 : index
    %179 = vector.load %arg1[%c0_76, %c25] : memref<8x128xf32, #tpu.memory_space<vmem>>, vector<8x1xf32>
    %c25_77 = arith.constant 25 : index
    %c0_78 = arith.constant 0 : index
    %180 = vector.load %arg2[%c25_77, %c0_78] : memref<128x8xf32, #tpu.memory_space<vmem>>, vector<1x8xf32>
    %181 = vector.broadcast %179 : vector<8x1xf32> to vector<8x8xf32>
    %182 = vector.broadcast %180 : vector<1x8xf32> to vector<8x8xf32>
    %183 = arith.subf %181, %182 : vector<8x8xf32>
    %184 = math.absf %183 : vector<8x8xf32>
    %185 = arith.addf %178, %184 : vector<8x8xf32>
    %c0_79 = arith.constant 0 : index
    %c26 = arith.constant 26 : index
    %186 = vector.load %arg1[%c0_79, %c26] : memref<8x128xf32, #tpu.memory_space<vmem>>, vector<8x1xf32>
    %c26_80 = arith.constant 26 : index
    %c0_81 = arith.constant 0 : index
    %187 = vector.load %arg2[%c26_80, %c0_81] : memref<128x8xf32, #tpu.memory_space<vmem>>, vector<1x8xf32>
    %188 = vector.broadcast %186 : vector<8x1xf32> to vector<8x8xf32>
    %189 = vector.broadcast %187 : vector<1x8xf32> to vector<8x8xf32>
    %190 = arith.subf %188, %189 : vector<8x8xf32>
    %191 = math.absf %190 : vector<8x8xf32>
    %192 = arith.addf %185, %191 : vector<8x8xf32>
    %c0_82 = arith.constant 0 : index
    %c27 = arith.constant 27 : index
    %193 = vector.load %arg1[%c0_82, %c27] : memref<8x128xf32, #tpu.memory_space<vmem>>, vector<8x1xf32>
    %c27_83 = arith.constant 27 : index
    %c0_84 = arith.constant 0 : index
    %194 = vector.load %arg2[%c27_83, %c0_84] : memref<128x8xf32, #tpu.memory_space<vmem>>, vector<1x8xf32>
    %195 = vector.broadcast %193 : vector<8x1xf32> to vector<8x8xf32>
    %196 = vector.broadcast %194 : vector<1x8xf32> to vector<8x8xf32>
    %197 = arith.subf %195, %196 : vector<8x8xf32>
    %198 = math.absf %197 : vector<8x8xf32>
    %199 = arith.addf %192, %198 : vector<8x8xf32>
    %c0_85 = arith.constant 0 : index
    %c28 = arith.constant 28 : index
    %200 = vector.load %arg1[%c0_85, %c28] : memref<8x128xf32, #tpu.memory_space<vmem>>, vector<8x1xf32>
    %c28_86 = arith.constant 28 : index
    %c0_87 = arith.constant 0 : index
    %201 = vector.load %arg2[%c28_86, %c0_87] : memref<128x8xf32, #tpu.memory_space<vmem>>, vector<1x8xf32>
    %202 = vector.broadcast %200 : vector<8x1xf32> to vector<8x8xf32>
    %203 = vector.broadcast %201 : vector<1x8xf32> to vector<8x8xf32>
    %204 = arith.subf %202, %203 : vector<8x8xf32>
    %205 = math.absf %204 : vector<8x8xf32>
    %206 = arith.addf %199, %205 : vector<8x8xf32>
    %c0_88 = arith.constant 0 : index
    %c29 = arith.constant 29 : index
    %207 = vector.load %arg1[%c0_88, %c29] : memref<8x128xf32, #tpu.memory_space<vmem>>, vector<8x1xf32>
    %c29_89 = arith.constant 29 : index
    %c0_90 = arith.constant 0 : index
    %208 = vector.load %arg2[%c29_89, %c0_90] : memref<128x8xf32, #tpu.memory_space<vmem>>, vector<1x8xf32>
    %209 = vector.broadcast %207 : vector<8x1xf32> to vector<8x8xf32>
    %210 = vector.broadcast %208 : vector<1x8xf32> to vector<8x8xf32>
    %211 = arith.subf %209, %210 : vector<8x8xf32>
    %212 = math.absf %211 : vector<8x8xf32>
    %213 = arith.addf %206, %212 : vector<8x8xf32>
    %c0_91 = arith.constant 0 : index
    %c30 = arith.constant 30 : index
    %214 = vector.load %arg1[%c0_91, %c30] : memref<8x128xf32, #tpu.memory_space<vmem>>, vector<8x1xf32>
    %c30_92 = arith.constant 30 : index
    %c0_93 = arith.constant 0 : index
    %215 = vector.load %arg2[%c30_92, %c0_93] : memref<128x8xf32, #tpu.memory_space<vmem>>, vector<1x8xf32>
    %216 = vector.broadcast %214 : vector<8x1xf32> to vector<8x8xf32>
    %217 = vector.broadcast %215 : vector<1x8xf32> to vector<8x8xf32>
    %218 = arith.subf %216, %217 : vector<8x8xf32>
    %219 = math.absf %218 : vector<8x8xf32>
    %220 = arith.addf %213, %219 : vector<8x8xf32>
    %c0_94 = arith.constant 0 : index
    %c31 = arith.constant 31 : index
    %221 = vector.load %arg1[%c0_94, %c31] : memref<8x128xf32, #tpu.memory_space<vmem>>, vector<8x1xf32>
    %c31_95 = arith.constant 31 : index
    %c0_96 = arith.constant 0 : index
    %222 = vector.load %arg2[%c31_95, %c0_96] : memref<128x8xf32, #tpu.memory_space<vmem>>, vector<1x8xf32>
    %223 = vector.broadcast %221 : vector<8x1xf32> to vector<8x8xf32>
    %224 = vector.broadcast %222 : vector<1x8xf32> to vector<8x8xf32>
    %225 = arith.subf %223, %224 : vector<8x8xf32>
    %226 = math.absf %225 : vector<8x8xf32>
    %227 = arith.addf %220, %226 : vector<8x8xf32>
    %c0_97 = arith.constant 0 : index
    %c32 = arith.constant 32 : index
    %228 = vector.load %arg1[%c0_97, %c32] : memref<8x128xf32, #tpu.memory_space<vmem>>, vector<8x1xf32>
    %c32_98 = arith.constant 32 : index
    %c0_99 = arith.constant 0 : index
    %229 = vector.load %arg2[%c32_98, %c0_99] : memref<128x8xf32, #tpu.memory_space<vmem>>, vector<1x8xf32>
    %230 = vector.broadcast %228 : vector<8x1xf32> to vector<8x8xf32>
    %231 = vector.broadcast %229 : vector<1x8xf32> to vector<8x8xf32>
    %232 = arith.subf %230, %231 : vector<8x8xf32>
    %233 = math.absf %232 : vector<8x8xf32>
    %234 = arith.addf %227, %233 : vector<8x8xf32>
    %c0_100 = arith.constant 0 : index
    %c33 = arith.constant 33 : index
    %235 = vector.load %arg1[%c0_100, %c33] : memref<8x128xf32, #tpu.memory_space<vmem>>, vector<8x1xf32>
    %c33_101 = arith.constant 33 : index
    %c0_102 = arith.constant 0 : index
    %236 = vector.load %arg2[%c33_101, %c0_102] : memref<128x8xf32, #tpu.memory_space<vmem>>, vector<1x8xf32>
    %237 = vector.broadcast %235 : vector<8x1xf32> to vector<8x8xf32>
    %238 = vector.broadcast %236 : vector<1x8xf32> to vector<8x8xf32>
    %239 = arith.subf %237, %238 : vector<8x8xf32>
    %240 = math.absf %239 : vector<8x8xf32>
    %241 = arith.addf %234, %240 : vector<8x8xf32>
    %c0_103 = arith.constant 0 : index
    %c34 = arith.constant 34 : index
    %242 = vector.load %arg1[%c0_103, %c34] : memref<8x128xf32, #tpu.memory_space<vmem>>, vector<8x1xf32>
    %c34_104 = arith.constant 34 : index
    %c0_105 = arith.constant 0 : index
    %243 = vector.load %arg2[%c34_104, %c0_105] : memref<128x8xf32, #tpu.memory_space<vmem>>, vector<1x8xf32>
    %244 = vector.broadcast %242 : vector<8x1xf32> to vector<8x8xf32>
    %245 = vector.broadcast %243 : vector<1x8xf32> to vector<8x8xf32>
    %246 = arith.subf %244, %245 : vector<8x8xf32>
    %247 = math.absf %246 : vector<8x8xf32>
    %248 = arith.addf %241, %247 : vector<8x8xf32>
    %c0_106 = arith.constant 0 : index
    %c35 = arith.constant 35 : index
    %249 = vector.load %arg1[%c0_106, %c35] : memref<8x128xf32, #tpu.memory_space<vmem>>, vector<8x1xf32>
    %c35_107 = arith.constant 35 : index
    %c0_108 = arith.constant 0 : index
    %250 = vector.load %arg2[%c35_107, %c0_108] : memref<128x8xf32, #tpu.memory_space<vmem>>, vector<1x8xf32>
    %251 = vector.broadcast %249 : vector<8x1xf32> to vector<8x8xf32>
    %252 = vector.broadcast %250 : vector<1x8xf32> to vector<8x8xf32>
    %253 = arith.subf %251, %252 : vector<8x8xf32>
    %254 = math.absf %253 : vector<8x8xf32>
    %255 = arith.addf %248, %254 : vector<8x8xf32>
    %c0_109 = arith.constant 0 : index
    %c36 = arith.constant 36 : index
    %256 = vector.load %arg1[%c0_109, %c36] : memref<8x128xf32, #tpu.memory_space<vmem>>, vector<8x1xf32>
    %c36_110 = arith.constant 36 : index
    %c0_111 = arith.constant 0 : index
    %257 = vector.load %arg2[%c36_110, %c0_111] : memref<128x8xf32, #tpu.memory_space<vmem>>, vector<1x8xf32>
    %258 = vector.broadcast %256 : vector<8x1xf32> to vector<8x8xf32>
    %259 = vector.broadcast %257 : vector<1x8xf32> to vector<8x8xf32>
    %260 = arith.subf %258, %259 : vector<8x8xf32>
    %261 = math.absf %260 : vector<8x8xf32>
    %262 = arith.addf %255, %261 : vector<8x8xf32>
    %c0_112 = arith.constant 0 : index
    %c37 = arith.constant 37 : index
    %263 = vector.load %arg1[%c0_112, %c37] : memref<8x128xf32, #tpu.memory_space<vmem>>, vector<8x1xf32>
    %c37_113 = arith.constant 37 : index
    %c0_114 = arith.constant 0 : index
    %264 = vector.load %arg2[%c37_113, %c0_114] : memref<128x8xf32, #tpu.memory_space<vmem>>, vector<1x8xf32>
    %265 = vector.broadcast %263 : vector<8x1xf32> to vector<8x8xf32>
    %266 = vector.broadcast %264 : vector<1x8xf32> to vector<8x8xf32>
    %267 = arith.subf %265, %266 : vector<8x8xf32>
    %268 = math.absf %267 : vector<8x8xf32>
    %269 = arith.addf %262, %268 : vector<8x8xf32>
    %c0_115 = arith.constant 0 : index
    %c38 = arith.constant 38 : index
    %270 = vector.load %arg1[%c0_115, %c38] : memref<8x128xf32, #tpu.memory_space<vmem>>, vector<8x1xf32>
    %c38_116 = arith.constant 38 : index
    %c0_117 = arith.constant 0 : index
    %271 = vector.load %arg2[%c38_116, %c0_117] : memref<128x8xf32, #tpu.memory_space<vmem>>, vector<1x8xf32>
    %272 = vector.broadcast %270 : vector<8x1xf32> to vector<8x8xf32>
    %273 = vector.broadcast %271 : vector<1x8xf32> to vector<8x8xf32>
    %274 = arith.subf %272, %273 : vector<8x8xf32>
    %275 = math.absf %274 : vector<8x8xf32>
    %276 = arith.addf %269, %275 : vector<8x8xf32>
    %c0_118 = arith.constant 0 : index
    %c39 = arith.constant 39 : index
    %277 = vector.load %arg1[%c0_118, %c39] : memref<8x128xf32, #tpu.memory_space<vmem>>, vector<8x1xf32>
    %c39_119 = arith.constant 39 : index
    %c0_120 = arith.constant 0 : index
    %278 = vector.load %arg2[%c39_119, %c0_120] : memref<128x8xf32, #tpu.memory_space<vmem>>, vector<1x8xf32>
    %279 = vector.broadcast %277 : vector<8x1xf32> to vector<8x8xf32>
    %280 = vector.broadcast %278 : vector<1x8xf32> to vector<8x8xf32>
    %281 = arith.subf %279, %280 : vector<8x8xf32>
    %282 = math.absf %281 : vector<8x8xf32>
    %283 = arith.addf %276, %282 : vector<8x8xf32>
    %c0_121 = arith.constant 0 : index
    %c40 = arith.constant 40 : index
    %284 = vector.load %arg1[%c0_121, %c40] : memref<8x128xf32, #tpu.memory_space<vmem>>, vector<8x1xf32>
    %c40_122 = arith.constant 40 : index
    %c0_123 = arith.constant 0 : index
    %285 = vector.load %arg2[%c40_122, %c0_123] : memref<128x8xf32, #tpu.memory_space<vmem>>, vector<1x8xf32>
    %286 = vector.broadcast %284 : vector<8x1xf32> to vector<8x8xf32>
    %287 = vector.broadcast %285 : vector<1x8xf32> to vector<8x8xf32>
    %288 = arith.subf %286, %287 : vector<8x8xf32>
    %289 = math.absf %288 : vector<8x8xf32>
    %290 = arith.addf %283, %289 : vector<8x8xf32>
    %c0_124 = arith.constant 0 : index
    %c41 = arith.constant 41 : index
    %291 = vector.load %arg1[%c0_124, %c41] : memref<8x128xf32, #tpu.memory_space<vmem>>, vector<8x1xf32>
    %c41_125 = arith.constant 41 : index
    %c0_126 = arith.constant 0 : index
    %292 = vector.load %arg2[%c41_125, %c0_126] : memref<128x8xf32, #tpu.memory_space<vmem>>, vector<1x8xf32>
    %293 = vector.broadcast %291 : vector<8x1xf32> to vector<8x8xf32>
    %294 = vector.broadcast %292 : vector<1x8xf32> to vector<8x8xf32>
    %295 = arith.subf %293, %294 : vector<8x8xf32>
    %296 = math.absf %295 : vector<8x8xf32>
    %297 = arith.addf %290, %296 : vector<8x8xf32>
    %c0_127 = arith.constant 0 : index
    %c42 = arith.constant 42 : index
    %298 = vector.load %arg1[%c0_127, %c42] : memref<8x128xf32, #tpu.memory_space<vmem>>, vector<8x1xf32>
    %c42_128 = arith.constant 42 : index
    %c0_129 = arith.constant 0 : index
    %299 = vector.load %arg2[%c42_128, %c0_129] : memref<128x8xf32, #tpu.memory_space<vmem>>, vector<1x8xf32>
    %300 = vector.broadcast %298 : vector<8x1xf32> to vector<8x8xf32>
    %301 = vector.broadcast %299 : vector<1x8xf32> to vector<8x8xf32>
    %302 = arith.subf %300, %301 : vector<8x8xf32>
    %303 = math.absf %302 : vector<8x8xf32>
    %304 = arith.addf %297, %303 : vector<8x8xf32>
    %c0_130 = arith.constant 0 : index
    %c43 = arith.constant 43 : index
    %305 = vector.load %arg1[%c0_130, %c43] : memref<8x128xf32, #tpu.memory_space<vmem>>, vector<8x1xf32>
    %c43_131 = arith.constant 43 : index
    %c0_132 = arith.constant 0 : index
    %306 = vector.load %arg2[%c43_131, %c0_132] : memref<128x8xf32, #tpu.memory_space<vmem>>, vector<1x8xf32>
    %307 = vector.broadcast %305 : vector<8x1xf32> to vector<8x8xf32>
    %308 = vector.broadcast %306 : vector<1x8xf32> to vector<8x8xf32>
    %309 = arith.subf %307, %308 : vector<8x8xf32>
    %310 = math.absf %309 : vector<8x8xf32>
    %311 = arith.addf %304, %310 : vector<8x8xf32>
    %c0_133 = arith.constant 0 : index
    %c44 = arith.constant 44 : index
    %312 = vector.load %arg1[%c0_133, %c44] : memref<8x128xf32, #tpu.memory_space<vmem>>, vector<8x1xf32>
    %c44_134 = arith.constant 44 : index
    %c0_135 = arith.constant 0 : index
    %313 = vector.load %arg2[%c44_134, %c0_135] : memref<128x8xf32, #tpu.memory_space<vmem>>, vector<1x8xf32>
    %314 = vector.broadcast %312 : vector<8x1xf32> to vector<8x8xf32>
    %315 = vector.broadcast %313 : vector<1x8xf32> to vector<8x8xf32>
    %316 = arith.subf %314, %315 : vector<8x8xf32>
    %317 = math.absf %316 : vector<8x8xf32>
    %318 = arith.addf %311, %317 : vector<8x8xf32>
    %c0_136 = arith.constant 0 : index
    %c45 = arith.constant 45 : index
    %319 = vector.load %arg1[%c0_136, %c45] : memref<8x128xf32, #tpu.memory_space<vmem>>, vector<8x1xf32>
    %c45_137 = arith.constant 45 : index
    %c0_138 = arith.constant 0 : index
    %320 = vector.load %arg2[%c45_137, %c0_138] : memref<128x8xf32, #tpu.memory_space<vmem>>, vector<1x8xf32>
    %321 = vector.broadcast %319 : vector<8x1xf32> to vector<8x8xf32>
    %322 = vector.broadcast %320 : vector<1x8xf32> to vector<8x8xf32>
    %323 = arith.subf %321, %322 : vector<8x8xf32>
    %324 = math.absf %323 : vector<8x8xf32>
    %325 = arith.addf %318, %324 : vector<8x8xf32>
    %c0_139 = arith.constant 0 : index
    %c46 = arith.constant 46 : index
    %326 = vector.load %arg1[%c0_139, %c46] : memref<8x128xf32, #tpu.memory_space<vmem>>, vector<8x1xf32>
    %c46_140 = arith.constant 46 : index
    %c0_141 = arith.constant 0 : index
    %327 = vector.load %arg2[%c46_140, %c0_141] : memref<128x8xf32, #tpu.memory_space<vmem>>, vector<1x8xf32>
    %328 = vector.broadcast %326 : vector<8x1xf32> to vector<8x8xf32>
    %329 = vector.broadcast %327 : vector<1x8xf32> to vector<8x8xf32>
    %330 = arith.subf %328, %329 : vector<8x8xf32>
    %331 = math.absf %330 : vector<8x8xf32>
    %332 = arith.addf %325, %331 : vector<8x8xf32>
    %c0_142 = arith.constant 0 : index
    %c47 = arith.constant 47 : index
    %333 = vector.load %arg1[%c0_142, %c47] : memref<8x128xf32, #tpu.memory_space<vmem>>, vector<8x1xf32>
    %c47_143 = arith.constant 47 : index
    %c0_144 = arith.constant 0 : index
    %334 = vector.load %arg2[%c47_143, %c0_144] : memref<128x8xf32, #tpu.memory_space<vmem>>, vector<1x8xf32>
    %335 = vector.broadcast %333 : vector<8x1xf32> to vector<8x8xf32>
    %336 = vector.broadcast %334 : vector<1x8xf32> to vector<8x8xf32>
    %337 = arith.subf %335, %336 : vector<8x8xf32>
    %338 = math.absf %337 : vector<8x8xf32>
    %339 = arith.addf %332, %338 : vector<8x8xf32>
    %c0_145 = arith.constant 0 : index
    %c48 = arith.constant 48 : index
    %340 = vector.load %arg1[%c0_145, %c48] : memref<8x128xf32, #tpu.memory_space<vmem>>, vector<8x1xf32>
    %c48_146 = arith.constant 48 : index
    %c0_147 = arith.constant 0 : index
    %341 = vector.load %arg2[%c48_146, %c0_147] : memref<128x8xf32, #tpu.memory_space<vmem>>, vector<1x8xf32>
    %342 = vector.broadcast %340 : vector<8x1xf32> to vector<8x8xf32>
    %343 = vector.broadcast %341 : vector<1x8xf32> to vector<8x8xf32>
    %344 = arith.subf %342, %343 : vector<8x8xf32>
    %345 = math.absf %344 : vector<8x8xf32>
    %346 = arith.addf %339, %345 : vector<8x8xf32>
    %c0_148 = arith.constant 0 : index
    %c49 = arith.constant 49 : index
    %347 = vector.load %arg1[%c0_148, %c49] : memref<8x128xf32, #tpu.memory_space<vmem>>, vector<8x1xf32>
    %c49_149 = arith.constant 49 : index
    %c0_150 = arith.constant 0 : index
    %348 = vector.load %arg2[%c49_149, %c0_150] : memref<128x8xf32, #tpu.memory_space<vmem>>, vector<1x8xf32>
    %349 = vector.broadcast %347 : vector<8x1xf32> to vector<8x8xf32>
    %350 = vector.broadcast %348 : vector<1x8xf32> to vector<8x8xf32>
    %351 = arith.subf %349, %350 : vector<8x8xf32>
    %352 = math.absf %351 : vector<8x8xf32>
    %353 = arith.addf %346, %352 : vector<8x8xf32>
    %c0_151 = arith.constant 0 : index
    %c50 = arith.constant 50 : index
    %354 = vector.load %arg1[%c0_151, %c50] : memref<8x128xf32, #tpu.memory_space<vmem>>, vector<8x1xf32>
    %c50_152 = arith.constant 50 : index
    %c0_153 = arith.constant 0 : index
    %355 = vector.load %arg2[%c50_152, %c0_153] : memref<128x8xf32, #tpu.memory_space<vmem>>, vector<1x8xf32>
    %356 = vector.broadcast %354 : vector<8x1xf32> to vector<8x8xf32>
    %357 = vector.broadcast %355 : vector<1x8xf32> to vector<8x8xf32>
    %358 = arith.subf %356, %357 : vector<8x8xf32>
    %359 = math.absf %358 : vector<8x8xf32>
    %360 = arith.addf %353, %359 : vector<8x8xf32>
    %c0_154 = arith.constant 0 : index
    %c51 = arith.constant 51 : index
    %361 = vector.load %arg1[%c0_154, %c51] : memref<8x128xf32, #tpu.memory_space<vmem>>, vector<8x1xf32>
    %c51_155 = arith.constant 51 : index
    %c0_156 = arith.constant 0 : index
    %362 = vector.load %arg2[%c51_155, %c0_156] : memref<128x8xf32, #tpu.memory_space<vmem>>, vector<1x8xf32>
    %363 = vector.broadcast %361 : vector<8x1xf32> to vector<8x8xf32>
    %364 = vector.broadcast %362 : vector<1x8xf32> to vector<8x8xf32>
    %365 = arith.subf %363, %364 : vector<8x8xf32>
    %366 = math.absf %365 : vector<8x8xf32>
    %367 = arith.addf %360, %366 : vector<8x8xf32>
    %c0_157 = arith.constant 0 : index
    %c52 = arith.constant 52 : index
    %368 = vector.load %arg1[%c0_157, %c52] : memref<8x128xf32, #tpu.memory_space<vmem>>, vector<8x1xf32>
    %c52_158 = arith.constant 52 : index
    %c0_159 = arith.constant 0 : index
    %369 = vector.load %arg2[%c52_158, %c0_159] : memref<128x8xf32, #tpu.memory_space<vmem>>, vector<1x8xf32>
    %370 = vector.broadcast %368 : vector<8x1xf32> to vector<8x8xf32>
    %371 = vector.broadcast %369 : vector<1x8xf32> to vector<8x8xf32>
    %372 = arith.subf %370, %371 : vector<8x8xf32>
    %373 = math.absf %372 : vector<8x8xf32>
    %374 = arith.addf %367, %373 : vector<8x8xf32>
    %c0_160 = arith.constant 0 : index
    %c53 = arith.constant 53 : index
    %375 = vector.load %arg1[%c0_160, %c53] : memref<8x128xf32, #tpu.memory_space<vmem>>, vector<8x1xf32>
    %c53_161 = arith.constant 53 : index
    %c0_162 = arith.constant 0 : index
    %376 = vector.load %arg2[%c53_161, %c0_162] : memref<128x8xf32, #tpu.memory_space<vmem>>, vector<1x8xf32>
    %377 = vector.broadcast %375 : vector<8x1xf32> to vector<8x8xf32>
    %378 = vector.broadcast %376 : vector<1x8xf32> to vector<8x8xf32>
    %379 = arith.subf %377, %378 : vector<8x8xf32>
    %380 = math.absf %379 : vector<8x8xf32>
    %381 = arith.addf %374, %380 : vector<8x8xf32>
    %c0_163 = arith.constant 0 : index
    %c54 = arith.constant 54 : index
    %382 = vector.load %arg1[%c0_163, %c54] : memref<8x128xf32, #tpu.memory_space<vmem>>, vector<8x1xf32>
    %c54_164 = arith.constant 54 : index
    %c0_165 = arith.constant 0 : index
    %383 = vector.load %arg2[%c54_164, %c0_165] : memref<128x8xf32, #tpu.memory_space<vmem>>, vector<1x8xf32>
    %384 = vector.broadcast %382 : vector<8x1xf32> to vector<8x8xf32>
    %385 = vector.broadcast %383 : vector<1x8xf32> to vector<8x8xf32>
    %386 = arith.subf %384, %385 : vector<8x8xf32>
    %387 = math.absf %386 : vector<8x8xf32>
    %388 = arith.addf %381, %387 : vector<8x8xf32>
    %c0_166 = arith.constant 0 : index
    %c55 = arith.constant 55 : index
    %389 = vector.load %arg1[%c0_166, %c55] : memref<8x128xf32, #tpu.memory_space<vmem>>, vector<8x1xf32>
    %c55_167 = arith.constant 55 : index
    %c0_168 = arith.constant 0 : index
    %390 = vector.load %arg2[%c55_167, %c0_168] : memref<128x8xf32, #tpu.memory_space<vmem>>, vector<1x8xf32>
    %391 = vector.broadcast %389 : vector<8x1xf32> to vector<8x8xf32>
    %392 = vector.broadcast %390 : vector<1x8xf32> to vector<8x8xf32>
    %393 = arith.subf %391, %392 : vector<8x8xf32>
    %394 = math.absf %393 : vector<8x8xf32>
    %395 = arith.addf %388, %394 : vector<8x8xf32>
    %c0_169 = arith.constant 0 : index
    %c56 = arith.constant 56 : index
    %396 = vector.load %arg1[%c0_169, %c56] : memref<8x128xf32, #tpu.memory_space<vmem>>, vector<8x1xf32>
    %c56_170 = arith.constant 56 : index
    %c0_171 = arith.constant 0 : index
    %397 = vector.load %arg2[%c56_170, %c0_171] : memref<128x8xf32, #tpu.memory_space<vmem>>, vector<1x8xf32>
    %398 = vector.broadcast %396 : vector<8x1xf32> to vector<8x8xf32>
    %399 = vector.broadcast %397 : vector<1x8xf32> to vector<8x8xf32>
    %400 = arith.subf %398, %399 : vector<8x8xf32>
    %401 = math.absf %400 : vector<8x8xf32>
    %402 = arith.addf %395, %401 : vector<8x8xf32>
    %c0_172 = arith.constant 0 : index
    %c57 = arith.constant 57 : index
    %403 = vector.load %arg1[%c0_172, %c57] : memref<8x128xf32, #tpu.memory_space<vmem>>, vector<8x1xf32>
    %c57_173 = arith.constant 57 : index
    %c0_174 = arith.constant 0 : index
    %404 = vector.load %arg2[%c57_173, %c0_174] : memref<128x8xf32, #tpu.memory_space<vmem>>, vector<1x8xf32>
    %405 = vector.broadcast %403 : vector<8x1xf32> to vector<8x8xf32>
    %406 = vector.broadcast %404 : vector<1x8xf32> to vector<8x8xf32>
    %407 = arith.subf %405, %406 : vector<8x8xf32>
    %408 = math.absf %407 : vector<8x8xf32>
    %409 = arith.addf %402, %408 : vector<8x8xf32>
    %c0_175 = arith.constant 0 : index
    %c58 = arith.constant 58 : index
    %410 = vector.load %arg1[%c0_175, %c58] : memref<8x128xf32, #tpu.memory_space<vmem>>, vector<8x1xf32>
    %c58_176 = arith.constant 58 : index
    %c0_177 = arith.constant 0 : index
    %411 = vector.load %arg2[%c58_176, %c0_177] : memref<128x8xf32, #tpu.memory_space<vmem>>, vector<1x8xf32>
    %412 = vector.broadcast %410 : vector<8x1xf32> to vector<8x8xf32>
    %413 = vector.broadcast %411 : vector<1x8xf32> to vector<8x8xf32>
    %414 = arith.subf %412, %413 : vector<8x8xf32>
    %415 = math.absf %414 : vector<8x8xf32>
    %416 = arith.addf %409, %415 : vector<8x8xf32>
    %c0_178 = arith.constant 0 : index
    %c59 = arith.constant 59 : index
    %417 = vector.load %arg1[%c0_178, %c59] : memref<8x128xf32, #tpu.memory_space<vmem>>, vector<8x1xf32>
    %c59_179 = arith.constant 59 : index
    %c0_180 = arith.constant 0 : index
    %418 = vector.load %arg2[%c59_179, %c0_180] : memref<128x8xf32, #tpu.memory_space<vmem>>, vector<1x8xf32>
    %419 = vector.broadcast %417 : vector<8x1xf32> to vector<8x8xf32>
    %420 = vector.broadcast %418 : vector<1x8xf32> to vector<8x8xf32>
    %421 = arith.subf %419, %420 : vector<8x8xf32>
    %422 = math.absf %421 : vector<8x8xf32>
    %423 = arith.addf %416, %422 : vector<8x8xf32>
    %c0_181 = arith.constant 0 : index
    %c60 = arith.constant 60 : index
    %424 = vector.load %arg1[%c0_181, %c60] : memref<8x128xf32, #tpu.memory_space<vmem>>, vector<8x1xf32>
    %c60_182 = arith.constant 60 : index
    %c0_183 = arith.constant 0 : index
    %425 = vector.load %arg2[%c60_182, %c0_183] : memref<128x8xf32, #tpu.memory_space<vmem>>, vector<1x8xf32>
    %426 = vector.broadcast %424 : vector<8x1xf32> to vector<8x8xf32>
    %427 = vector.broadcast %425 : vector<1x8xf32> to vector<8x8xf32>
    %428 = arith.subf %426, %427 : vector<8x8xf32>
    %429 = math.absf %428 : vector<8x8xf32>
    %430 = arith.addf %423, %429 : vector<8x8xf32>
    %c0_184 = arith.constant 0 : index
    %c61 = arith.constant 61 : index
    %431 = vector.load %arg1[%c0_184, %c61] : memref<8x128xf32, #tpu.memory_space<vmem>>, vector<8x1xf32>
    %c61_185 = arith.constant 61 : index
    %c0_186 = arith.constant 0 : index
    %432 = vector.load %arg2[%c61_185, %c0_186] : memref<128x8xf32, #tpu.memory_space<vmem>>, vector<1x8xf32>
    %433 = vector.broadcast %431 : vector<8x1xf32> to vector<8x8xf32>
    %434 = vector.broadcast %432 : vector<1x8xf32> to vector<8x8xf32>
    %435 = arith.subf %433, %434 : vector<8x8xf32>
    %436 = math.absf %435 : vector<8x8xf32>
    %437 = arith.addf %430, %436 : vector<8x8xf32>
    %c0_187 = arith.constant 0 : index
    %c62 = arith.constant 62 : index
    %438 = vector.load %arg1[%c0_187, %c62] : memref<8x128xf32, #tpu.memory_space<vmem>>, vector<8x1xf32>
    %c62_188 = arith.constant 62 : index
    %c0_189 = arith.constant 0 : index
    %439 = vector.load %arg2[%c62_188, %c0_189] : memref<128x8xf32, #tpu.memory_space<vmem>>, vector<1x8xf32>
    %440 = vector.broadcast %438 : vector<8x1xf32> to vector<8x8xf32>
    %441 = vector.broadcast %439 : vector<1x8xf32> to vector<8x8xf32>
    %442 = arith.subf %440, %441 : vector<8x8xf32>
    %443 = math.absf %442 : vector<8x8xf32>
    %444 = arith.addf %437, %443 : vector<8x8xf32>
    %c0_190 = arith.constant 0 : index
    %c63 = arith.constant 63 : index
    %445 = vector.load %arg1[%c0_190, %c63] : memref<8x128xf32, #tpu.memory_space<vmem>>, vector<8x1xf32>
    %c63_191 = arith.constant 63 : index
    %c0_192 = arith.constant 0 : index
    %446 = vector.load %arg2[%c63_191, %c0_192] : memref<128x8xf32, #tpu.memory_space<vmem>>, vector<1x8xf32>
    %447 = vector.broadcast %445 : vector<8x1xf32> to vector<8x8xf32>
    %448 = vector.broadcast %446 : vector<1x8xf32> to vector<8x8xf32>
    %449 = arith.subf %447, %448 : vector<8x8xf32>
    %450 = math.absf %449 : vector<8x8xf32>
    %451 = arith.addf %444, %450 : vector<8x8xf32>
    %c0_193 = arith.constant 0 : index
    %c64 = arith.constant 64 : index
    %452 = vector.load %arg1[%c0_193, %c64] : memref<8x128xf32, #tpu.memory_space<vmem>>, vector<8x1xf32>
    %c64_194 = arith.constant 64 : index
    %c0_195 = arith.constant 0 : index
    %453 = vector.load %arg2[%c64_194, %c0_195] : memref<128x8xf32, #tpu.memory_space<vmem>>, vector<1x8xf32>
    %454 = vector.broadcast %452 : vector<8x1xf32> to vector<8x8xf32>
    %455 = vector.broadcast %453 : vector<1x8xf32> to vector<8x8xf32>
    %456 = arith.subf %454, %455 : vector<8x8xf32>
    %457 = math.absf %456 : vector<8x8xf32>
    %458 = arith.addf %451, %457 : vector<8x8xf32>
    %c0_196 = arith.constant 0 : index
    %c65 = arith.constant 65 : index
    %459 = vector.load %arg1[%c0_196, %c65] : memref<8x128xf32, #tpu.memory_space<vmem>>, vector<8x1xf32>
    %c65_197 = arith.constant 65 : index
    %c0_198 = arith.constant 0 : index
    %460 = vector.load %arg2[%c65_197, %c0_198] : memref<128x8xf32, #tpu.memory_space<vmem>>, vector<1x8xf32>
    %461 = vector.broadcast %459 : vector<8x1xf32> to vector<8x8xf32>
    %462 = vector.broadcast %460 : vector<1x8xf32> to vector<8x8xf32>
    %463 = arith.subf %461, %462 : vector<8x8xf32>
    %464 = math.absf %463 : vector<8x8xf32>
    %465 = arith.addf %458, %464 : vector<8x8xf32>
    %c0_199 = arith.constant 0 : index
    %c66 = arith.constant 66 : index
    %466 = vector.load %arg1[%c0_199, %c66] : memref<8x128xf32, #tpu.memory_space<vmem>>, vector<8x1xf32>
    %c66_200 = arith.constant 66 : index
    %c0_201 = arith.constant 0 : index
    %467 = vector.load %arg2[%c66_200, %c0_201] : memref<128x8xf32, #tpu.memory_space<vmem>>, vector<1x8xf32>
    %468 = vector.broadcast %466 : vector<8x1xf32> to vector<8x8xf32>
    %469 = vector.broadcast %467 : vector<1x8xf32> to vector<8x8xf32>
    %470 = arith.subf %468, %469 : vector<8x8xf32>
    %471 = math.absf %470 : vector<8x8xf32>
    %472 = arith.addf %465, %471 : vector<8x8xf32>
    %c0_202 = arith.constant 0 : index
    %c67 = arith.constant 67 : index
    %473 = vector.load %arg1[%c0_202, %c67] : memref<8x128xf32, #tpu.memory_space<vmem>>, vector<8x1xf32>
    %c67_203 = arith.constant 67 : index
    %c0_204 = arith.constant 0 : index
    %474 = vector.load %arg2[%c67_203, %c0_204] : memref<128x8xf32, #tpu.memory_space<vmem>>, vector<1x8xf32>
    %475 = vector.broadcast %473 : vector<8x1xf32> to vector<8x8xf32>
    %476 = vector.broadcast %474 : vector<1x8xf32> to vector<8x8xf32>
    %477 = arith.subf %475, %476 : vector<8x8xf32>
    %478 = math.absf %477 : vector<8x8xf32>
    %479 = arith.addf %472, %478 : vector<8x8xf32>
    %c0_205 = arith.constant 0 : index
    %c68 = arith.constant 68 : index
    %480 = vector.load %arg1[%c0_205, %c68] : memref<8x128xf32, #tpu.memory_space<vmem>>, vector<8x1xf32>
    %c68_206 = arith.constant 68 : index
    %c0_207 = arith.constant 0 : index
    %481 = vector.load %arg2[%c68_206, %c0_207] : memref<128x8xf32, #tpu.memory_space<vmem>>, vector<1x8xf32>
    %482 = vector.broadcast %480 : vector<8x1xf32> to vector<8x8xf32>
    %483 = vector.broadcast %481 : vector<1x8xf32> to vector<8x8xf32>
    %484 = arith.subf %482, %483 : vector<8x8xf32>
    %485 = math.absf %484 : vector<8x8xf32>
    %486 = arith.addf %479, %485 : vector<8x8xf32>
    %c0_208 = arith.constant 0 : index
    %c69 = arith.constant 69 : index
    %487 = vector.load %arg1[%c0_208, %c69] : memref<8x128xf32, #tpu.memory_space<vmem>>, vector<8x1xf32>
    %c69_209 = arith.constant 69 : index
    %c0_210 = arith.constant 0 : index
    %488 = vector.load %arg2[%c69_209, %c0_210] : memref<128x8xf32, #tpu.memory_space<vmem>>, vector<1x8xf32>
    %489 = vector.broadcast %487 : vector<8x1xf32> to vector<8x8xf32>
    %490 = vector.broadcast %488 : vector<1x8xf32> to vector<8x8xf32>
    %491 = arith.subf %489, %490 : vector<8x8xf32>
    %492 = math.absf %491 : vector<8x8xf32>
    %493 = arith.addf %486, %492 : vector<8x8xf32>
    %c0_211 = arith.constant 0 : index
    %c70 = arith.constant 70 : index
    %494 = vector.load %arg1[%c0_211, %c70] : memref<8x128xf32, #tpu.memory_space<vmem>>, vector<8x1xf32>
    %c70_212 = arith.constant 70 : index
    %c0_213 = arith.constant 0 : index
    %495 = vector.load %arg2[%c70_212, %c0_213] : memref<128x8xf32, #tpu.memory_space<vmem>>, vector<1x8xf32>
    %496 = vector.broadcast %494 : vector<8x1xf32> to vector<8x8xf32>
    %497 = vector.broadcast %495 : vector<1x8xf32> to vector<8x8xf32>
    %498 = arith.subf %496, %497 : vector<8x8xf32>
    %499 = math.absf %498 : vector<8x8xf32>
    %500 = arith.addf %493, %499 : vector<8x8xf32>
    %c0_214 = arith.constant 0 : index
    %c71 = arith.constant 71 : index
    %501 = vector.load %arg1[%c0_214, %c71] : memref<8x128xf32, #tpu.memory_space<vmem>>, vector<8x1xf32>
    %c71_215 = arith.constant 71 : index
    %c0_216 = arith.constant 0 : index
    %502 = vector.load %arg2[%c71_215, %c0_216] : memref<128x8xf32, #tpu.memory_space<vmem>>, vector<1x8xf32>
    %503 = vector.broadcast %501 : vector<8x1xf32> to vector<8x8xf32>
    %504 = vector.broadcast %502 : vector<1x8xf32> to vector<8x8xf32>
    %505 = arith.subf %503, %504 : vector<8x8xf32>
    %506 = math.absf %505 : vector<8x8xf32>
    %507 = arith.addf %500, %506 : vector<8x8xf32>
    %c0_217 = arith.constant 0 : index
    %c72 = arith.constant 72 : index
    %508 = vector.load %arg1[%c0_217, %c72] : memref<8x128xf32, #tpu.memory_space<vmem>>, vector<8x1xf32>
    %c72_218 = arith.constant 72 : index
    %c0_219 = arith.constant 0 : index
    %509 = vector.load %arg2[%c72_218, %c0_219] : memref<128x8xf32, #tpu.memory_space<vmem>>, vector<1x8xf32>
    %510 = vector.broadcast %508 : vector<8x1xf32> to vector<8x8xf32>
    %511 = vector.broadcast %509 : vector<1x8xf32> to vector<8x8xf32>
    %512 = arith.subf %510, %511 : vector<8x8xf32>
    %513 = math.absf %512 : vector<8x8xf32>
    %514 = arith.addf %507, %513 : vector<8x8xf32>
    %c0_220 = arith.constant 0 : index
    %c73 = arith.constant 73 : index
    %515 = vector.load %arg1[%c0_220, %c73] : memref<8x128xf32, #tpu.memory_space<vmem>>, vector<8x1xf32>
    %c73_221 = arith.constant 73 : index
    %c0_222 = arith.constant 0 : index
    %516 = vector.load %arg2[%c73_221, %c0_222] : memref<128x8xf32, #tpu.memory_space<vmem>>, vector<1x8xf32>
    %517 = vector.broadcast %515 : vector<8x1xf32> to vector<8x8xf32>
    %518 = vector.broadcast %516 : vector<1x8xf32> to vector<8x8xf32>
    %519 = arith.subf %517, %518 : vector<8x8xf32>
    %520 = math.absf %519 : vector<8x8xf32>
    %521 = arith.addf %514, %520 : vector<8x8xf32>
    %c0_223 = arith.constant 0 : index
    %c74 = arith.constant 74 : index
    %522 = vector.load %arg1[%c0_223, %c74] : memref<8x128xf32, #tpu.memory_space<vmem>>, vector<8x1xf32>
    %c74_224 = arith.constant 74 : index
    %c0_225 = arith.constant 0 : index
    %523 = vector.load %arg2[%c74_224, %c0_225] : memref<128x8xf32, #tpu.memory_space<vmem>>, vector<1x8xf32>
    %524 = vector.broadcast %522 : vector<8x1xf32> to vector<8x8xf32>
    %525 = vector.broadcast %523 : vector<1x8xf32> to vector<8x8xf32>
    %526 = arith.subf %524, %525 : vector<8x8xf32>
    %527 = math.absf %526 : vector<8x8xf32>
    %528 = arith.addf %521, %527 : vector<8x8xf32>
    %c0_226 = arith.constant 0 : index
    %c75 = arith.constant 75 : index
    %529 = vector.load %arg1[%c0_226, %c75] : memref<8x128xf32, #tpu.memory_space<vmem>>, vector<8x1xf32>
    %c75_227 = arith.constant 75 : index
    %c0_228 = arith.constant 0 : index
    %530 = vector.load %arg2[%c75_227, %c0_228] : memref<128x8xf32, #tpu.memory_space<vmem>>, vector<1x8xf32>
    %531 = vector.broadcast %529 : vector<8x1xf32> to vector<8x8xf32>
    %532 = vector.broadcast %530 : vector<1x8xf32> to vector<8x8xf32>
    %533 = arith.subf %531, %532 : vector<8x8xf32>
    %534 = math.absf %533 : vector<8x8xf32>
    %535 = arith.addf %528, %534 : vector<8x8xf32>
    %c0_229 = arith.constant 0 : index
    %c76 = arith.constant 76 : index
    %536 = vector.load %arg1[%c0_229, %c76] : memref<8x128xf32, #tpu.memory_space<vmem>>, vector<8x1xf32>
    %c76_230 = arith.constant 76 : index
    %c0_231 = arith.constant 0 : index
    %537 = vector.load %arg2[%c76_230, %c0_231] : memref<128x8xf32, #tpu.memory_space<vmem>>, vector<1x8xf32>
    %538 = vector.broadcast %536 : vector<8x1xf32> to vector<8x8xf32>
    %539 = vector.broadcast %537 : vector<1x8xf32> to vector<8x8xf32>
    %540 = arith.subf %538, %539 : vector<8x8xf32>
    %541 = math.absf %540 : vector<8x8xf32>
    %542 = arith.addf %535, %541 : vector<8x8xf32>
    %c0_232 = arith.constant 0 : index
    %c77 = arith.constant 77 : index
    %543 = vector.load %arg1[%c0_232, %c77] : memref<8x128xf32, #tpu.memory_space<vmem>>, vector<8x1xf32>
    %c77_233 = arith.constant 77 : index
    %c0_234 = arith.constant 0 : index
    %544 = vector.load %arg2[%c77_233, %c0_234] : memref<128x8xf32, #tpu.memory_space<vmem>>, vector<1x8xf32>
    %545 = vector.broadcast %543 : vector<8x1xf32> to vector<8x8xf32>
    %546 = vector.broadcast %544 : vector<1x8xf32> to vector<8x8xf32>
    %547 = arith.subf %545, %546 : vector<8x8xf32>
    %548 = math.absf %547 : vector<8x8xf32>
    %549 = arith.addf %542, %548 : vector<8x8xf32>
    %c0_235 = arith.constant 0 : index
    %c78 = arith.constant 78 : index
    %550 = vector.load %arg1[%c0_235, %c78] : memref<8x128xf32, #tpu.memory_space<vmem>>, vector<8x1xf32>
    %c78_236 = arith.constant 78 : index
    %c0_237 = arith.constant 0 : index
    %551 = vector.load %arg2[%c78_236, %c0_237] : memref<128x8xf32, #tpu.memory_space<vmem>>, vector<1x8xf32>
    %552 = vector.broadcast %550 : vector<8x1xf32> to vector<8x8xf32>
    %553 = vector.broadcast %551 : vector<1x8xf32> to vector<8x8xf32>
    %554 = arith.subf %552, %553 : vector<8x8xf32>
    %555 = math.absf %554 : vector<8x8xf32>
    %556 = arith.addf %549, %555 : vector<8x8xf32>
    %c0_238 = arith.constant 0 : index
    %c79 = arith.constant 79 : index
    %557 = vector.load %arg1[%c0_238, %c79] : memref<8x128xf32, #tpu.memory_space<vmem>>, vector<8x1xf32>
    %c79_239 = arith.constant 79 : index
    %c0_240 = arith.constant 0 : index
    %558 = vector.load %arg2[%c79_239, %c0_240] : memref<128x8xf32, #tpu.memory_space<vmem>>, vector<1x8xf32>
    %559 = vector.broadcast %557 : vector<8x1xf32> to vector<8x8xf32>
    %560 = vector.broadcast %558 : vector<1x8xf32> to vector<8x8xf32>
    %561 = arith.subf %559, %560 : vector<8x8xf32>
    %562 = math.absf %561 : vector<8x8xf32>
    %563 = arith.addf %556, %562 : vector<8x8xf32>
    %c0_241 = arith.constant 0 : index
    %c80 = arith.constant 80 : index
    %564 = vector.load %arg1[%c0_241, %c80] : memref<8x128xf32, #tpu.memory_space<vmem>>, vector<8x1xf32>
    %c80_242 = arith.constant 80 : index
    %c0_243 = arith.constant 0 : index
    %565 = vector.load %arg2[%c80_242, %c0_243] : memref<128x8xf32, #tpu.memory_space<vmem>>, vector<1x8xf32>
    %566 = vector.broadcast %564 : vector<8x1xf32> to vector<8x8xf32>
    %567 = vector.broadcast %565 : vector<1x8xf32> to vector<8x8xf32>
    %568 = arith.subf %566, %567 : vector<8x8xf32>
    %569 = math.absf %568 : vector<8x8xf32>
    %570 = arith.addf %563, %569 : vector<8x8xf32>
    %c0_244 = arith.constant 0 : index
    %c81 = arith.constant 81 : index
    %571 = vector.load %arg1[%c0_244, %c81] : memref<8x128xf32, #tpu.memory_space<vmem>>, vector<8x1xf32>
    %c81_245 = arith.constant 81 : index
    %c0_246 = arith.constant 0 : index
    %572 = vector.load %arg2[%c81_245, %c0_246] : memref<128x8xf32, #tpu.memory_space<vmem>>, vector<1x8xf32>
    %573 = vector.broadcast %571 : vector<8x1xf32> to vector<8x8xf32>
    %574 = vector.broadcast %572 : vector<1x8xf32> to vector<8x8xf32>
    %575 = arith.subf %573, %574 : vector<8x8xf32>
    %576 = math.absf %575 : vector<8x8xf32>
    %577 = arith.addf %570, %576 : vector<8x8xf32>
    %c0_247 = arith.constant 0 : index
    %c82 = arith.constant 82 : index
    %578 = vector.load %arg1[%c0_247, %c82] : memref<8x128xf32, #tpu.memory_space<vmem>>, vector<8x1xf32>
    %c82_248 = arith.constant 82 : index
    %c0_249 = arith.constant 0 : index
    %579 = vector.load %arg2[%c82_248, %c0_249] : memref<128x8xf32, #tpu.memory_space<vmem>>, vector<1x8xf32>
    %580 = vector.broadcast %578 : vector<8x1xf32> to vector<8x8xf32>
    %581 = vector.broadcast %579 : vector<1x8xf32> to vector<8x8xf32>
    %582 = arith.subf %580, %581 : vector<8x8xf32>
    %583 = math.absf %582 : vector<8x8xf32>
    %584 = arith.addf %577, %583 : vector<8x8xf32>
    %c0_250 = arith.constant 0 : index
    %c83 = arith.constant 83 : index
    %585 = vector.load %arg1[%c0_250, %c83] : memref<8x128xf32, #tpu.memory_space<vmem>>, vector<8x1xf32>
    %c83_251 = arith.constant 83 : index
    %c0_252 = arith.constant 0 : index
    %586 = vector.load %arg2[%c83_251, %c0_252] : memref<128x8xf32, #tpu.memory_space<vmem>>, vector<1x8xf32>
    %587 = vector.broadcast %585 : vector<8x1xf32> to vector<8x8xf32>
    %588 = vector.broadcast %586 : vector<1x8xf32> to vector<8x8xf32>
    %589 = arith.subf %587, %588 : vector<8x8xf32>
    %590 = math.absf %589 : vector<8x8xf32>
    %591 = arith.addf %584, %590 : vector<8x8xf32>
    %c0_253 = arith.constant 0 : index
    %c84 = arith.constant 84 : index
    %592 = vector.load %arg1[%c0_253, %c84] : memref<8x128xf32, #tpu.memory_space<vmem>>, vector<8x1xf32>
    %c84_254 = arith.constant 84 : index
    %c0_255 = arith.constant 0 : index
    %593 = vector.load %arg2[%c84_254, %c0_255] : memref<128x8xf32, #tpu.memory_space<vmem>>, vector<1x8xf32>
    %594 = vector.broadcast %592 : vector<8x1xf32> to vector<8x8xf32>
    %595 = vector.broadcast %593 : vector<1x8xf32> to vector<8x8xf32>
    %596 = arith.subf %594, %595 : vector<8x8xf32>
    %597 = math.absf %596 : vector<8x8xf32>
    %598 = arith.addf %591, %597 : vector<8x8xf32>
    %c0_256 = arith.constant 0 : index
    %c85 = arith.constant 85 : index
    %599 = vector.load %arg1[%c0_256, %c85] : memref<8x128xf32, #tpu.memory_space<vmem>>, vector<8x1xf32>
    %c85_257 = arith.constant 85 : index
    %c0_258 = arith.constant 0 : index
    %600 = vector.load %arg2[%c85_257, %c0_258] : memref<128x8xf32, #tpu.memory_space<vmem>>, vector<1x8xf32>
    %601 = vector.broadcast %599 : vector<8x1xf32> to vector<8x8xf32>
    %602 = vector.broadcast %600 : vector<1x8xf32> to vector<8x8xf32>
    %603 = arith.subf %601, %602 : vector<8x8xf32>
    %604 = math.absf %603 : vector<8x8xf32>
    %605 = arith.addf %598, %604 : vector<8x8xf32>
    %c0_259 = arith.constant 0 : index
    %c86 = arith.constant 86 : index
    %606 = vector.load %arg1[%c0_259, %c86] : memref<8x128xf32, #tpu.memory_space<vmem>>, vector<8x1xf32>
    %c86_260 = arith.constant 86 : index
    %c0_261 = arith.constant 0 : index
    %607 = vector.load %arg2[%c86_260, %c0_261] : memref<128x8xf32, #tpu.memory_space<vmem>>, vector<1x8xf32>
    %608 = vector.broadcast %606 : vector<8x1xf32> to vector<8x8xf32>
    %609 = vector.broadcast %607 : vector<1x8xf32> to vector<8x8xf32>
    %610 = arith.subf %608, %609 : vector<8x8xf32>
    %611 = math.absf %610 : vector<8x8xf32>
    %612 = arith.addf %605, %611 : vector<8x8xf32>
    %c0_262 = arith.constant 0 : index
    %c87 = arith.constant 87 : index
    %613 = vector.load %arg1[%c0_262, %c87] : memref<8x128xf32, #tpu.memory_space<vmem>>, vector<8x1xf32>
    %c87_263 = arith.constant 87 : index
    %c0_264 = arith.constant 0 : index
    %614 = vector.load %arg2[%c87_263, %c0_264] : memref<128x8xf32, #tpu.memory_space<vmem>>, vector<1x8xf32>
    %615 = vector.broadcast %613 : vector<8x1xf32> to vector<8x8xf32>
    %616 = vector.broadcast %614 : vector<1x8xf32> to vector<8x8xf32>
    %617 = arith.subf %615, %616 : vector<8x8xf32>
    %618 = math.absf %617 : vector<8x8xf32>
    %619 = arith.addf %612, %618 : vector<8x8xf32>
    %c0_265 = arith.constant 0 : index
    %c88 = arith.constant 88 : index
    %620 = vector.load %arg1[%c0_265, %c88] : memref<8x128xf32, #tpu.memory_space<vmem>>, vector<8x1xf32>
    %c88_266 = arith.constant 88 : index
    %c0_267 = arith.constant 0 : index
    %621 = vector.load %arg2[%c88_266, %c0_267] : memref<128x8xf32, #tpu.memory_space<vmem>>, vector<1x8xf32>
    %622 = vector.broadcast %620 : vector<8x1xf32> to vector<8x8xf32>
    %623 = vector.broadcast %621 : vector<1x8xf32> to vector<8x8xf32>
    %624 = arith.subf %622, %623 : vector<8x8xf32>
    %625 = math.absf %624 : vector<8x8xf32>
    %626 = arith.addf %619, %625 : vector<8x8xf32>
    %c0_268 = arith.constant 0 : index
    %c89 = arith.constant 89 : index
    %627 = vector.load %arg1[%c0_268, %c89] : memref<8x128xf32, #tpu.memory_space<vmem>>, vector<8x1xf32>
    %c89_269 = arith.constant 89 : index
    %c0_270 = arith.constant 0 : index
    %628 = vector.load %arg2[%c89_269, %c0_270] : memref<128x8xf32, #tpu.memory_space<vmem>>, vector<1x8xf32>
    %629 = vector.broadcast %627 : vector<8x1xf32> to vector<8x8xf32>
    %630 = vector.broadcast %628 : vector<1x8xf32> to vector<8x8xf32>
    %631 = arith.subf %629, %630 : vector<8x8xf32>
    %632 = math.absf %631 : vector<8x8xf32>
    %633 = arith.addf %626, %632 : vector<8x8xf32>
    %c0_271 = arith.constant 0 : index
    %c90 = arith.constant 90 : index
    %634 = vector.load %arg1[%c0_271, %c90] : memref<8x128xf32, #tpu.memory_space<vmem>>, vector<8x1xf32>
    %c90_272 = arith.constant 90 : index
    %c0_273 = arith.constant 0 : index
    %635 = vector.load %arg2[%c90_272, %c0_273] : memref<128x8xf32, #tpu.memory_space<vmem>>, vector<1x8xf32>
    %636 = vector.broadcast %634 : vector<8x1xf32> to vector<8x8xf32>
    %637 = vector.broadcast %635 : vector<1x8xf32> to vector<8x8xf32>
    %638 = arith.subf %636, %637 : vector<8x8xf32>
    %639 = math.absf %638 : vector<8x8xf32>
    %640 = arith.addf %633, %639 : vector<8x8xf32>
    %c0_274 = arith.constant 0 : index
    %c91 = arith.constant 91 : index
    %641 = vector.load %arg1[%c0_274, %c91] : memref<8x128xf32, #tpu.memory_space<vmem>>, vector<8x1xf32>
    %c91_275 = arith.constant 91 : index
    %c0_276 = arith.constant 0 : index
    %642 = vector.load %arg2[%c91_275, %c0_276] : memref<128x8xf32, #tpu.memory_space<vmem>>, vector<1x8xf32>
    %643 = vector.broadcast %641 : vector<8x1xf32> to vector<8x8xf32>
    %644 = vector.broadcast %642 : vector<1x8xf32> to vector<8x8xf32>
    %645 = arith.subf %643, %644 : vector<8x8xf32>
    %646 = math.absf %645 : vector<8x8xf32>
    %647 = arith.addf %640, %646 : vector<8x8xf32>
    %c0_277 = arith.constant 0 : index
    %c92 = arith.constant 92 : index
    %648 = vector.load %arg1[%c0_277, %c92] : memref<8x128xf32, #tpu.memory_space<vmem>>, vector<8x1xf32>
    %c92_278 = arith.constant 92 : index
    %c0_279 = arith.constant 0 : index
    %649 = vector.load %arg2[%c92_278, %c0_279] : memref<128x8xf32, #tpu.memory_space<vmem>>, vector<1x8xf32>
    %650 = vector.broadcast %648 : vector<8x1xf32> to vector<8x8xf32>
    %651 = vector.broadcast %649 : vector<1x8xf32> to vector<8x8xf32>
    %652 = arith.subf %650, %651 : vector<8x8xf32>
    %653 = math.absf %652 : vector<8x8xf32>
    %654 = arith.addf %647, %653 : vector<8x8xf32>
    %c0_280 = arith.constant 0 : index
    %c93 = arith.constant 93 : index
    %655 = vector.load %arg1[%c0_280, %c93] : memref<8x128xf32, #tpu.memory_space<vmem>>, vector<8x1xf32>
    %c93_281 = arith.constant 93 : index
    %c0_282 = arith.constant 0 : index
    %656 = vector.load %arg2[%c93_281, %c0_282] : memref<128x8xf32, #tpu.memory_space<vmem>>, vector<1x8xf32>
    %657 = vector.broadcast %655 : vector<8x1xf32> to vector<8x8xf32>
    %658 = vector.broadcast %656 : vector<1x8xf32> to vector<8x8xf32>
    %659 = arith.subf %657, %658 : vector<8x8xf32>
    %660 = math.absf %659 : vector<8x8xf32>
    %661 = arith.addf %654, %660 : vector<8x8xf32>
    %c0_283 = arith.constant 0 : index
    %c94 = arith.constant 94 : index
    %662 = vector.load %arg1[%c0_283, %c94] : memref<8x128xf32, #tpu.memory_space<vmem>>, vector<8x1xf32>
    %c94_284 = arith.constant 94 : index
    %c0_285 = arith.constant 0 : index
    %663 = vector.load %arg2[%c94_284, %c0_285] : memref<128x8xf32, #tpu.memory_space<vmem>>, vector<1x8xf32>
    %664 = vector.broadcast %662 : vector<8x1xf32> to vector<8x8xf32>
    %665 = vector.broadcast %663 : vector<1x8xf32> to vector<8x8xf32>
    %666 = arith.subf %664, %665 : vector<8x8xf32>
    %667 = math.absf %666 : vector<8x8xf32>
    %668 = arith.addf %661, %667 : vector<8x8xf32>
    %c0_286 = arith.constant 0 : index
    %c95 = arith.constant 95 : index
    %669 = vector.load %arg1[%c0_286, %c95] : memref<8x128xf32, #tpu.memory_space<vmem>>, vector<8x1xf32>
    %c95_287 = arith.constant 95 : index
    %c0_288 = arith.constant 0 : index
    %670 = vector.load %arg2[%c95_287, %c0_288] : memref<128x8xf32, #tpu.memory_space<vmem>>, vector<1x8xf32>
    %671 = vector.broadcast %669 : vector<8x1xf32> to vector<8x8xf32>
    %672 = vector.broadcast %670 : vector<1x8xf32> to vector<8x8xf32>
    %673 = arith.subf %671, %672 : vector<8x8xf32>
    %674 = math.absf %673 : vector<8x8xf32>
    %675 = arith.addf %668, %674 : vector<8x8xf32>
    %c0_289 = arith.constant 0 : index
    %c96 = arith.constant 96 : index
    %676 = vector.load %arg1[%c0_289, %c96] : memref<8x128xf32, #tpu.memory_space<vmem>>, vector<8x1xf32>
    %c96_290 = arith.constant 96 : index
    %c0_291 = arith.constant 0 : index
    %677 = vector.load %arg2[%c96_290, %c0_291] : memref<128x8xf32, #tpu.memory_space<vmem>>, vector<1x8xf32>
    %678 = vector.broadcast %676 : vector<8x1xf32> to vector<8x8xf32>
    %679 = vector.broadcast %677 : vector<1x8xf32> to vector<8x8xf32>
    %680 = arith.subf %678, %679 : vector<8x8xf32>
    %681 = math.absf %680 : vector<8x8xf32>
    %682 = arith.addf %675, %681 : vector<8x8xf32>
    %c0_292 = arith.constant 0 : index
    %c97 = arith.constant 97 : index
    %683 = vector.load %arg1[%c0_292, %c97] : memref<8x128xf32, #tpu.memory_space<vmem>>, vector<8x1xf32>
    %c97_293 = arith.constant 97 : index
    %c0_294 = arith.constant 0 : index
    %684 = vector.load %arg2[%c97_293, %c0_294] : memref<128x8xf32, #tpu.memory_space<vmem>>, vector<1x8xf32>
    %685 = vector.broadcast %683 : vector<8x1xf32> to vector<8x8xf32>
    %686 = vector.broadcast %684 : vector<1x8xf32> to vector<8x8xf32>
    %687 = arith.subf %685, %686 : vector<8x8xf32>
    %688 = math.absf %687 : vector<8x8xf32>
    %689 = arith.addf %682, %688 : vector<8x8xf32>
    %c0_295 = arith.constant 0 : index
    %c98 = arith.constant 98 : index
    %690 = vector.load %arg1[%c0_295, %c98] : memref<8x128xf32, #tpu.memory_space<vmem>>, vector<8x1xf32>
    %c98_296 = arith.constant 98 : index
    %c0_297 = arith.constant 0 : index
    %691 = vector.load %arg2[%c98_296, %c0_297] : memref<128x8xf32, #tpu.memory_space<vmem>>, vector<1x8xf32>
    %692 = vector.broadcast %690 : vector<8x1xf32> to vector<8x8xf32>
    %693 = vector.broadcast %691 : vector<1x8xf32> to vector<8x8xf32>
    %694 = arith.subf %692, %693 : vector<8x8xf32>
    %695 = math.absf %694 : vector<8x8xf32>
    %696 = arith.addf %689, %695 : vector<8x8xf32>
    %c0_298 = arith.constant 0 : index
    %c99 = arith.constant 99 : index
    %697 = vector.load %arg1[%c0_298, %c99] : memref<8x128xf32, #tpu.memory_space<vmem>>, vector<8x1xf32>
    %c99_299 = arith.constant 99 : index
    %c0_300 = arith.constant 0 : index
    %698 = vector.load %arg2[%c99_299, %c0_300] : memref<128x8xf32, #tpu.memory_space<vmem>>, vector<1x8xf32>
    %699 = vector.broadcast %697 : vector<8x1xf32> to vector<8x8xf32>
    %700 = vector.broadcast %698 : vector<1x8xf32> to vector<8x8xf32>
    %701 = arith.subf %699, %700 : vector<8x8xf32>
    %702 = math.absf %701 : vector<8x8xf32>
    %703 = arith.addf %696, %702 : vector<8x8xf32>
    %c0_301 = arith.constant 0 : index
    %c100 = arith.constant 100 : index
    %704 = vector.load %arg1[%c0_301, %c100] : memref<8x128xf32, #tpu.memory_space<vmem>>, vector<8x1xf32>
    %c100_302 = arith.constant 100 : index
    %c0_303 = arith.constant 0 : index
    %705 = vector.load %arg2[%c100_302, %c0_303] : memref<128x8xf32, #tpu.memory_space<vmem>>, vector<1x8xf32>
    %706 = vector.broadcast %704 : vector<8x1xf32> to vector<8x8xf32>
    %707 = vector.broadcast %705 : vector<1x8xf32> to vector<8x8xf32>
    %708 = arith.subf %706, %707 : vector<8x8xf32>
    %709 = math.absf %708 : vector<8x8xf32>
    %710 = arith.addf %703, %709 : vector<8x8xf32>
    %c0_304 = arith.constant 0 : index
    %c101 = arith.constant 101 : index
    %711 = vector.load %arg1[%c0_304, %c101] : memref<8x128xf32, #tpu.memory_space<vmem>>, vector<8x1xf32>
    %c101_305 = arith.constant 101 : index
    %c0_306 = arith.constant 0 : index
    %712 = vector.load %arg2[%c101_305, %c0_306] : memref<128x8xf32, #tpu.memory_space<vmem>>, vector<1x8xf32>
    %713 = vector.broadcast %711 : vector<8x1xf32> to vector<8x8xf32>
    %714 = vector.broadcast %712 : vector<1x8xf32> to vector<8x8xf32>
    %715 = arith.subf %713, %714 : vector<8x8xf32>
    %716 = math.absf %715 : vector<8x8xf32>
    %717 = arith.addf %710, %716 : vector<8x8xf32>
    %c0_307 = arith.constant 0 : index
    %c102 = arith.constant 102 : index
    %718 = vector.load %arg1[%c0_307, %c102] : memref<8x128xf32, #tpu.memory_space<vmem>>, vector<8x1xf32>
    %c102_308 = arith.constant 102 : index
    %c0_309 = arith.constant 0 : index
    %719 = vector.load %arg2[%c102_308, %c0_309] : memref<128x8xf32, #tpu.memory_space<vmem>>, vector<1x8xf32>
    %720 = vector.broadcast %718 : vector<8x1xf32> to vector<8x8xf32>
    %721 = vector.broadcast %719 : vector<1x8xf32> to vector<8x8xf32>
    %722 = arith.subf %720, %721 : vector<8x8xf32>
    %723 = math.absf %722 : vector<8x8xf32>
    %724 = arith.addf %717, %723 : vector<8x8xf32>
    %c0_310 = arith.constant 0 : index
    %c103 = arith.constant 103 : index
    %725 = vector.load %arg1[%c0_310, %c103] : memref<8x128xf32, #tpu.memory_space<vmem>>, vector<8x1xf32>
    %c103_311 = arith.constant 103 : index
    %c0_312 = arith.constant 0 : index
    %726 = vector.load %arg2[%c103_311, %c0_312] : memref<128x8xf32, #tpu.memory_space<vmem>>, vector<1x8xf32>
    %727 = vector.broadcast %725 : vector<8x1xf32> to vector<8x8xf32>
    %728 = vector.broadcast %726 : vector<1x8xf32> to vector<8x8xf32>
    %729 = arith.subf %727, %728 : vector<8x8xf32>
    %730 = math.absf %729 : vector<8x8xf32>
    %731 = arith.addf %724, %730 : vector<8x8xf32>
    %c0_313 = arith.constant 0 : index
    %c104 = arith.constant 104 : index
    %732 = vector.load %arg1[%c0_313, %c104] : memref<8x128xf32, #tpu.memory_space<vmem>>, vector<8x1xf32>
    %c104_314 = arith.constant 104 : index
    %c0_315 = arith.constant 0 : index
    %733 = vector.load %arg2[%c104_314, %c0_315] : memref<128x8xf32, #tpu.memory_space<vmem>>, vector<1x8xf32>
    %734 = vector.broadcast %732 : vector<8x1xf32> to vector<8x8xf32>
    %735 = vector.broadcast %733 : vector<1x8xf32> to vector<8x8xf32>
    %736 = arith.subf %734, %735 : vector<8x8xf32>
    %737 = math.absf %736 : vector<8x8xf32>
    %738 = arith.addf %731, %737 : vector<8x8xf32>
    %c0_316 = arith.constant 0 : index
    %c105 = arith.constant 105 : index
    %739 = vector.load %arg1[%c0_316, %c105] : memref<8x128xf32, #tpu.memory_space<vmem>>, vector<8x1xf32>
    %c105_317 = arith.constant 105 : index
    %c0_318 = arith.constant 0 : index
    %740 = vector.load %arg2[%c105_317, %c0_318] : memref<128x8xf32, #tpu.memory_space<vmem>>, vector<1x8xf32>
    %741 = vector.broadcast %739 : vector<8x1xf32> to vector<8x8xf32>
    %742 = vector.broadcast %740 : vector<1x8xf32> to vector<8x8xf32>
    %743 = arith.subf %741, %742 : vector<8x8xf32>
    %744 = math.absf %743 : vector<8x8xf32>
    %745 = arith.addf %738, %744 : vector<8x8xf32>
    %c0_319 = arith.constant 0 : index
    %c106 = arith.constant 106 : index
    %746 = vector.load %arg1[%c0_319, %c106] : memref<8x128xf32, #tpu.memory_space<vmem>>, vector<8x1xf32>
    %c106_320 = arith.constant 106 : index
    %c0_321 = arith.constant 0 : index
    %747 = vector.load %arg2[%c106_320, %c0_321] : memref<128x8xf32, #tpu.memory_space<vmem>>, vector<1x8xf32>
    %748 = vector.broadcast %746 : vector<8x1xf32> to vector<8x8xf32>
    %749 = vector.broadcast %747 : vector<1x8xf32> to vector<8x8xf32>
    %750 = arith.subf %748, %749 : vector<8x8xf32>
    %751 = math.absf %750 : vector<8x8xf32>
    %752 = arith.addf %745, %751 : vector<8x8xf32>
    %c0_322 = arith.constant 0 : index
    %c107 = arith.constant 107 : index
    %753 = vector.load %arg1[%c0_322, %c107] : memref<8x128xf32, #tpu.memory_space<vmem>>, vector<8x1xf32>
    %c107_323 = arith.constant 107 : index
    %c0_324 = arith.constant 0 : index
    %754 = vector.load %arg2[%c107_323, %c0_324] : memref<128x8xf32, #tpu.memory_space<vmem>>, vector<1x8xf32>
    %755 = vector.broadcast %753 : vector<8x1xf32> to vector<8x8xf32>
    %756 = vector.broadcast %754 : vector<1x8xf32> to vector<8x8xf32>
    %757 = arith.subf %755, %756 : vector<8x8xf32>
    %758 = math.absf %757 : vector<8x8xf32>
    %759 = arith.addf %752, %758 : vector<8x8xf32>
    %c0_325 = arith.constant 0 : index
    %c108 = arith.constant 108 : index
    %760 = vector.load %arg1[%c0_325, %c108] : memref<8x128xf32, #tpu.memory_space<vmem>>, vector<8x1xf32>
    %c108_326 = arith.constant 108 : index
    %c0_327 = arith.constant 0 : index
    %761 = vector.load %arg2[%c108_326, %c0_327] : memref<128x8xf32, #tpu.memory_space<vmem>>, vector<1x8xf32>
    %762 = vector.broadcast %760 : vector<8x1xf32> to vector<8x8xf32>
    %763 = vector.broadcast %761 : vector<1x8xf32> to vector<8x8xf32>
    %764 = arith.subf %762, %763 : vector<8x8xf32>
    %765 = math.absf %764 : vector<8x8xf32>
    %766 = arith.addf %759, %765 : vector<8x8xf32>
    %c0_328 = arith.constant 0 : index
    %c109 = arith.constant 109 : index
    %767 = vector.load %arg1[%c0_328, %c109] : memref<8x128xf32, #tpu.memory_space<vmem>>, vector<8x1xf32>
    %c109_329 = arith.constant 109 : index
    %c0_330 = arith.constant 0 : index
    %768 = vector.load %arg2[%c109_329, %c0_330] : memref<128x8xf32, #tpu.memory_space<vmem>>, vector<1x8xf32>
    %769 = vector.broadcast %767 : vector<8x1xf32> to vector<8x8xf32>
    %770 = vector.broadcast %768 : vector<1x8xf32> to vector<8x8xf32>
    %771 = arith.subf %769, %770 : vector<8x8xf32>
    %772 = math.absf %771 : vector<8x8xf32>
    %773 = arith.addf %766, %772 : vector<8x8xf32>
    %c0_331 = arith.constant 0 : index
    %c110 = arith.constant 110 : index
    %774 = vector.load %arg1[%c0_331, %c110] : memref<8x128xf32, #tpu.memory_space<vmem>>, vector<8x1xf32>
    %c110_332 = arith.constant 110 : index
    %c0_333 = arith.constant 0 : index
    %775 = vector.load %arg2[%c110_332, %c0_333] : memref<128x8xf32, #tpu.memory_space<vmem>>, vector<1x8xf32>
    %776 = vector.broadcast %774 : vector<8x1xf32> to vector<8x8xf32>
    %777 = vector.broadcast %775 : vector<1x8xf32> to vector<8x8xf32>
    %778 = arith.subf %776, %777 : vector<8x8xf32>
    %779 = math.absf %778 : vector<8x8xf32>
    %780 = arith.addf %773, %779 : vector<8x8xf32>
    %c0_334 = arith.constant 0 : index
    %c111 = arith.constant 111 : index
    %781 = vector.load %arg1[%c0_334, %c111] : memref<8x128xf32, #tpu.memory_space<vmem>>, vector<8x1xf32>
    %c111_335 = arith.constant 111 : index
    %c0_336 = arith.constant 0 : index
    %782 = vector.load %arg2[%c111_335, %c0_336] : memref<128x8xf32, #tpu.memory_space<vmem>>, vector<1x8xf32>
    %783 = vector.broadcast %781 : vector<8x1xf32> to vector<8x8xf32>
    %784 = vector.broadcast %782 : vector<1x8xf32> to vector<8x8xf32>
    %785 = arith.subf %783, %784 : vector<8x8xf32>
    %786 = math.absf %785 : vector<8x8xf32>
    %787 = arith.addf %780, %786 : vector<8x8xf32>
    %c0_337 = arith.constant 0 : index
    %c112 = arith.constant 112 : index
    %788 = vector.load %arg1[%c0_337, %c112] : memref<8x128xf32, #tpu.memory_space<vmem>>, vector<8x1xf32>
    %c112_338 = arith.constant 112 : index
    %c0_339 = arith.constant 0 : index
    %789 = vector.load %arg2[%c112_338, %c0_339] : memref<128x8xf32, #tpu.memory_space<vmem>>, vector<1x8xf32>
    %790 = vector.broadcast %788 : vector<8x1xf32> to vector<8x8xf32>
    %791 = vector.broadcast %789 : vector<1x8xf32> to vector<8x8xf32>
    %792 = arith.subf %790, %791 : vector<8x8xf32>
    %793 = math.absf %792 : vector<8x8xf32>
    %794 = arith.addf %787, %793 : vector<8x8xf32>
    %c0_340 = arith.constant 0 : index
    %c113 = arith.constant 113 : index
    %795 = vector.load %arg1[%c0_340, %c113] : memref<8x128xf32, #tpu.memory_space<vmem>>, vector<8x1xf32>
    %c113_341 = arith.constant 113 : index
    %c0_342 = arith.constant 0 : index
    %796 = vector.load %arg2[%c113_341, %c0_342] : memref<128x8xf32, #tpu.memory_space<vmem>>, vector<1x8xf32>
    %797 = vector.broadcast %795 : vector<8x1xf32> to vector<8x8xf32>
    %798 = vector.broadcast %796 : vector<1x8xf32> to vector<8x8xf32>
    %799 = arith.subf %797, %798 : vector<8x8xf32>
    %800 = math.absf %799 : vector<8x8xf32>
    %801 = arith.addf %794, %800 : vector<8x8xf32>
    %c0_343 = arith.constant 0 : index
    %c114 = arith.constant 114 : index
    %802 = vector.load %arg1[%c0_343, %c114] : memref<8x128xf32, #tpu.memory_space<vmem>>, vector<8x1xf32>
    %c114_344 = arith.constant 114 : index
    %c0_345 = arith.constant 0 : index
    %803 = vector.load %arg2[%c114_344, %c0_345] : memref<128x8xf32, #tpu.memory_space<vmem>>, vector<1x8xf32>
    %804 = vector.broadcast %802 : vector<8x1xf32> to vector<8x8xf32>
    %805 = vector.broadcast %803 : vector<1x8xf32> to vector<8x8xf32>
    %806 = arith.subf %804, %805 : vector<8x8xf32>
    %807 = math.absf %806 : vector<8x8xf32>
    %808 = arith.addf %801, %807 : vector<8x8xf32>
    %c0_346 = arith.constant 0 : index
    %c115 = arith.constant 115 : index
    %809 = vector.load %arg1[%c0_346, %c115] : memref<8x128xf32, #tpu.memory_space<vmem>>, vector<8x1xf32>
    %c115_347 = arith.constant 115 : index
    %c0_348 = arith.constant 0 : index
    %810 = vector.load %arg2[%c115_347, %c0_348] : memref<128x8xf32, #tpu.memory_space<vmem>>, vector<1x8xf32>
    %811 = vector.broadcast %809 : vector<8x1xf32> to vector<8x8xf32>
    %812 = vector.broadcast %810 : vector<1x8xf32> to vector<8x8xf32>
    %813 = arith.subf %811, %812 : vector<8x8xf32>
    %814 = math.absf %813 : vector<8x8xf32>
    %815 = arith.addf %808, %814 : vector<8x8xf32>
    %c0_349 = arith.constant 0 : index
    %c116 = arith.constant 116 : index
    %816 = vector.load %arg1[%c0_349, %c116] : memref<8x128xf32, #tpu.memory_space<vmem>>, vector<8x1xf32>
    %c116_350 = arith.constant 116 : index
    %c0_351 = arith.constant 0 : index
    %817 = vector.load %arg2[%c116_350, %c0_351] : memref<128x8xf32, #tpu.memory_space<vmem>>, vector<1x8xf32>
    %818 = vector.broadcast %816 : vector<8x1xf32> to vector<8x8xf32>
    %819 = vector.broadcast %817 : vector<1x8xf32> to vector<8x8xf32>
    %820 = arith.subf %818, %819 : vector<8x8xf32>
    %821 = math.absf %820 : vector<8x8xf32>
    %822 = arith.addf %815, %821 : vector<8x8xf32>
    %c0_352 = arith.constant 0 : index
    %c117 = arith.constant 117 : index
    %823 = vector.load %arg1[%c0_352, %c117] : memref<8x128xf32, #tpu.memory_space<vmem>>, vector<8x1xf32>
    %c117_353 = arith.constant 117 : index
    %c0_354 = arith.constant 0 : index
    %824 = vector.load %arg2[%c117_353, %c0_354] : memref<128x8xf32, #tpu.memory_space<vmem>>, vector<1x8xf32>
    %825 = vector.broadcast %823 : vector<8x1xf32> to vector<8x8xf32>
    %826 = vector.broadcast %824 : vector<1x8xf32> to vector<8x8xf32>
    %827 = arith.subf %825, %826 : vector<8x8xf32>
    %828 = math.absf %827 : vector<8x8xf32>
    %829 = arith.addf %822, %828 : vector<8x8xf32>
    %c0_355 = arith.constant 0 : index
    %c118 = arith.constant 118 : index
    %830 = vector.load %arg1[%c0_355, %c118] : memref<8x128xf32, #tpu.memory_space<vmem>>, vector<8x1xf32>
    %c118_356 = arith.constant 118 : index
    %c0_357 = arith.constant 0 : index
    %831 = vector.load %arg2[%c118_356, %c0_357] : memref<128x8xf32, #tpu.memory_space<vmem>>, vector<1x8xf32>
    %832 = vector.broadcast %830 : vector<8x1xf32> to vector<8x8xf32>
    %833 = vector.broadcast %831 : vector<1x8xf32> to vector<8x8xf32>
    %834 = arith.subf %832, %833 : vector<8x8xf32>
    %835 = math.absf %834 : vector<8x8xf32>
    %836 = arith.addf %829, %835 : vector<8x8xf32>
    %c0_358 = arith.constant 0 : index
    %c119 = arith.constant 119 : index
    %837 = vector.load %arg1[%c0_358, %c119] : memref<8x128xf32, #tpu.memory_space<vmem>>, vector<8x1xf32>
    %c119_359 = arith.constant 119 : index
    %c0_360 = arith.constant 0 : index
    %838 = vector.load %arg2[%c119_359, %c0_360] : memref<128x8xf32, #tpu.memory_space<vmem>>, vector<1x8xf32>
    %839 = vector.broadcast %837 : vector<8x1xf32> to vector<8x8xf32>
    %840 = vector.broadcast %838 : vector<1x8xf32> to vector<8x8xf32>
    %841 = arith.subf %839, %840 : vector<8x8xf32>
    %842 = math.absf %841 : vector<8x8xf32>
    %843 = arith.addf %836, %842 : vector<8x8xf32>
    %c0_361 = arith.constant 0 : index
    %c120 = arith.constant 120 : index
    %844 = vector.load %arg1[%c0_361, %c120] : memref<8x128xf32, #tpu.memory_space<vmem>>, vector<8x1xf32>
    %c120_362 = arith.constant 120 : index
    %c0_363 = arith.constant 0 : index
    %845 = vector.load %arg2[%c120_362, %c0_363] : memref<128x8xf32, #tpu.memory_space<vmem>>, vector<1x8xf32>
    %846 = vector.broadcast %844 : vector<8x1xf32> to vector<8x8xf32>
    %847 = vector.broadcast %845 : vector<1x8xf32> to vector<8x8xf32>
    %848 = arith.subf %846, %847 : vector<8x8xf32>
    %849 = math.absf %848 : vector<8x8xf32>
    %850 = arith.addf %843, %849 : vector<8x8xf32>
    %c0_364 = arith.constant 0 : index
    %c121 = arith.constant 121 : index
    %851 = vector.load %arg1[%c0_364, %c121] : memref<8x128xf32, #tpu.memory_space<vmem>>, vector<8x1xf32>
    %c121_365 = arith.constant 121 : index
    %c0_366 = arith.constant 0 : index
    %852 = vector.load %arg2[%c121_365, %c0_366] : memref<128x8xf32, #tpu.memory_space<vmem>>, vector<1x8xf32>
    %853 = vector.broadcast %851 : vector<8x1xf32> to vector<8x8xf32>
    %854 = vector.broadcast %852 : vector<1x8xf32> to vector<8x8xf32>
    %855 = arith.subf %853, %854 : vector<8x8xf32>
    %856 = math.absf %855 : vector<8x8xf32>
    %857 = arith.addf %850, %856 : vector<8x8xf32>
    %c0_367 = arith.constant 0 : index
    %c122 = arith.constant 122 : index
    %858 = vector.load %arg1[%c0_367, %c122] : memref<8x128xf32, #tpu.memory_space<vmem>>, vector<8x1xf32>
    %c122_368 = arith.constant 122 : index
    %c0_369 = arith.constant 0 : index
    %859 = vector.load %arg2[%c122_368, %c0_369] : memref<128x8xf32, #tpu.memory_space<vmem>>, vector<1x8xf32>
    %860 = vector.broadcast %858 : vector<8x1xf32> to vector<8x8xf32>
    %861 = vector.broadcast %859 : vector<1x8xf32> to vector<8x8xf32>
    %862 = arith.subf %860, %861 : vector<8x8xf32>
    %863 = math.absf %862 : vector<8x8xf32>
    %864 = arith.addf %857, %863 : vector<8x8xf32>
    %c0_370 = arith.constant 0 : index
    %c123 = arith.constant 123 : index
    %865 = vector.load %arg1[%c0_370, %c123] : memref<8x128xf32, #tpu.memory_space<vmem>>, vector<8x1xf32>
    %c123_371 = arith.constant 123 : index
    %c0_372 = arith.constant 0 : index
    %866 = vector.load %arg2[%c123_371, %c0_372] : memref<128x8xf32, #tpu.memory_space<vmem>>, vector<1x8xf32>
    %867 = vector.broadcast %865 : vector<8x1xf32> to vector<8x8xf32>
    %868 = vector.broadcast %866 : vector<1x8xf32> to vector<8x8xf32>
    %869 = arith.subf %867, %868 : vector<8x8xf32>
    %870 = math.absf %869 : vector<8x8xf32>
    %871 = arith.addf %864, %870 : vector<8x8xf32>
    %c0_373 = arith.constant 0 : index
    %c124 = arith.constant 124 : index
    %872 = vector.load %arg1[%c0_373, %c124] : memref<8x128xf32, #tpu.memory_space<vmem>>, vector<8x1xf32>
    %c124_374 = arith.constant 124 : index
    %c0_375 = arith.constant 0 : index
    %873 = vector.load %arg2[%c124_374, %c0_375] : memref<128x8xf32, #tpu.memory_space<vmem>>, vector<1x8xf32>
    %874 = vector.broadcast %872 : vector<8x1xf32> to vector<8x8xf32>
    %875 = vector.broadcast %873 : vector<1x8xf32> to vector<8x8xf32>
    %876 = arith.subf %874, %875 : vector<8x8xf32>
    %877 = math.absf %876 : vector<8x8xf32>
    %878 = arith.addf %871, %877 : vector<8x8xf32>
    %c0_376 = arith.constant 0 : index
    %c125 = arith.constant 125 : index
    %879 = vector.load %arg1[%c0_376, %c125] : memref<8x128xf32, #tpu.memory_space<vmem>>, vector<8x1xf32>
    %c125_377 = arith.constant 125 : index
    %c0_378 = arith.constant 0 : index
    %880 = vector.load %arg2[%c125_377, %c0_378] : memref<128x8xf32, #tpu.memory_space<vmem>>, vector<1x8xf32>
    %881 = vector.broadcast %879 : vector<8x1xf32> to vector<8x8xf32>
    %882 = vector.broadcast %880 : vector<1x8xf32> to vector<8x8xf32>
    %883 = arith.subf %881, %882 : vector<8x8xf32>
    %884 = math.absf %883 : vector<8x8xf32>
    %885 = arith.addf %878, %884 : vector<8x8xf32>
    %c0_379 = arith.constant 0 : index
    %c126 = arith.constant 126 : index
    %886 = vector.load %arg1[%c0_379, %c126] : memref<8x128xf32, #tpu.memory_space<vmem>>, vector<8x1xf32>
    %c126_380 = arith.constant 126 : index
    %c0_381 = arith.constant 0 : index
    %887 = vector.load %arg2[%c126_380, %c0_381] : memref<128x8xf32, #tpu.memory_space<vmem>>, vector<1x8xf32>
    %888 = vector.broadcast %886 : vector<8x1xf32> to vector<8x8xf32>
    %889 = vector.broadcast %887 : vector<1x8xf32> to vector<8x8xf32>
    %890 = arith.subf %888, %889 : vector<8x8xf32>
    %891 = math.absf %890 : vector<8x8xf32>
    %892 = arith.addf %885, %891 : vector<8x8xf32>
    %c0_382 = arith.constant 0 : index
    %c127 = arith.constant 127 : index
    %893 = vector.load %arg1[%c0_382, %c127] : memref<8x128xf32, #tpu.memory_space<vmem>>, vector<8x1xf32>
    %c127_383 = arith.constant 127 : index
    %c0_384 = arith.constant 0 : index
    %894 = vector.load %arg2[%c127_383, %c0_384] : memref<128x8xf32, #tpu.memory_space<vmem>>, vector<1x8xf32>
    %895 = vector.broadcast %893 : vector<8x1xf32> to vector<8x8xf32>
    %896 = vector.broadcast %894 : vector<1x8xf32> to vector<8x8xf32>
    %897 = arith.subf %895, %896 : vector<8x8xf32>
    %898 = math.absf %897 : vector<8x8xf32>
    %899 = arith.addf %892, %898 : vector<8x8xf32>
    %c0_385 = arith.constant 0 : index
    %c0_386 = arith.constant 0 : index
    %900 = vector.load %arg4[%c0_385, %c0_386] : memref<8x8xf32, #tpu.memory_space<vmem>>, vector<8x8xf32>
    %901 = arith.addf %900, %899 : vector<8x8xf32>
    %c0_387 = arith.constant 0 : index
    %c0_388 = arith.constant 0 : index
    %902 = vector.load %arg4[%c0_387, %c0_388] : memref<8x8xf32, #tpu.memory_space<vmem>>, vector<8x8xf32>
    tpu.vector_store %arg4[%c0_387, %c0_388], %901 {strides = array<i32>} : memref<8x8xf32, #tpu.memory_space<vmem>>, vector<8x8xf32>,
    %c0_i32_389 = arith.constant 0 : i32
    %903 = arith.cmpi eq, %arg0, %c0_i32_389 : i32
    %904 = arith.extui %903 : i1 to i32
    %c0_i32_390 = arith.constant 0 : i32
    %905 = arith.cmpi ne, %904, %c0_i32_390 : i32
    scf.if %905 {
      %c0_391 = arith.constant 0 : index
      %c0_392 = arith.constant 0 : index
      %906 = vector.load %arg4[%c0_391, %c0_392] : memref<8x8xf32, #tpu.memory_space<vmem>>, vector<8x8xf32>
      %cst_393 = arith.constant 0.000000e+00 : f32
      %907 = vector.broadcast %cst_393 : f32 to vector<8x8xf32>
      %908 = arith.subf %907, %906 : vector<8x8xf32>
      %cst_394 = arith.constant 0.00999999977 : f32
      %909 = vector.broadcast %cst_394 : f32 to vector<8x8xf32>
      %910 = arith.mulf %908, %909 : vector<8x8xf32>
      %911 = math.exp %910 : vector<8x8xf32>
      %cst_395 = arith.constant 0.000000e+00 : f32
      %912 = vector.broadcast %cst_395 : f32 to vector<8x1xf32>
      %cst_396 = arith.constant 0.000000e+00 : f32
      %913 = vector.broadcast %cst_396 : f32 to vector<1x8xf32>
      %cst_397 = arith.constant 0.00999999977 : f32
      %cst_398 = arith.constant -2.07944155 : f32
      %cst_399 = arith.constant 1.000000e+02 : f32
      %c0_i32_400 = arith.constant 0 : i32
      %cst_401 = arith.constant 0x7F800000 : f32
      %914:4 = scf.while (%arg5 = %912, %arg6 = %913, %arg7 = %c0_i32_400, %arg8 = %cst_401) : (vector<8x1xf32>, vector<1x8xf32>, i32, f32) -> (vector<8x1xf32>, vector<1x8xf32>, i32, f32) {
        %c10_i32 = arith.constant 10 : i32
        %930 = arith.cmpi slt, %arg7, %c10_i32 : i32
        %cst_408 = arith.constant 1.000000e-01 : f32
        %931 = arith.cmpf oge, %arg8, %cst_408 : f32
        %932 = arith.andi %930, %931 : i1
        scf.condition(%932) %arg5, %arg6, %arg7, %arg8 : vector<8x1xf32>, vector<1x8xf32>, i32, f32
      } do {
      ^bb0(%arg5: vector<8x1xf32>, %arg6: vector<1x8xf32>, %arg7: i32, %arg8: f32):
        %930 = vector.broadcast %cst_397 : f32 to vector<8x1xf32>
        %931 = arith.mulf %arg5, %930 : vector<8x1xf32>
        %932 = math.exp %931 : vector<8x1xf32>
        %933 = vector.broadcast %cst_397 : f32 to vector<1x8xf32>
        %934 = arith.mulf %arg6, %933 : vector<1x8xf32>
        %935 = math.exp %934 : vector<1x8xf32>
        %936 = vector.broadcast %935 : vector<1x8xf32> to vector<8x8xf32>
        %937 = arith.mulf %911, %936 : vector<8x8xf32>
        %cst_408 = arith.constant dense<0.000000e+00> : vector<8xf32>
        %938 = vector.multi_reduction <add>, %937, %cst_408 [1] : vector<8x8xf32> to vector<8xf32>
        %939 = vector.shape_cast %938 : vector<8xf32> to vector<8x1xf32>
        %940 = arith.mulf %932, %939 : vector<8x1xf32>
        %cst_409 = arith.constant 9.99999997E-7 : f32
        %941 = vector.broadcast %cst_409 : f32 to vector<8x1xf32>
        %942 = arith.addf %940, %941 : vector<8x1xf32>
        %943 = math.log %942 : vector<8x1xf32>
        %944 = vector.broadcast %cst_398 : f32 to vector<8x1xf32>
        %945 = arith.subf %944, %943 : vector<8x1xf32>
        %946 = vector.broadcast %cst_399 : f32 to vector<8x1xf32>
        %947 = arith.mulf %946, %945 : vector<8x1xf32>
        %948 = arith.addf %947, %arg5 : vector<8x1xf32>
        %949 = vector.broadcast %cst_397 : f32 to vector<8x1xf32>
        %950 = arith.mulf %948, %949 : vector<8x1xf32>
        %951 = math.exp %950 : vector<8x1xf32>
        %952 = vector.broadcast %951 : vector<8x1xf32> to vector<8x8xf32>
        %953 = arith.mulf %911, %952 : vector<8x8xf32>
        %cst_410 = arith.constant dense<0.000000e+00> : vector<8xf32>
        %954 = vector.multi_reduction <add>, %953, %cst_410 [0] : vector<8x8xf32> to vector<8xf32>
        %955 = vector.shape_cast %954 : vector<8xf32> to vector<1x8xf32>
        %956 = arith.mulf %935, %955 : vector<1x8xf32>
        %cst_411 = arith.constant 9.99999997E-7 : f32
        %957 = vector.broadcast %cst_411 : f32 to vector<1x8xf32>
        %958 = arith.addf %956, %957 : vector<1x8xf32>
        %959 = math.log %958 : vector<1x8xf32>
        %960 = vector.broadcast %cst_398 : f32 to vector<1x8xf32>
        %961 = arith.subf %960, %959 : vector<1x8xf32>
        %962 = vector.broadcast %cst_399 : f32 to vector<1x8xf32>
        %963 = arith.mulf %962, %961 : vector<1x8xf32>
        %964 = arith.addf %963, %arg6 : vector<1x8xf32>
        %965 = arith.subf %948, %arg5 : vector<8x1xf32>
        %966 = math.absf %965 : vector<8x1xf32>
        %967 = vector.shape_cast %966 : vector<8x1xf32> to vector<1x8x1xf32>
        %cst_412 = arith.constant dense<0.000000e+00> : vector<1xf32>
        %968 = vector.multi_reduction <add>, %967, %cst_412 [1, 2] : vector<1x8x1xf32> to vector<1xf32>
        %969 = vector.shape_cast %968 : vector<1xf32> to vector<1x1x1xf32>
        %970 = vector.extract %969[0, 0, 0] : f32 from vector<1x1x1xf32>
        %c1_i32 = arith.constant 1 : i32
        %971 = arith.addi %arg7, %c1_i32 : i32
        scf.yield %948, %964, %971, %970 : vector<8x1xf32>, vector<1x8xf32>, i32, f32
      }
      %cst_402 = arith.constant 0.00999999977 : f32
      %915 = vector.broadcast %cst_402 : f32 to vector<8x1xf32>
      %916 = arith.mulf %914#0, %915 : vector<8x1xf32>
      %917 = math.exp %916 : vector<8x1xf32>
      %cst_403 = arith.constant 0.00999999977 : f32
      %918 = vector.broadcast %cst_403 : f32 to vector<1x8xf32>
      %919 = arith.mulf %914#1, %918 : vector<1x8xf32>
      %920 = math.exp %919 : vector<1x8xf32>
      %921 = arith.mulf %911, %906 : vector<8x8xf32>
      %922 = vector.broadcast %920 : vector<1x8xf32> to vector<8x8xf32>
      %923 = arith.mulf %921, %922 : vector<8x8xf32>
      %cst_404 = arith.constant dense<0.000000e+00> : vector<8xf32>
      %924 = vector.multi_reduction <add>, %923, %cst_404 [1] : vector<8x8xf32> to vector<8xf32>
      %925 = vector.shape_cast %924 : vector<8xf32> to vector<8x1xf32>
      %926 = arith.mulf %917, %925 : vector<8x1xf32>
      %cst_405 = arith.constant dense<0.000000e+00> : vector<1xf32>
      %927 = vector.multi_reduction <add>, %926, %cst_405 [0] : vector<8x1xf32> to vector<1xf32>
      %928 = vector.shape_cast %927 : vector<1xf32> to vector<1x1xf32>
      %c0_406 = arith.constant 0 : index
      %c0_407 = arith.constant 0 : index
      %929 = vector.load %arg3[%c0_406, %c0_407] : memref<1x1xf32, #tpu.memory_space<vmem>>, vector<1x1xf32>
      tpu.vector_store %arg3[%c0_406, %c0_407], %928 {strides = array<i32>} : memref<1x1xf32, #tpu.memory_space<vmem>>, vector<1x1xf32>,
    } else {
    }
    return
  }
  func.func @transform_0(%arg0: i32) -> (i32, i32) {
    %c0_i32 = arith.constant 0 : i32
    %c0_i32_0 = arith.constant 0 : i32
    return %c0_i32, %arg0 : i32, i32
  }
  func.func @transform_1(%arg0: i32) -> (i32, i32) {
    %c0_i32 = arith.constant 0 : i32
    %c0_i32_0 = arith.constant 0 : i32
    return %arg0, %c0_i32 : i32, i32
  }
  func.func @transform_2(%arg0: i32) -> (i32, i32) {
    %c0_i32 = arith.constant 0 : i32
    %c0_i32_0 = arith.constant 0 : i32
    %c0_i32_1 = arith.constant 0 : i32
    return %c0_i32, %c0_i32_0 : i32, i32
  }
}

</mosaic_0001>

<bundles_post_ra>
// kernel: tpu_custom_call.1
= control target key start
LH: loop header
LB: loop body
LE: loop exit
PB: predicated region body
PF: predicated region fallthrough
CT: control target
= control target key end

     0   :  { %v2152_v1 = vmov 2   ;;  %v2153_v2 = vmov 0   ;;  %s2865_s0 = inlined_call_operand.vmem [shape: f32[8,128], index: 0, kind: input, shape index: {}]   ;;  %s2866_s1 = inlined_call_operand.vmem [shape: f32[128,8], index: 1, kind: input, shape index: {}]   ;;  %s2867_s2 = inlined_call_operand.hbm [shape: f32[1,1], index: 2, kind: output, shape index: {}]  }
   0x1   :  { %v2300_v0 = vld [vmem:[%s2865_s0] sm:$0xff]  ;;  %1962 = vset.pattern.permute.xlu1 %v2152_v1  ;;  %1960 = vset.pattern.permute.xlu0 %v2153_v2 }
   0x2   :  { %46 = vperm.xlu1 %1962, %v2300_v0   ;;  %22 = vperm.xlu0 %1960, %v2300_v0  }
   0x3   :  { %7 = vsyncpa [#allocation4], 0  ;;  %v2154_v3 = vmov 3   ;;  %v2155_v4 = vmov 1   ;;  %v2156_v5 = vmov 4   ;;  %v2157_v6 = vmov 5  }
   0x4   :  { %v2158_v7 = vmov 6   ;;  %v2159_v8 = vmov 8   ;;  %v2160_v9 = vmov 7   ;;  %v2161_v10 = vmov 11   ;;  %v1676_v53 = vld [vmem:[%s2866_s1] ss:$0 sm:$0xff] }
   0x5   :  { %v2162_v11 = vmov 9   ;;  %v2163_v12 = vmov 14   ;;  %v2164_v13 = vmov 10   ;;  %v2165_v14 = vmov 17   ;;  %v1678_v59 = vld [vmem:[%s2866_s1 + $0x2] ss:$0 sm:$0xff] }
   0x6   :  { %1963 = vset.pattern.permute.xlu1 %v2154_v3  ;;  %1961 = vset.pattern.permute.xlu0 %v2155_v4  ;;  %v2166_v15 = vmov 12   ;;  %v2167_v16 = vmov 20   ;;  %v2168_v17 = vmov 13   ;;  %v2169_v18 = vmov 23   ;;  %v1677_v60 = vld [vmem:[%s2866_s1 + $0x1] ss:$0 sm:$0xff] }
   0x7   :  { %58 = vperm.xlu1 %1963, %v2300_v0   ;;  %34 = vperm.xlu0 %1961, %v2300_v0   ;;  %v2170_v19 = vmov 15   ;;  %v2171_v20 = vmov 26   ;;  %v2172_v21 = vmov 16   ;;  %v2173_v22 = vmov 29   ;;  %v1679_v61 = vld [vmem:[%s2866_s1 + $0x3] ss:$0 sm:$0xff] }
   0x8   :  { %v2174_v23 = vmov 18   ;;  %v2175_v24 = vmov 32   ;;  %v2176_v25 = vmov 19   ;;  %v2177_v26 = vmov 35  }
   0x9   :  { %v2178_v27 = vmov 21   ;;  %v2179_v28 = vmov 38   ;;  %v2180_v29 = vmov 22   ;;  %v2181_v30 = vmov 41  }
   0xa   :  { %v2182_v31 = vmov 24   ;;  %v2183_v32 = vmov 44   ;;  %v2184_v33 = vmov 25   ;;  %v2185_v34 = vmov 47  }
   0xb   :  { %1964 = vset.pattern.permute.xlu1 %v2156_v5  ;;  %1965 = vset.pattern.permute.xlu0 %v2157_v6  ;;  %v2186_v35 = vmov 27   ;;  %v2187_v36 = vmov 50   ;;  %v2188_v37 = vmov 28   ;;  %v2189_v38 = vmov 53  }
   0xc   :  { %70 = vperm.xlu1 %1964, %v2300_v0   ;;  %82 = vperm.xlu0 %1965, %v2300_v0   ;;  %v2190_v39 = vmov 30   ;;  %v2191_v40 = vmov 56   ;;  %v2192_v41 = vmov 31   ;;  %v2193_v42 = vmov 59  }
   0xd   :  { %v2194_v43 = vmov 33   ;;  %v2195_v44 = vmov 62   ;;  %v2196_v45 = vmov 34   ;;  %v2197_v46 = vmov 65  }
   0xe   :  { %v2198_v47 = vmov 36   ;;  %v2199_v48 = vmov 68   ;;  %v2200_v49 = vmov 37   ;;  %v2201_v50 = vmov 71  }
   0xf   :  { %v2202_v51 = vmov 39   ;;  %v2203_v52 = vmov 74   ;;  %v2204_v57 = vmov 40   ;;  %v2205_v58 = vmov 77  }
  0x10   :  { %1966 = vset.pattern.permute.xlu1 %v2158_v7  ;;  %1968 = vset.pattern.permute.xlu0 %v2159_v8  ;;  %v2206_v4 = vmov 42   ;;  %v2207_v5 = vmov 80   ;;  %v1680_v8 = vld [vmem:[%s2866_s1 + $0x4] ss:$0 sm:$0xff]  ;;  %vm16_vm0 = vcmask 64512  }
  0x11   :  { %94 = vperm.xlu1 %1966, %v2300_v0   ;;  %118 = vperm.xlu0 %1968, %v2300_v0  }
  0x15   :  { %1967 = vset.pattern.permute.xlu1 %v2160_v9  ;;  %1971 = vset.pattern.permute.xlu0 %v2161_v10  ;;  %v1681_v9 = vld [vmem:[%s2866_s1 + $0x5] ss:$0 sm:$0xff] }
  0x16   :  { %106 = vperm.xlu1 %1967, %v2300_v0   ;;  %154 = vperm.xlu0 %1971, %v2300_v0  }
  0x1a   :  { %1969 = vset.pattern.permute.xlu1 %v2162_v11  ;;  %1974 = vset.pattern.permute.xlu0 %v2163_v12 }
  0x1b   :  { %130 = vperm.xlu1 %1969, %v2300_v0   ;;  %190 = vperm.xlu0 %1974, %v2300_v0  }
  0x1f   :  { %1970 = vset.pattern.permute.xlu1 %v2164_v13  ;;  %1977 = vset.pattern.permute.xlu0 %v2165_v14 }
  0x20   :  { %142 = vperm.xlu1 %1970, %v2300_v0   ;;  %226 = vperm.xlu0 %1977, %v2300_v0  }
  0x24   :  { %1972 = vset.pattern.permute.xlu1 %v2166_v15  ;;  %1980 = vset.pattern.permute.xlu0 %v2167_v16 }
  0x25   :  { %166 = vperm.xlu1 %1972, %v2300_v0   ;;  %262 = vperm.xlu0 %1980, %v2300_v0  }
  0x29   :  { %1973 = vset.pattern.permute.xlu1 %v2168_v17  ;;  %1983 = vset.pattern.permute.xlu0 %v2169_v18  ;;  %v2208_v18 = vmov 43  }
  0x2a   :  { %178 = vperm.xlu1 %1973, %v2300_v0   ;;  %298 = vperm.xlu0 %1983, %v2300_v0  }
  0x2e   :  { %1975 = vset.pattern.permute.xlu1 %v2170_v19  ;;  %1986 = vset.pattern.permute.xlu0 %v2171_v20  ;;  %v1682_v20 = vld [vmem:[%s2866_s1 + $0x6] ss:$0 sm:$0xff] }
  0x2f   :  { %202 = vperm.xlu1 %1975, %v2300_v0   ;;  %334 = vperm.xlu0 %1986, %v2300_v0  }
  0x33   :  { %1976 = vset.pattern.permute.xlu1 %v2172_v21  ;;  %1989 = vset.pattern.permute.xlu0 %v2173_v22 }
  0x34   :  { %214 = vperm.xlu1 %1976, %v2300_v0   ;;  %370 = vperm.xlu0 %1989, %v2300_v0  }
  0x38   :  { %1978 = vset.pattern.permute.xlu1 %v2174_v23  ;;  %1992 = vset.pattern.permute.xlu0 %v2175_v24 }
  0x39   :  { %238 = vperm.xlu1 %1978, %v2300_v0   ;;  %406 = vperm.xlu0 %1992, %v2300_v0  }
  0x3d   :  { %1979 = vset.pattern.permute.xlu1 %v2176_v25  ;;  %1995 = vset.pattern.permute.xlu0 %v2177_v26  ;;  %v2209_v26 = vmov 83  }
  0x3e   :  { %250 = vperm.xlu1 %1979, %v2300_v0   ;;  %442 = vperm.xlu0 %1995, %v2300_v0  }
  0x42   :  { %1981 = vset.pattern.permute.xlu1 %v2178_v27  ;;  %1998 = vset.pattern.permute.xlu0 %v2179_v28  ;;  %v2210_v27 = vmov 45   ;;  %v1683_v28 = vld [vmem:[%s2866_s1 + $0x7] ss:$0 sm:$0xff] }
  0x43   :  { %274 = vperm.xlu1 %1981, %v2300_v0   ;;  %478 = vperm.xlu0 %1998, %v2300_v0  }
  0x47   :  { %1982 = vset.pattern.permute.xlu1 %v2180_v29  ;;  %2001 = vset.pattern.permute.xlu0 %v2181_v30  ;;  %v1684_v29 = vld [vmem:[%s2866_s1 + $0x8] ss:$0 sm:$0xff] }
  0x48   :  { %286 = vperm.xlu1 %1982, %v2300_v0   ;;  %514 = vperm.xlu0 %2001, %v2300_v0  }
  0x4c   :  { %1984 = vset.pattern.permute.xlu1 %v2182_v31  ;;  %2004 = vset.pattern.permute.xlu0 %v2183_v32 }
  0x4d   :  { %310 = vperm.xlu1 %1984, %v2300_v0   ;;  %550 = vperm.xlu0 %2004, %v2300_v0  }
  0x51   :  { %1985 = vset.pattern.permute.xlu1 %v2184_v33  ;;  %2007 = vset.pattern.permute.xlu0 %v2185_v34 }
  0x52   :  { %322 = vperm.xlu1 %1985, %v2300_v0   ;;  %586 = vperm.xlu0 %2007, %v2300_v0  }
  0x56   :  { %1987 = vset.pattern.permute.xlu1 %v2186_v35  ;;  %2010 = vset.pattern.permute.xlu0 %v2187_v36  ;;  %v2211_v36 = vmov 46  }
  0x57   :  { %346 = vperm.xlu1 %1987, %v2300_v0   ;;  %622 = vperm.xlu0 %2010, %v2300_v0  }
  0x5b   :  { %1988 = vset.pattern.permute.xlu1 %v2188_v37  ;;  %2013 = vset.pattern.permute.xlu0 %v2189_v38 }
  0x5c   :  { %358 = vperm.xlu1 %1988, %v2300_v0   ;;  %658 = vperm.xlu0 %2013, %v2300_v0  }
  0x60   :  { %1990 = vset.pattern.permute.xlu1 %v2190_v39  ;;  %2016 = vset.pattern.permute.xlu0 %v2191_v40  ;;  %v1685_v39 = vld [vmem:[%s2866_s1 + $0x9] ss:$0 sm:$0xff] }
  0x61   :  { %382 = vperm.xlu1 %1990, %v2300_v0   ;;  %694 = vperm.xlu0 %2016, %v2300_v0  }
  0x65   :  { %1991 = vset.pattern.permute.xlu1 %v2192_v41  ;;  %2019 = vset.pattern.permute.xlu0 %v2193_v42 }
  0x66   :  { %394 = vperm.xlu1 %1991, %v2300_v0   ;;  %730 = vperm.xlu0 %2019, %v2300_v0  }
  0x6a   :  { %1993 = vset.pattern.permute.xlu1 %v2194_v43  ;;  %2022 = vset.pattern.permute.xlu0 %v2195_v44  ;;  %v2212_v44 = vmov 86  }
  0x6b   :  { %418 = vperm.xlu1 %1993, %v2300_v0   ;;  %766 = vperm.xlu0 %2022, %v2300_v0  }
  0x6f   :  { %1994 = vset.pattern.permute.xlu1 %v2196_v45  ;;  %2025 = vset.pattern.permute.xlu0 %v2197_v46  ;;  %v2213_v45 = vmov 48   ;;  %v1686_v46 = vld [vmem:[%s2866_s1 + $0xa] ss:$0 sm:$0xff] }
  0x70   :  { %430 = vperm.xlu1 %1994, %v2300_v0   ;;  %802 = vperm.xlu0 %2025, %v2300_v0  }
  0x74   :  { %1996 = vset.pattern.permute.xlu1 %v2198_v47  ;;  %2028 = vset.pattern.permute.xlu0 %v2199_v48  ;;  %v1687_v47 = vld [vmem:[%s2866_s1 + $0xb] ss:$0 sm:$0xff] }
  0x75   :  { %454 = vperm.xlu1 %1996, %v2300_v0   ;;  %838 = vperm.xlu0 %2028, %v2300_v0  }
  0x79   :  { %1997 = vset.pattern.permute.xlu1 %v2200_v49  ;;  %2031 = vset.pattern.permute.xlu0 %v2201_v50 }
  0x7a   :  { %466 = vperm.xlu1 %1997, %v2300_v0   ;;  %874 = vperm.xlu0 %2031, %v2300_v0  }
  0x7e   :  { %1999 = vset.pattern.permute.xlu1 %v2202_v51  ;;  %2034 = vset.pattern.permute.xlu0 %v2203_v52 }
  0x7f   :  { %490 = vperm.xlu1 %1999, %v2300_v0   ;;  %910 = vperm.xlu0 %2034, %v2300_v0  }
  0x81   :  { %v47_v54 = vpop.permute.xlu1 %46  ;;  %v23_v55 = vpop.permute.xlu0 %22 }
  0x82   :  { %v29_v56 = vsub.f32 %v23_v55, %v1676_v53  ;;  %v53_v1 = vsub.f32 %v47_v54, %v1678_v59  ;;  %v2214_v54 = vmov 49  }
  0x83   :  { %2000 = vset.pattern.permute.xlu1 %v2204_v57  ;;  %2037 = vset.pattern.permute.xlu0 %v2205_v58  ;;  %v1688_v57 = vld [vmem:[%s2866_s1 + $0xc] ss:$0 sm:$0xff] }
  0x84   :  { %502 = vperm.xlu1 %2000, %v2300_v0   ;;  %946 = vperm.xlu0 %2037, %v2300_v0   ;;  %v30_v2 = vand.u32 2147483647, %v29_v56  ;;  %v54_v10 = vand.u32 2147483647, %v53_v1  ;;  %v1689_v1 = vld [vmem:[%s2866_s1 + $0xd] ss:$0 sm:$0xff] }
  0x86   :  { %v59_v62 = vpop.permute.xlu1 %58  ;;  %v35_v63 = vpop.permute.xlu0 %34 }
  0x87   :  { %v41_v3 = vsub.f32 %v35_v63, %v1677_v60  ;;  %v65_v6 = vsub.f32 %v59_v62, %v1679_v61  ;;  %v2215_v62 = vmov 89   ;;  %v2216_v63 = vmov 51  }
  0x88   :  { %2002 = vset.pattern.permute.xlu1 %v2206_v4  ;;  %2040 = vset.pattern.permute.xlu0 %v2207_v5 }
  0x89   :  { %v42_v7 = vand.u32 2147483647, %v41_v3  ;;  %526 = vperm.xlu1 %2002, %v2300_v0   ;;  %982 = vperm.xlu0 %2040, %v2300_v0   ;;  %v66_v16 = vand.u32 2147483647, %v65_v6 }
  0x8b   :  { %v43_v11 = vadd.f32 %v42_v7, %v30_v2  ;;  %v71_v12 = vpop.permute.xlu1 %70  ;;  %v83_v13 = vpop.permute.xlu0 %82  ;;  %v1690_v2 = vld [vmem:[%s2866_s1 + $0xe] ss:$0 sm:$0xff] }
  0x8c   :  { %v77_v14 = vsub.f32 %v71_v12, %v1680_v8  ;;  %v89_v15 = vsub.f32 %v83_v13, %v1681_v9  ;;  %v2217_v9 = vmov 52   ;;  %v1691_v12 = vld [vmem:[%s2866_s1 + $0xf] ss:$0 sm:$0xff] }
  0x8d   :  { %v55_v17 = vadd.f32 %v54_v10, %v43_v11  ;;  %2003 = vset.pattern.permute.xlu1 %v2208_v18  ;;  %2043 = vset.pattern.permute.xlu0 %v2209_v26  ;;  %v2219_v18 = vmov 54  }
  0x8e   :  { %v78_v19 = vand.u32 2147483647, %v77_v14  ;;  %538 = vperm.xlu1 %2003, %v2300_v0   ;;  %v90_v22 = vand.u32 2147483647, %v89_v15  ;;  %1018 = vperm.xlu0 %2043, %v2300_v0  }
  0x8f   :  { %v67_v21 = vadd.f32 %v66_v16, %v55_v17  ;;  %v2218_v17 = vmov 92  }
  0x90   :  { %v95_v23 = vpop.permute.xlu1 %94  ;;  %v119_v30 = vpop.permute.xlu0 %118 }
  0x91   :  { %v79_v24 = vadd.f32 %v78_v19, %v67_v21  ;;  %v101_v25 = vsub.f32 %v95_v23, %v1682_v20  ;;  %v125_v35 = vsub.f32 %v119_v30, %v1684_v29  ;;  %v1692_v19 = vld [vmem:[%s2866_s1 + $0x10] ss:$0 sm:$0xff]  ;;  %v1693_v20 = vld [vmem:[%s2866_s1 + $0x11] ss:$0 sm:$0xff]  ;;  %v1694_v30 = vld [vmem:[%s2866_s1 + $0x12] ss:$0 sm:$0xff] }
  0x92   :  { %2005 = vset.pattern.permute.xlu1 %v2210_v27  ;;  %2046 = vset.pattern.permute.xlu0 %v2212_v44  ;;  %v2220_v27 = vmov 55  }
  0x93   :  { %562 = vperm.xlu1 %2005, %v2300_v0   ;;  %v91_v31 = vadd.f32 %v90_v22, %v79_v24  ;;  %v102_v32 = vand.u32 2147483647, %v101_v25  ;;  %v126_v41 = vand.u32 2147483647, %v125_v35  ;;  %1054 = vperm.xlu0 %2046, %v2300_v0   ;;  %v2221_v35 = vmov 95  }
  0x95   :  { %v107_v33 = vpop.permute.xlu1 %106  ;;  %v103_v37 = vadd.f32 %v102_v32, %v91_v31  ;;  %v155_v48 = vpop.permute.xlu0 %154 }
  0x96   :  { %v113_v34 = vsub.f32 %v107_v33, %v1683_v28  ;;  %v161_v53 = vsub.f32 %v155_v48, %v1687_v47  ;;  %v1697_v48 = vld [vmem:[%s2866_s1 + $0x15] ss:$0 sm:$0xff] }
  0x97   :  { %2006 = vset.pattern.permute.xlu1 %v2211_v36  ;;  %2049 = vset.pattern.permute.xlu0 %v2215_v62  ;;  %v2222_v36 = vmov 57  }
  0x98   :  { %v114_v38 = vand.u32 2147483647, %v113_v34  ;;  %574 = vperm.xlu1 %2006, %v2300_v0   ;;  %v162_v59 = vand.u32 2147483647, %v161_v53  ;;  %1090 = vperm.xlu0 %2049, %v2300_v0   ;;  %v2224_v53 = vmov 98  }
  0x9a   :  { %v115_v40 = vadd.f32 %v114_v38, %v103_v37  ;;  %v131_v42 = vpop.permute.xlu1 %130  ;;  %v191_v3 = vpop.permute.xlu0 %190  ;;  %v1695_v37 = vld [vmem:[%s2866_s1 + $0x13] ss:$0 sm:$0xff]  ;;  %v1696_v38 = vld [vmem:[%s2866_s1 + $0x14] ss:$0 sm:$0xff] }
  0x9b   :  { %v137_v43 = vsub.f32 %v131_v42, %v1685_v39  ;;  %v197_v8 = vsub.f32 %v191_v3, %v1690_v2  ;;  %v1700_v3 = vld [vmem:[%s2866_s1 + $0x18] ss:$0 sm:$0xff] }
  0x9c   :  { %2008 = vset.pattern.permute.xlu1 %v2213_v45  ;;  %v127_v49 = vadd.f32 %v126_v41, %v115_v40  ;;  %2052 = vset.pattern.permute.xlu0 %v2218_v17  ;;  %v2223_v45 = vmov 58  }
  0x9d   :  { %598 = vperm.xlu1 %2008, %v2300_v0   ;;  %v138_v50 = vand.u32 2147483647, %v137_v43  ;;  %v198_v14 = vand.u32 2147483647, %v197_v8  ;;  %1126 = vperm.xlu0 %2052, %v2300_v0   ;;  %v2227_v8 = vmov 101  }
  0x9f   :  { %v143_v51 = vpop.permute.xlu1 %142  ;;  %v139_v55 = vadd.f32 %v138_v50, %v127_v49  ;;  %v227_v21 = vpop.permute.xlu0 %226 }
  0xa0   :  { %v149_v52 = vsub.f32 %v143_v51, %v1686_v46  ;;  %v233_v26 = vsub.f32 %v227_v21, %v1693_v20  ;;  %v1703_v21 = vld [vmem:[%s2866_s1 + $0x1b] ss:$0 sm:$0xff] }
  0xa1   :  { %2009 = vset.pattern.permute.xlu1 %v2214_v54  ;;  %2055 = vset.pattern.permute.xlu0 %v2221_v35  ;;  %v2225_v54 = vmov 60  }
  0xa2   :  { %v150_v56 = vand.u32 2147483647, %v149_v52  ;;  %610 = vperm.xlu1 %2009, %v2300_v0   ;;  %v234_v32 = vand.u32 2147483647, %v233_v26  ;;  %1162 = vperm.xlu0 %2055, %v2300_v0   ;;  %v1705_v26 = vld [vmem:[%s2866_s1 + $0x1d] ss:$0 sm:$0xff] }
  0xa4   :  { %v151_v58 = vadd.f32 %v150_v56, %v139_v55  ;;  %v167_v60 = vpop.permute.xlu1 %166  ;;  %v263_v39 = vpop.permute.xlu0 %262  ;;  %v1698_v55 = vld [vmem:[%s2866_s1 + $0x16] ss:$0 sm:$0xff]  ;;  %v1699_v56 = vld [vmem:[%s2866_s1 + $0x17] ss:$0 sm:$0xff] }
  0xa5   :  { %v173_v61 = vsub.f32 %v167_v60, %v1688_v57  ;;  %v269_v44 = vsub.f32 %v263_v39, %v1696_v38 }
  0xa6   :  { %2011 = vset.pattern.permute.xlu1 %v2216_v63  ;;  %v163_v4 = vadd.f32 %v162_v59, %v151_v58  ;;  %2058 = vset.pattern.permute.xlu0 %v2224_v53  ;;  %v2226_v63 = vmov 61  }
  0xa7   :  { %634 = vperm.xlu1 %2011, %v2300_v0   ;;  %v174_v5 = vand.u32 2147483647, %v173_v61  ;;  %v270_v50 = vand.u32 2147483647, %v269_v44  ;;  %1198 = vperm.xlu0 %2058, %v2300_v0   ;;  %v1708_v44 = vld [vmem:[%s2866_s1 + $0x20] ss:$0 sm:$0xff] }
  0xa9   :  { %v179_v6 = vpop.permute.xlu1 %178  ;;  %v175_v10 = vadd.f32 %v174_v5, %v163_v4  ;;  %v299_v57 = vpop.permute.xlu0 %298 }
  0xaa   :  { %v185_v7 = vsub.f32 %v179_v6, %v1689_v1  ;;  %v305_v62 = vsub.f32 %v299_v57, %v1699_v56 }
  0xab   :  { %2012 = vset.pattern.permute.xlu1 %v2217_v9  ;;  %2061 = vset.pattern.permute.xlu0 %v2227_v8  ;;  %v2228_v9 = vmov 63  }
  0xac   :  { %v186_v11 = vand.u32 2147483647, %v185_v7  ;;  %646 = vperm.xlu1 %2012, %v2300_v0   ;;  %v306_v5 = vand.u32 2147483647, %v305_v62  ;;  %1234 = vperm.xlu0 %2061, %v2300_v0   ;;  %v2236_v62 = vmov 110  }
  0xae   :  { %v187_v13 = vadd.f32 %v186_v11, %v175_v10  ;;  %v203_v15 = vpop.permute.xlu1 %202  ;;  %v1701_v10 = vld [vmem:[%s2866_s1 + $0x19] ss:$0 sm:$0xff]  ;;  %v1702_v11 = vld [vmem:[%s2866_s1 + $0x1a] ss:$0 sm:$0xff] }
  0xaf   :  { %v209_v16 = vsub.f32 %v203_v15, %v1691_v12  ;;  %v335_v12 = vpop.permute.xlu0 %334 }
  0xb0   :  { %2014 = vset.pattern.permute.xlu1 %v2219_v18  ;;  %v199_v22 = vadd.f32 %v198_v14, %v187_v13  ;;  %v341_v17 = vsub.f32 %v335_v12, %v1702_v11  ;;  %v2229_v18 = vmov 64   ;;  %v1712_v12 = vld [vmem:[%s2866_s1 + $0x24] ss:$0 sm:$0xff] }
  0xb1   :  { %670 = vperm.xlu1 %2014, %v2300_v0   ;;  %v210_v23 = vand.u32 2147483647, %v209_v16 }
  0xb3   :  { %v215_v24 = vpop.permute.xlu1 %214  ;;  %v211_v28 = vadd.f32 %v210_v23, %v199_v22  ;;  %v342_v23 = vand.u32 2147483647, %v341_v17  ;;  %v2239_v17 = vmov 113  }
  0xb4   :  { %v221_v25 = vsub.f32 %v215_v24, %v1692_v19 }
  0xb5   :  { %2015 = vset.pattern.permute.xlu1 %v2220_v27  ;;  %v371_v27 = vpop.permute.xlu0 %370 }
  0xb6   :  { %v222_v29 = vand.u32 2147483647, %v221_v25  ;;  %682 = vperm.xlu1 %2015, %v2300_v0  }
  0xb8   :  { %v223_v31 = vadd.f32 %v222_v29, %v211_v28  ;;  %v239_v33 = vpop.permute.xlu1 %238  ;;  %v2230_v28 = vmov 104   ;;  %v2231_v29 = vmov 66  }
  0xb9   :  { %v245_v34 = vsub.f32 %v239_v33, %v1694_v30  ;;  %2064 = vset.pattern.permute.xlu0 %v2230_v28  ;;  %v1704_v30 = vld [vmem:[%s2866_s1 + $0x1c] ss:$0 sm:$0xff]  ;;  %v377_v33 = vsub.f32 %v371_v27, %v1705_v26  ;;  %v2241_v27 = vmov 76  }
  0xba   :  { %2017 = vset.pattern.permute.xlu1 %v2222_v36  ;;  %v235_v40 = vadd.f32 %v234_v32, %v223_v31  ;;  %1270 = vperm.xlu0 %2064, %v2300_v0   ;;  %v2232_v36 = vmov 67  }
  0xbb   :  { %706 = vperm.xlu1 %2017, %v2300_v0   ;;  %v246_v41 = vand.u32 2147483647, %v245_v34  ;;  %v378_v39 = vand.u32 2147483647, %v377_v33 }
  0xbd   :  { %v251_v42 = vpop.permute.xlu1 %250  ;;  %v247_v46 = vadd.f32 %v246_v41, %v235_v40  ;;  %v1706_v40 = vld [vmem:[%s2866_s1 + $0x1e] ss:$0 sm:$0xff] }
  0xbe   :  { %v257_v43 = vsub.f32 %v251_v42, %v1695_v37 }
  0xbf   :  { %2018 = vset.pattern.permute.xlu1 %v2223_v45  ;;  %v407_v45 = vpop.permute.xlu0 %406 }
  0xc0   :  { %v258_v47 = vand.u32 2147483647, %v257_v43  ;;  %718 = vperm.xlu1 %2018, %v2300_v0  }
  0xc2   :  { %v259_v49 = vadd.f32 %v258_v47, %v247_v46  ;;  %v275_v51 = vpop.permute.xlu1 %274  ;;  %v2233_v46 = vmov 107  }
  0xc3   :  { %v281_v52 = vsub.f32 %v275_v51, %v1697_v48  ;;  %2067 = vset.pattern.permute.xlu0 %v2233_v46  ;;  %v2234_v48 = vmov 69   ;;  %v413_v51 = vsub.f32 %v407_v45, %v1708_v44  ;;  %v2244_v45 = vmov 79  }
  0xc4   :  { %2020 = vset.pattern.permute.xlu1 %v2225_v54  ;;  %v271_v58 = vadd.f32 %v270_v50, %v259_v49  ;;  %1306 = vperm.xlu0 %2067, %v2300_v0   ;;  %v1707_v50 = vld [vmem:[%s2866_s1 + $0x1f] ss:$0 sm:$0xff] }
  0xc5   :  { %742 = vperm.xlu1 %2020, %v2300_v0   ;;  %v282_v59 = vand.u32 2147483647, %v281_v52  ;;  %v414_v57 = vand.u32 2147483647, %v413_v51 }
  0xc7   :  { %v287_v60 = vpop.permute.xlu1 %286  ;;  %v283_v1 = vadd.f32 %v282_v59, %v271_v58  ;;  %v1709_v58 = vld [vmem:[%s2866_s1 + $0x21] ss:$0 sm:$0xff] }
  0xc8   :  { %v293_v61 = vsub.f32 %v287_v60, %v1698_v55  ;;  %v2235_v55 = vmov 70   ;;  %2070 = vset.pattern.permute.xlu0 %v2236_v62 }
  0xc9   :  { %2021 = vset.pattern.permute.xlu1 %v2226_v63  ;;  %1342 = vperm.xlu0 %2070, %v2300_v0  }
  0xca   :  { %v294_v2 = vand.u32 2147483647, %v293_v61  ;;  %754 = vperm.xlu1 %2021, %v2300_v0  }
  0xcc   :  { %v295_v4 = vadd.f32 %v294_v2, %v283_v1  ;;  %v311_v6 = vpop.permute.xlu1 %310  ;;  %v2237_v1 = vmov 72  }
  0xcd   :  { %v317_v7 = vsub.f32 %v311_v6, %v1700_v3  ;;  %v1710_v3 = vld [vmem:[%s2866_s1 + $0x22] ss:$0 sm:$0xff]  ;;  %2073 = vset.pattern.permute.xlu0 %v2239_v17 }
  0xce   :  { %2023 = vset.pattern.permute.xlu1 %v2228_v9  ;;  %v307_v13 = vadd.f32 %v306_v5, %v295_v4  ;;  %v1711_v4 = vld [vmem:[%s2866_s1 + $0x23] ss:$0 sm:$0xff]  ;;  %v443_v5 = vpop.permute.xlu0 %442  ;;  %1378 = vperm.xlu0 %2073, %v2300_v0  }
  0xcf   :  { %778 = vperm.xlu1 %2023, %v2300_v0   ;;  %v318_v14 = vand.u32 2147483647, %v317_v7  ;;  %v449_v9 = vsub.f32 %v443_v5, %v1711_v4 }
  0xd1   :  { %v323_v15 = vpop.permute.xlu1 %322  ;;  %v319_v19 = vadd.f32 %v318_v14, %v307_v13  ;;  %v450_v14 = vand.u32 2147483647, %v449_v9  ;;  %v2249_v9 = vmov 84  }
  0xd2   :  { %v329_v16 = vsub.f32 %v323_v15, %v1701_v10  ;;  %v2238_v10 = vmov 73  }
  0xd3   :  { %2024 = vset.pattern.permute.xlu1 %v2229_v18  ;;  %v2240_v18 = vmov 75  }
  0xd4   :  { %v330_v20 = vand.u32 2147483647, %v329_v16  ;;  %790 = vperm.xlu1 %2024, %v2300_v0  }
  0xd6   :  { %v331_v22 = vadd.f32 %v330_v20, %v319_v19  ;;  %v347_v24 = vpop.permute.xlu1 %346  ;;  %v1713_v19 = vld [vmem:[%s2866_s1 + $0x25] ss:$0 sm:$0xff]  ;;  %v1714_v20 = vld [vmem:[%s2866_s1 + $0x26] ss:$0 sm:$0xff] }
  0xd7   :  { %v353_v25 = vsub.f32 %v347_v24, %v1703_v21  ;;  %v479_v21 = vpop.permute.xlu0 %478 }
  0xd8   :  { %2026 = vset.pattern.permute.xlu1 %v2231_v29  ;;  %v343_v31 = vadd.f32 %v342_v23, %v331_v22  ;;  %v485_v26 = vsub.f32 %v479_v21, %v1714_v20  ;;  %v1724_v21 = vld [vmem:[%s2866_s1 + $0x30] ss:$0 sm:$0xff] }
  0xd9   :  { %814 = vperm.xlu1 %2026, %v2300_v0   ;;  %v354_v32 = vand.u32 2147483647, %v353_v25 }
  0xdb   :  { %v359_v34 = vpop.permute.xlu1 %358  ;;  %v355_v37 = vadd.f32 %v354_v32, %v343_v31  ;;  %v486_v32 = vand.u32 2147483647, %v485_v26  ;;  %v2251_v26 = vmov 125  }
  0xdc   :  { %v365_v35 = vsub.f32 %v359_v34, %v1704_v30  ;;  %v1715_v30 = vld [vmem:[%s2866_s1 + $0x27] ss:$0 sm:$0xff] }
  0xdd   :  { %2027 = vset.pattern.permute.xlu1 %v2232_v36  ;;  %v2243_v36 = vmov 78  }
  0xde   :  { %v366_v38 = vand.u32 2147483647, %v365_v35  ;;  %826 = vperm.xlu1 %2027, %v2300_v0   ;;  %v2242_v35 = vmov 116  }
  0xdf   :  { %2076 = vset.pattern.permute.xlu0 %v2242_v35 }
  0xe0   :  { %v367_v41 = vadd.f32 %v366_v38, %v355_v37  ;;  %v383_v42 = vpop.permute.xlu1 %382  ;;  %1414 = vperm.xlu0 %2076, %v2300_v0   ;;  %v1716_v37 = vld [vmem:[%s2866_s1 + $0x28] ss:$0 sm:$0xff]  ;;  %v1717_v38 = vld [vmem:[%s2866_s1 + $0x29] ss:$0 sm:$0xff] }
  0xe1   :  { %v389_v43 = vsub.f32 %v383_v42, %v1706_v40 }
  0xe2   :  { %v379_v47 = vadd.f32 %v378_v39, %v367_v41  ;;  %2029 = vset.pattern.permute.xlu1 %v2234_v48  ;;  %v515_v39 = vpop.permute.xlu0 %514  ;;  %v1718_v48 = vld [vmem:[%s2866_s1 + $0x2a] ss:$0 sm:$0xff] }
  0xe3   :  { %v390_v49 = vand.u32 2147483647, %v389_v43  ;;  %850 = vperm.xlu1 %2029, %v2300_v0   ;;  %v521_v44 = vsub.f32 %v515_v39, %v1717_v38  ;;  %v1727_v39 = vld [vmem:[%s2866_s1 + $0x33] ss:$0 sm:$0xff] }
  0xe5   :  { %v391_v52 = vadd.f32 %v390_v49, %v379_v47  ;;  %v395_v53 = vpop.permute.xlu1 %394 }
  0xe6   :  { %v401_v54 = vsub.f32 %v395_v53, %v1707_v50  ;;  %v522_v50 = vand.u32 2147483647, %v521_v44  ;;  %v2245_v53 = vmov 119  }
  0xe7   :  { %2030 = vset.pattern.permute.xlu1 %v2235_v55  ;;  %2079 = vset.pattern.permute.xlu0 %v2245_v53  ;;  %v1719_v55 = vld [vmem:[%s2866_s1 + $0x2b] ss:$0 sm:$0xff] }
  0xe8   :  { %v402_v56 = vand.u32 2147483647, %v401_v54  ;;  %862 = vperm.xlu1 %2030, %v2300_v0   ;;  %v2246_v54 = vmov 81   ;;  %1450 = vperm.xlu0 %2079, %v2300_v0  }
  0xea   :  { %v403_v59 = vadd.f32 %v402_v56, %v391_v52  ;;  %v419_v60 = vpop.permute.xlu1 %418  ;;  %v1720_v56 = vld [vmem:[%s2866_s1 + $0x2c] ss:$0 sm:$0xff] }
  0xeb   :  { %v425_v61 = vsub.f32 %v419_v60, %v1709_v58 }
  0xec   :  { %v415_v63 = vadd.f32 %v414_v57, %v403_v59  ;;  %2032 = vset.pattern.permute.xlu1 %v2237_v1  ;;  %v551_v57 = vpop.permute.xlu0 %550 }
  0xed   :  { %v426_v2 = vand.u32 2147483647, %v425_v61  ;;  %886 = vperm.xlu1 %2032, %v2300_v0   ;;  %v557_v62 = vsub.f32 %v551_v57, %v1720_v56  ;;  %v1730_v57 = vld [vmem:[%s2866_s1 + $0x36] ss:$0 sm:$0xff] }
  0xef   :  { %v427_v6 = vadd.f32 %v426_v2, %v415_v63  ;;  %v431_v7 = vpop.permute.xlu1 %430  ;;  %v2247_v63 = vmov 82   ;;  %v558_v5 = vand.u32 2147483647, %v557_v62  ;;  %v2257_v62 = vmov 93  }
  0xf0   :  { %v437_v8 = vsub.f32 %v431_v7, %v1710_v3  ;;  %v1721_v3 = vld [vmem:[%s2866_s1 + $0x2d] ss:$0 sm:$0xff] }
  0xf1   :  { %2033 = vset.pattern.permute.xlu1 %v2238_v10  ;;  %v2539_v10 = vld [vmem:[%s2865_s0] sm:$0xff] }
  0xf2   :  { %v438_v11 = vand.u32 2147483647, %v437_v8  ;;  %898 = vperm.xlu1 %2033, %v2300_v0   ;;  %v2248_v8 = vmov 122  }
  0xf3   :  { %2082 = vset.pattern.permute.xlu0 %v2248_v8  ;;  %v2258_v8 = vmov 94  }
  0xf4   :  { %v439_v13 = vadd.f32 %v438_v11, %v427_v6  ;;  %v455_v15 = vpop.permute.xlu1 %454  ;;  %1486 = vperm.xlu0 %2082, %v2539_v10   ;;  %v1723_v11 = vld [vmem:[%s2866_s1 + $0x2f] ss:$0 sm:$0xff] }
  0xf5   :  { %v461_v16 = vsub.f32 %v455_v15, %v1712_v12  ;;  %v587_v12 = vpop.permute.xlu0 %586 }
  0xf6   :  { %2035 = vset.pattern.permute.xlu1 %v2240_v18  ;;  %v451_v22 = vadd.f32 %v450_v14, %v439_v13  ;;  %v593_v17 = vsub.f32 %v587_v12, %v1723_v11  ;;  %v2250_v18 = vmov 85   ;;  %v1733_v11 = vld [vmem:[%s2866_s1 + $0x39] ss:$0 sm:$0xff] }
  0xf7   :  { %922 = vperm.xlu1 %2035, %v2300_v0   ;;  %v462_v23 = vand.u32 2147483647, %v461_v16 }
  0xf8   :  { %2085 = vset.pattern.permute.xlu0 %v2251_v26 }
  0xf9   :  { %v467_v24 = vpop.permute.xlu1 %466  ;;  %v463_v28 = vadd.f32 %v462_v23, %v451_v22  ;;  %v594_v23 = vand.u32 2147483647, %v593_v17  ;;  %1522 = vperm.xlu0 %2085, %v2539_v10   ;;  %v1734_v17 = vld [vmem:[%s2866_s1 + $0x3a] ss:$0 sm:$0xff] }
  0xfa   :  { %v473_v25 = vsub.f32 %v467_v24, %v1713_v19 }
  0xfb   :  { %2036 = vset.pattern.permute.xlu1 %v2241_v27  ;;  %v2252_v27 = vmov 87  }
  0xfc   :  { %v474_v29 = vand.u32 2147483647, %v473_v25  ;;  %934 = vperm.xlu1 %2036, %v2300_v0  }
  0xfe   :  { %v475_v31 = vadd.f32 %v474_v29, %v463_v28  ;;  %v491_v33 = vpop.permute.xlu1 %490  ;;  %v1725_v28 = vld [vmem:[%s2866_s1 + $0x31] ss:$0 sm:$0xff]  ;;  %v1726_v29 = vld [vmem:[%s2866_s1 + $0x32] ss:$0 sm:$0xff] }
  0xff   :  { %v497_v34 = vsub.f32 %v491_v33, %v1715_v30  ;;  %v623_v30 = vpop.permute.xlu0 %622 }
 0x100   :  { %2038 = vset.pattern.permute.xlu1 %v2243_v36  ;;  %v487_v40 = vadd.f32 %v486_v32, %v475_v31  ;;  %v629_v35 = vsub.f32 %v623_v30, %v1726_v29  ;;  %v2253_v36 = vmov 88  }
 0x101   :  { %958 = vperm.xlu1 %2038, %v2300_v0   ;;  %v498_v41 = vand.u32 2147483647, %v497_v34 }
 0x103   :  { %v503_v42 = vpop.permute.xlu1 %502  ;;  %v499_v46 = vadd.f32 %v498_v41, %v487_v40  ;;  %v2254_v40 = vmov 127  }
 0x104   :  { %v509_v43 = vsub.f32 %v503_v42, %v1716_v37  ;;  %2088 = vset.pattern.permute.xlu0 %v2254_v40  ;;  %v630_v42 = vand.u32 2147483647, %v629_v35  ;;  %v1738_v35 = vld [vmem:[%s2866_s1 + $0x3e] ss:$0 sm:$0xff] }
 0x105   :  { %2039 = vset.pattern.permute.xlu1 %v2244_v45  ;;  %v2255_v45 = vmov 90  }
 0x106   :  { %v510_v47 = vand.u32 2147483647, %v509_v43  ;;  %970 = vperm.xlu1 %2039, %v2300_v0  }
 0x108   :  { %v511_v49 = vadd.f32 %v510_v47, %v499_v46  ;;  %v527_v51 = vpop.permute.xlu1 %526  ;;  %v1728_v46 = vld [vmem:[%s2866_s1 + $0x34] ss:$0 sm:$0xff]  ;;  %v1729_v47 = vld [vmem:[%s2866_s1 + $0x35] ss:$0 sm:$0xff] }
 0x109   :  { %v533_v52 = vsub.f32 %v527_v51, %v1718_v48  ;;  %v659_v48 = vpop.permute.xlu0 %658 }
 0x10a   :  { %2041 = vset.pattern.permute.xlu1 %v2246_v54  ;;  %v523_v58 = vadd.f32 %v522_v50, %v511_v49  ;;  %v665_v53 = vsub.f32 %v659_v48, %v1729_v47  ;;  %v2256_v54 = vmov 91  }
 0x10b   :  { %994 = vperm.xlu1 %2041, %v2300_v0   ;;  %v534_v59 = vand.u32 2147483647, %v533_v52 }
 0x10d   :  { %v539_v60 = vpop.permute.xlu1 %538  ;;  %v535_v1 = vadd.f32 %v534_v59, %v523_v58  ;;  %v666_v59 = vand.u32 2147483647, %v665_v53  ;;  %v1741_v53 = vld [vmem:[%s2866_s1 + $0x41] ss:$0 sm:$0xff] }
 0x10e   :  { %v545_v61 = vsub.f32 %v539_v60, %v1719_v55 }
 0x10f   :  { %2042 = vset.pattern.permute.xlu1 %v2247_v63  ;;  %v1731_v63 = vld [vmem:[%s2866_s1 + $0x37] ss:$0 sm:$0xff] }
 0x110   :  { %v546_v2 = vand.u32 2147483647, %v545_v61  ;;  %1006 = vperm.xlu1 %2042, %v2300_v0   ;;  %v1722_v0 = vld [vmem:[%s2866_s1 + $0x2e] ss:$0 sm:$0xff] }
 0x112   :  { %v547_v4 = vadd.f32 %v546_v2, %v535_v1  ;;  %v563_v6 = vpop.permute.xlu1 %562  ;;  %v1732_v1 = vld [vmem:[%s2866_s1 + $0x38] ss:$0 sm:$0xff]  ;;  %v695_v2 = vpop.permute.xlu0 %694 }
 0x113   :  { %v569_v7 = vsub.f32 %v563_v6, %v1721_v3 }
 0x114   :  { %2044 = vset.pattern.permute.xlu1 %v2249_v9  ;;  %v559_v13 = vadd.f32 %v558_v5, %v547_v4 }
 0x115   :  { %1030 = vperm.xlu1 %2044, %v2539_v10   ;;  %v570_v14 = vand.u32 2147483647, %v569_v7  ;;  %v701_v7 = vsub.f32 %v695_v2, %v1732_v1 }
 0x117   :  { %v575_v15 = vpop.permute.xlu1 %574  ;;  %v571_v19 = vadd.f32 %v570_v14, %v559_v13  ;;  %v702_v13 = vand.u32 2147483647, %v701_v7  ;;  %v1744_v7 = vld [vmem:[%s2866_s1 + $0x44] ss:$0 sm:$0xff] }
 0x118   :  { %v581_v16 = vsub.f32 %v575_v15, %v1722_v0 }
 0x119   :  { %2045 = vset.pattern.permute.xlu1 %v2250_v18  ;;  %v1735_v18 = vld [vmem:[%s2866_s1 + $0x3b] ss:$0 sm:$0xff] }
 0x11a   :  { %v582_v20 = vand.u32 2147483647, %v581_v16  ;;  %1042 = vperm.xlu1 %2045, %v2539_v10   ;;  %v2259_v16 = vmov 96  }
 0x11c   :  { %v583_v22 = vadd.f32 %v582_v20, %v571_v19  ;;  %v599_v24 = vpop.permute.xlu1 %598  ;;  %v731_v19 = vpop.permute.xlu0 %730 }
 0x11d   :  { %v605_v25 = vsub.f32 %v599_v24, %v1724_v21  ;;  %v737_v24 = vsub.f32 %v731_v19, %v1735_v18 }
 0x11e   :  { %2047 = vset.pattern.permute.xlu1 %v2252_v27  ;;  %v595_v31 = vadd.f32 %v594_v23, %v583_v22 }
 0x11f   :  { %1066 = vperm.xlu1 %2047, %v2539_v10   ;;  %v606_v32 = vand.u32 2147483647, %v605_v25  ;;  %v2260_v25 = vmov 97   ;;  %v738_v30 = vand.u32 2147483647, %v737_v24 }
 0x120   :  { %v1747_v24 = vld [vmem:[%s2866_s1 + $0x47] ss:$0 sm:$0xff] }
 0x121   :  { %v611_v33 = vpop.permute.xlu1 %610  ;;  %v607_v37 = vadd.f32 %v606_v32, %v595_v31 }
 0x122   :  { %v617_v34 = vsub.f32 %v611_v33, %v1725_v28  ;;  %v1736_v28 = vld [vmem:[%s2866_s1 + $0x3c] ss:$0 sm:$0xff]  ;;  %v2261_v33 = vmov 99  }
 0x123   :  { %2048 = vset.pattern.permute.xlu1 %v2253_v36  ;;  %v767_v36 = vpop.permute.xlu0 %766 }
 0x124   :  { %v618_v38 = vand.u32 2147483647, %v617_v34  ;;  %1078 = vperm.xlu1 %2048, %v2539_v10   ;;  %v1737_v34 = vld [vmem:[%s2866_s1 + $0x3d] ss:$0 sm:$0xff] }
 0x126   :  { %v619_v41 = vadd.f32 %v618_v38, %v607_v37  ;;  %v635_v43 = vpop.permute.xlu1 %634 }
 0x127   :  { %v641_v44 = vsub.f32 %v635_v43, %v1727_v39  ;;  %v2262_v43 = vmov 100  }
 0x128   :  { %2050 = vset.pattern.permute.xlu1 %v2255_v45  ;;  %v631_v49 = vadd.f32 %v630_v42, %v619_v41  ;;  %v773_v42 = vsub.f32 %v767_v36, %v1738_v35 }
 0x129   :  { %1102 = vperm.xlu1 %2050, %v2539_v10   ;;  %v642_v50 = vand.u32 2147483647, %v641_v44 }
 0x12a   :  { %v774_v48 = vand.u32 2147483647, %v773_v42  ;;  %v1750_v42 = vld [vmem:[%s2866_s1 + $0x4a] ss:$0 sm:$0xff] }
 0x12b   :  { %v647_v51 = vpop.permute.xlu1 %646  ;;  %v643_v55 = vadd.f32 %v642_v50, %v631_v49 }
 0x12c   :  { %v653_v52 = vsub.f32 %v647_v51, %v1728_v46  ;;  %v1739_v46 = vld [vmem:[%s2866_s1 + $0x3f] ss:$0 sm:$0xff]  ;;  %v2263_v51 = vmov 102  }
 0x12d   :  { %2051 = vset.pattern.permute.xlu1 %v2256_v54  ;;  %v803_v54 = vpop.permute.xlu0 %802 }
 0x12e   :  { %v654_v56 = vand.u32 2147483647, %v653_v52  ;;  %1114 = vperm.xlu1 %2051, %v2539_v10   ;;  %v1740_v52 = vld [vmem:[%s2866_s1 + $0x40] ss:$0 sm:$0xff] }
 0x130   :  { %v655_v58 = vadd.f32 %v654_v56, %v643_v55  ;;  %v671_v60 = vpop.permute.xlu1 %670 }
 0x131   :  { %v677_v61 = vsub.f32 %v671_v60, %v1730_v57  ;;  %v2264_v60 = vmov 103  }
 0x132   :  { %2053 = vset.pattern.permute.xlu1 %v2257_v62  ;;  %v667_v3 = vadd.f32 %v666_v59, %v655_v58  ;;  %v809_v59 = vsub.f32 %v803_v54, %v1741_v53 }
 0x133   :  { %1138 = vperm.xlu1 %2053, %v2539_v10   ;;  %v678_v4 = vand.u32 2147483647, %v677_v61 }
 0x134   :  { %v810_v2 = vand.u32 2147483647, %v809_v59  ;;  %v1753_v59 = vld [vmem:[%s2866_s1 + $0x4d] ss:$0 sm:$0xff] }
 0x135   :  { %v683_v5 = vpop.permute.xlu1 %682  ;;  %v679_v9 = vadd.f32 %v678_v4, %v667_v3 }
 0x136   :  { %v689_v6 = vsub.f32 %v683_v5, %v1731_v63  ;;  %v1742_v63 = vld [vmem:[%s2866_s1 + $0x42] ss:$0 sm:$0xff]  ;;  %v2265_v5 = vmov 105  }
 0x137   :  { %2054 = vset.pattern.permute.xlu1 %v2258_v8  ;;  %v839_v8 = vpop.permute.xlu0 %838 }
 0x138   :  { %v690_v0 = vand.u32 2147483647, %v689_v6  ;;  %1150 = vperm.xlu1 %2054, %v2539_v10   ;;  %v1743_v6 = vld [vmem:[%s2866_s1 + $0x43] ss:$0 sm:$0xff] }
 0x13a   :  { %v691_v12 = vadd.f32 %v690_v0, %v679_v9  ;;  %v707_v14 = vpop.permute.xlu1 %706 }
 0x13b   :  { %v713_v15 = vsub.f32 %v707_v14, %v1733_v11  ;;  %v2266_v14 = vmov 106  }
 0x13c   :  { %2056 = vset.pattern.permute.xlu1 %v2259_v16  ;;  %v703_v20 = vadd.f32 %v702_v13, %v691_v12  ;;  %v845_v13 = vsub.f32 %v839_v8, %v1744_v7 }
 0x13d   :  { %1174 = vperm.xlu1 %2056, %v2539_v10   ;;  %v714_v21 = vand.u32 2147483647, %v713_v15 }
 0x13e   :  { %v846_v19 = vand.u32 2147483647, %v845_v13  ;;  %v1756_v13 = vld [vmem:[%s2866_s1 + $0x50] ss:$0 sm:$0xff] }
 0x13f   :  { %v719_v22 = vpop.permute.xlu1 %718  ;;  %v715_v26 = vadd.f32 %v714_v21, %v703_v20 }
 0x140   :  { %v725_v23 = vsub.f32 %v719_v22, %v1734_v17  ;;  %v1745_v17 = vld [vmem:[%s2866_s1 + $0x45] ss:$0 sm:$0xff]  ;;  %v2267_v22 = vmov 108  }
 0x141   :  { %2057 = vset.pattern.permute.xlu1 %v2260_v25  ;;  %v875_v25 = vpop.permute.xlu0 %874 }
 0x142   :  { %v726_v27 = vand.u32 2147483647, %v725_v23  ;;  %1186 = vperm.xlu1 %2057, %v2539_v10   ;;  %v1746_v23 = vld [vmem:[%s2866_s1 + $0x46] ss:$0 sm:$0xff] }
 0x144   :  { %v727_v29 = vadd.f32 %v726_v27, %v715_v26  ;;  %v743_v31 = vpop.permute.xlu1 %742 }
 0x145   :  { %v749_v32 = vsub.f32 %v743_v31, %v1736_v28  ;;  %v2268_v31 = vmov 109  }
 0x146   :  { %2059 = vset.pattern.permute.xlu1 %v2261_v33  ;;  %v739_v37 = vadd.f32 %v738_v30, %v727_v29  ;;  %v881_v30 = vsub.f32 %v875_v25, %v1747_v24 }
 0x147   :  { %1210 = vperm.xlu1 %2059, %v2539_v10   ;;  %v750_v38 = vand.u32 2147483647, %v749_v32 }
 0x148   :  { %v882_v36 = vand.u32 2147483647, %v881_v30  ;;  %v1759_v30 = vld [vmem:[%s2866_s1 + $0x53] ss:$0 sm:$0xff] }
 0x149   :  { %v755_v39 = vpop.permute.xlu1 %754  ;;  %v751_v44 = vadd.f32 %v750_v38, %v739_v37 }
 0x14a   :  { %v761_v41 = vsub.f32 %v755_v39, %v1737_v34  ;;  %v1748_v34 = vld [vmem:[%s2866_s1 + $0x48] ss:$0 sm:$0xff]  ;;  %v2269_v39 = vmov 111  }
 0x14b   :  { %2060 = vset.pattern.permute.xlu1 %v2262_v43  ;;  %v911_v43 = vpop.permute.xlu0 %910 }
 0x14c   :  { %v762_v45 = vand.u32 2147483647, %v761_v41  ;;  %1222 = vperm.xlu1 %2060, %v2539_v10   ;;  %v1749_v41 = vld [vmem:[%s2866_s1 + $0x49] ss:$0 sm:$0xff] }
 0x14e   :  { %v763_v47 = vadd.f32 %v762_v45, %v751_v44  ;;  %v779_v49 = vpop.permute.xlu1 %778 }
 0x14f   :  { %v785_v50 = vsub.f32 %v779_v49, %v1739_v46  ;;  %v2270_v49 = vmov 112  }
 0x150   :  { %2062 = vset.pattern.permute.xlu1 %v2263_v51  ;;  %v775_v55 = vadd.f32 %v774_v48, %v763_v47  ;;  %v917_v48 = vsub.f32 %v911_v43, %v1750_v42 }
 0x151   :  { %1246 = vperm.xlu1 %2062, %v2539_v10   ;;  %v786_v56 = vand.u32 2147483647, %v785_v50 }
 0x152   :  { %v918_v54 = vand.u32 2147483647, %v917_v48  ;;  %v1762_v48 = vld [vmem:[%s2866_s1 + $0x56] ss:$0 sm:$0xff] }
 0x153   :  { %v791_v57 = vpop.permute.xlu1 %790  ;;  %v787_v61 = vadd.f32 %v786_v56, %v775_v55 }
 0x154   :  { %v797_v58 = vsub.f32 %v791_v57, %v1740_v52  ;;  %v1751_v52 = vld [vmem:[%s2866_s1 + $0x4b] ss:$0 sm:$0xff]  ;;  %v2271_v57 = vmov 114  }
 0x155   :  { %2063 = vset.pattern.permute.xlu1 %v2264_v60  ;;  %v947_v60 = vpop.permute.xlu0 %946 }
 0x156   :  { %v798_v62 = vand.u32 2147483647, %v797_v58  ;;  %1258 = vperm.xlu1 %2063, %v2539_v10   ;;  %v1752_v58 = vld [vmem:[%s2866_s1 + $0x4c] ss:$0 sm:$0xff] }
 0x158   :  { %v799_v1 = vadd.f32 %v798_v62, %v787_v61  ;;  %v815_v3 = vpop.permute.xlu1 %814 }
 0x159   :  { %v821_v4 = vsub.f32 %v815_v3, %v1742_v63  ;;  %v2272_v3 = vmov 115  }
 0x15a   :  { %2065 = vset.pattern.permute.xlu1 %v2265_v5  ;;  %v811_v9 = vadd.f32 %v810_v2, %v799_v1  ;;  %v953_v2 = vsub.f32 %v947_v60, %v1753_v59 }
 0x15b   :  { %1282 = vperm.xlu1 %2065, %v2539_v10   ;;  %v822_v0 = vand.u32 2147483647, %v821_v4 }
 0x15c   :  { %v954_v8 = vand.u32 2147483647, %v953_v2  ;;  %v1765_v2 = vld [vmem:[%s2866_s1 + $0x59] ss:$0 sm:$0xff] }
 0x15d   :  { %v827_v11 = vpop.permute.xlu1 %826  ;;  %v823_v15 = vadd.f32 %v822_v0, %v811_v9 }
 0x15e   :  { %v833_v12 = vsub.f32 %v827_v11, %v1743_v6  ;;  %v1754_v6 = vld [vmem:[%s2866_s1 + $0x4e] ss:$0 sm:$0xff]  ;;  %v2273_v11 = vmov 117  }
 0x15f   :  { %2066 = vset.pattern.permute.xlu1 %v2266_v14  ;;  %v983_v14 = vpop.permute.xlu0 %982 }
 0x160   :  { %v834_v16 = vand.u32 2147483647, %v833_v12  ;;  %1294 = vperm.xlu1 %2066, %v2539_v10   ;;  %v1755_v12 = vld [vmem:[%s2866_s1 + $0x4f] ss:$0 sm:$0xff] }
 0x162   :  { %v835_v18 = vadd.f32 %v834_v16, %v823_v15  ;;  %v851_v20 = vpop.permute.xlu1 %850 }
 0x163   :  { %v857_v21 = vsub.f32 %v851_v20, %v1745_v17  ;;  %v2274_v20 = vmov 118  }
 0x164   :  { %2068 = vset.pattern.permute.xlu1 %v2267_v22  ;;  %v847_v26 = vadd.f32 %v846_v19, %v835_v18  ;;  %v989_v19 = vsub.f32 %v983_v14, %v1756_v13 }
 0x165   :  { %1318 = vperm.xlu1 %2068, %v2539_v10   ;;  %v858_v27 = vand.u32 2147483647, %v857_v21 }
 0x166   :  { %v990_v25 = vand.u32 2147483647, %v989_v19 }
 0x167   :  { %v863_v28 = vpop.permute.xlu1 %862  ;;  %v859_v32 = vadd.f32 %v858_v27, %v847_v26 }
 0x168   :  { %v869_v29 = vsub.f32 %v863_v28, %v1746_v23  ;;  %v1757_v23 = vld [vmem:[%s2866_s1 + $0x51] ss:$0 sm:$0xff]  ;;  %v2275_v28 = vmov 120  }
 0x169   :  { %2069 = vset.pattern.permute.xlu1 %v2268_v31  ;;  %v1019_v31 = vpop.permute.xlu0 %1018 }
 0x16a   :  { %v870_v33 = vand.u32 2147483647, %v869_v29  ;;  %1330 = vperm.xlu1 %2069, %v2539_v10   ;;  %v1758_v29 = vld [vmem:[%s2866_s1 + $0x52] ss:$0 sm:$0xff] }
 0x16c   :  { %v871_v35 = vadd.f32 %v870_v33, %v859_v32  ;;  %v887_v37 = vpop.permute.xlu1 %886 }
 0x16d   :  { %v893_v38 = vsub.f32 %v887_v37, %v1748_v34  ;;  %v2276_v37 = vmov 121  }
 0x16e   :  { %2071 = vset.pattern.permute.xlu1 %v2269_v39  ;;  %v883_v44 = vadd.f32 %v882_v36, %v871_v35  ;;  %v1025_v36 = vsub.f32 %v1019_v31, %v1759_v30  ;;  %v1770_v30 = vld [vmem:[%s2866_s1 + $0x5e] ss:$0 sm:$0xff]  ;;  %v1771_v31 = vld [vmem:[%s2866_s1 + $0x5f] ss:$0 sm:$0xff] }
 0x16f   :  { %1354 = vperm.xlu1 %2071, %v2539_v10   ;;  %v894_v45 = vand.u32 2147483647, %v893_v38 }
 0x170   :  { %v1026_v43 = vand.u32 2147483647, %v1025_v36 }
 0x171   :  { %v899_v46 = vpop.permute.xlu1 %898  ;;  %v895_v50 = vadd.f32 %v894_v45, %v883_v44 }
 0x172   :  { %v905_v47 = vsub.f32 %v899_v46, %v1749_v41  ;;  %v1760_v41 = vld [vmem:[%s2866_s1 + $0x54] ss:$0 sm:$0xff]  ;;  %v2277_v46 = vmov 123  }
 0x173   :  { %2072 = vset.pattern.permute.xlu1 %v2270_v49  ;;  %v1055_v49 = vpop.permute.xlu0 %1054 }
 0x174   :  { %v906_v51 = vand.u32 2147483647, %v905_v47  ;;  %1366 = vperm.xlu1 %2072, %v2539_v10   ;;  %v1761_v47 = vld [vmem:[%s2866_s1 + $0x55] ss:$0 sm:$0xff] }
 0x176   :  { %v907_v53 = vadd.f32 %v906_v51, %v895_v50  ;;  %v923_v55 = vpop.permute.xlu1 %922 }
 0x177   :  { %v929_v56 = vsub.f32 %v923_v55, %v1751_v52  ;;  %v2278_v55 = vmov 124  }
 0x178   :  { %2074 = vset.pattern.permute.xlu1 %v2271_v57  ;;  %v919_v61 = vadd.f32 %v918_v54, %v907_v53  ;;  %v1061_v54 = vsub.f32 %v1055_v49, %v1762_v48 }
 0x179   :  { %1390 = vperm.xlu1 %2074, %v2539_v10   ;;  %v930_v62 = vand.u32 2147483647, %v929_v56 }
 0x17a   :  { %v1062_v60 = vand.u32 2147483647, %v1061_v54 }
 0x17b   :  { %v935_v63 = vpop.permute.xlu1 %934  ;;  %v931_v4 = vadd.f32 %v930_v62, %v919_v61 }
 0x17c   :  { %v941_v1 = vsub.f32 %v935_v63, %v1752_v58  ;;  %v1763_v58 = vld [vmem:[%s2866_s1 + $0x57] ss:$0 sm:$0xff]  ;;  %v2279_v63 = vmov 126  }
 0x17d   :  { %2075 = vset.pattern.permute.xlu1 %v2272_v3  ;;  %v1091_v3 = vpop.permute.xlu0 %1090 }
 0x17e   :  { %v942_v5 = vand.u32 2147483647, %v941_v1  ;;  %1402 = vperm.xlu1 %2075, %v2539_v10   ;;  %v1764_v1 = vld [vmem:[%s2866_s1 + $0x58] ss:$0 sm:$0xff] }
 0x180   :  { %v943_v7 = vadd.f32 %v942_v5, %v931_v4  ;;  %v959_v9 = vpop.permute.xlu1 %958 }
 0x181   :  { %v965_v0 = vsub.f32 %v959_v9, %v1754_v6  ;;  %v2280_v9 = vmov 0.0  }
 0x182   :  { %2077 = vset.pattern.permute.xlu1 %v2273_v11  ;;  %v955_v15 = vadd.f32 %v954_v8, %v943_v7  ;;  %v1097_v8 = vsub.f32 %v1091_v3, %v1765_v2  ;;  %17 = vst.msk [vmem:[#allocation2] sm:$0xff] %vm16_vm0, %v2280_v9 }
 0x183   :  { %1426 = vperm.xlu1 %2077, %v2539_v10   ;;  %v966_v16 = vand.u32 2147483647, %v965_v0 }
 0x184   :  { %v1098_v14 = vand.u32 2147483647, %v1097_v8  ;;  %v1778_v8 = vld [vmem:[%s2866_s1 + $0x66] ss:$0 sm:$0xff] }
 0x185   :  { %v971_v17 = vpop.permute.xlu1 %970  ;;  %v967_v21 = vadd.f32 %v966_v16, %v955_v15 }
 0x186   :  { %v977_v18 = vsub.f32 %v971_v17, %v1755_v12  ;;  %v1766_v12 = vld [vmem:[%s2866_s1 + $0x5a] ss:$0 sm:$0xff]  ;;  %v1767_v17 = vld [vmem:[%s2866_s1 + $0x5b] ss:$0 sm:$0xff] }
 0x187   :  { %2078 = vset.pattern.permute.xlu1 %v2274_v20 }
 0x188   :  { %v978_v22 = vand.u32 2147483647, %v977_v18  ;;  %1438 = vperm.xlu1 %2078, %v2539_v10   ;;  %v1127_v18 = vpop.permute.xlu0 %1126 }
 0x18a   :  { %v979_v24 = vadd.f32 %v978_v22, %v967_v21  ;;  %v995_v26 = vpop.permute.xlu1 %994 }
 0x18b   :  { %v1001_v27 = vsub.f32 %v995_v26, %v1757_v23 }
 0x18c   :  { %2080 = vset.pattern.permute.xlu1 %v2275_v28  ;;  %v991_v32 = vadd.f32 %v990_v25, %v979_v24  ;;  %v1769_v25 = vld [vmem:[%s2866_s1 + $0x5d] ss:$0 sm:$0xff] }
 0x18d   :  { %1462 = vperm.xlu1 %2080, %v2539_v10   ;;  %v1002_v33 = vand.u32 2147483647, %v1001_v27 }
 0x18f   :  { %v1007_v34 = vpop.permute.xlu1 %1006  ;;  %v1003_v38 = vadd.f32 %v1002_v33, %v991_v32  ;;  %v1163_v32 = vpop.permute.xlu0 %1162 }
 0x190   :  { %v1013_v35 = vsub.f32 %v1007_v34, %v1758_v29 }
 0x191   :  { %2081 = vset.pattern.permute.xlu1 %v2276_v37  ;;  %v1169_v37 = vsub.f32 %v1163_v32, %v1771_v31 }
 0x192   :  { %v1014_v39 = vand.u32 2147483647, %v1013_v35  ;;  %1474 = vperm.xlu1 %2081, %v2539_v10  }
 0x193   :  { %v1199_v48 = vpop.permute.xlu0 %1198 }
 0x194   :  { %v1015_v42 = vadd.f32 %v1014_v39, %v1003_v38  ;;  %v1031_v44 = vpop.permute.xlu1 %1030 }
 0x195   :  { %v1037_v45 = vsub.f32 %v1031_v44, %v1760_v41  ;;  %v1772_v41 = vld [vmem:[%s2866_s1 + $0x60] ss:$0 sm:$0xff] }
 0x196   :  { %2083 = vset.pattern.permute.xlu1 %v2277_v46  ;;  %v1027_v50 = vadd.f32 %v1026_v43, %v1015_v42  ;;  %v1170_v43 = vand.u32 2147483647, %v1169_v37  ;;  %v1773_v46 = vld [vmem:[%s2866_s1 + $0x61] ss:$0 sm:$0xff] }
 0x197   :  { %1498 = vperm.xlu1 %2083, %v2539_v10   ;;  %v1038_v51 = vand.u32 2147483647, %v1037_v45 }
 0x199   :  { %v1043_v52 = vpop.permute.xlu1 %1042  ;;  %v1039_v56 = vadd.f32 %v1038_v51, %v1027_v50 }
 0x19a   :  { %v1049_v53 = vsub.f32 %v1043_v52, %v1761_v47  ;;  %v1774_v47 = vld [vmem:[%s2866_s1 + $0x62] ss:$0 sm:$0xff] }
 0x19b   :  { %2084 = vset.pattern.permute.xlu1 %v2278_v55 }
 0x19c   :  { %v1050_v57 = vand.u32 2147483647, %v1049_v53  ;;  %1510 = vperm.xlu1 %2084, %v2539_v10   ;;  %v1205_v53 = vsub.f32 %v1199_v48, %v1774_v47 }
 0x19e   :  { %v1051_v59 = vadd.f32 %v1050_v57, %v1039_v56  ;;  %v1067_v61 = vpop.permute.xlu1 %1066  ;;  %v1775_v56 = vld [vmem:[%s2866_s1 + $0x63] ss:$0 sm:$0xff] }
 0x19f   :  { %v1073_v62 = vsub.f32 %v1067_v61, %v1763_v58  ;;  %v1206_v58 = vand.u32 2147483647, %v1205_v53  ;;  %v1776_v61 = vld [vmem:[%s2866_s1 + $0x64] ss:$0 sm:$0xff] }
 0x1a0   :  { %2086 = vset.pattern.permute.xlu1 %v2279_v63  ;;  %v1063_v4 = vadd.f32 %v1062_v60, %v1051_v59  ;;  %v1235_v63 = vpop.permute.xlu0 %1234 }
 0x1a1   :  { %1534 = vperm.xlu1 %2086, %v2539_v10   ;;  %v1074_v5 = vand.u32 2147483647, %v1073_v62  ;;  %v1777_v62 = vld [vmem:[%s2866_s1 + $0x65] ss:$0 sm:$0xff] }
 0x1a3   :  { %v1079_v6 = vpop.permute.xlu1 %1078  ;;  %v1075_v0 = vadd.f32 %v1074_v5, %v1063_v4  ;;  %v1241_v5 = vsub.f32 %v1235_v63, %v1777_v62 }
 0x1a4   :  { %v1085_v7 = vsub.f32 %v1079_v6, %v1764_v1 }
 0x1a5   :  { %2087 = vset.pattern.permute.xlu1 %v2254_v40  ;;  %v1768_v40 = vld [vmem:[%s2866_s1 + $0x5c] ss:$0 sm:$0xff] }
 0x1a6   :  { %v1086_v11 = vand.u32 2147483647, %v1085_v7  ;;  %1546 = vperm.xlu1 %2087, %v2539_v10   ;;  %v1133_v22 = vsub.f32 %v1127_v18, %v1768_v40 }
 0x1a8   :  { %v1087_v13 = vadd.f32 %v1086_v11, %v1075_v0  ;;  %v1103_v15 = vpop.permute.xlu1 %1102  ;;  %v1134_v27 = vand.u32 2147483647, %v1133_v22  ;;  %v1242_v0 = vand.u32 2147483647, %v1241_v5 }
 0x1a9   :  { %v1109_v16 = vsub.f32 %v1103_v15, %v1766_v12  ;;  %v1271_v15 = vpop.permute.xlu0 %1270 }
 0x1aa   :  { %v1099_v19 = vadd.f32 %v1098_v14, %v1087_v13  ;;  %v1779_v13 = vld [vmem:[%s2866_s1 + $0x67] ss:$0 sm:$0xff]  ;;  %v1780_v14 = vld [vmem:[%s2866_s1 + $0x68] ss:$0 sm:$0xff] }
 0x1ab   :  { %v1110_v20 = vand.u32 2147483647, %v1109_v16 }
 0x1ad   :  { %v1115_v10 = vpop.permute.xlu1 %1114  ;;  %v1111_v23 = vadd.f32 %v1110_v20, %v1099_v19  ;;  %v1277_v19 = vsub.f32 %v1271_v15, %v1780_v14 }
 0x1ae   :  { %v1121_v21 = vsub.f32 %v1115_v10, %v1767_v17 }
 0x1b0   :  { %v1122_v24 = vand.u32 2147483647, %v1121_v21  ;;  %v1781_v21 = vld [vmem:[%s2866_s1 + $0x69] ss:$0 sm:$0xff] }
 0x1b2   :  { %v1123_v26 = vadd.f32 %v1122_v24, %v1111_v23  ;;  %v1139_v28 = vpop.permute.xlu1 %1138  ;;  %v1278_v23 = vand.u32 2147483647, %v1277_v19 }
 0x1b3   :  { %v1145_v29 = vsub.f32 %v1139_v28, %v1769_v25  ;;  %v1307_v28 = vpop.permute.xlu0 %1306 }
 0x1b4   :  { %v1135_v33 = vadd.f32 %v1134_v27, %v1123_v26  ;;  %v1782_v26 = vld [vmem:[%s2866_s1 + $0x6a] ss:$0 sm:$0xff]  ;;  %v1783_v27 = vld [vmem:[%s2866_s1 + $0x6b] ss:$0 sm:$0xff] }
 0x1b5   :  { %v1146_v34 = vand.u32 2147483647, %v1145_v29 }
 0x1b7   :  { %v1151_v35 = vpop.permute.xlu1 %1150  ;;  %v1147_v38 = vadd.f32 %v1146_v34, %v1135_v33  ;;  %v1313_v33 = vsub.f32 %v1307_v28, %v1783_v27 }
 0x1b8   :  { %v1157_v36 = vsub.f32 %v1151_v35, %v1770_v30 }
 0x1ba   :  { %v1158_v39 = vand.u32 2147483647, %v1157_v36  ;;  %v1784_v36 = vld [vmem:[%s2866_s1 + $0x6c] ss:$0 sm:$0xff] }
 0x1bc   :  { %v1159_v42 = vadd.f32 %v1158_v39, %v1147_v38  ;;  %v1175_v44 = vpop.permute.xlu1 %1174  ;;  %v1314_v38 = vand.u32 2147483647, %v1313_v33 }
 0x1bd   :  { %v1181_v45 = vsub.f32 %v1175_v44, %v1772_v41  ;;  %v1343_v44 = vpop.permute.xlu0 %1342 }
 0x1be   :  { %v1171_v49 = vadd.f32 %v1170_v43, %v1159_v42  ;;  %v1785_v42 = vld [vmem:[%s2866_s1 + $0x6d] ss:$0 sm:$0xff]  ;;  %v1786_v43 = vld [vmem:[%s2866_s1 + $0x6e] ss:$0 sm:$0xff] }
 0x1bf   :  { %v1182_v50 = vand.u32 2147483647, %v1181_v45 }
 0x1c1   :  { %v1187_v51 = vpop.permute.xlu1 %1186  ;;  %v1183_v54 = vadd.f32 %v1182_v50, %v1171_v49  ;;  %v1349_v49 = vsub.f32 %v1343_v44, %v1786_v43 }
 0x1c2   :  { %v1193_v52 = vsub.f32 %v1187_v51, %v1773_v46 }
 0x1c4   :  { %v1194_v55 = vand.u32 2147483647, %v1193_v52  ;;  %v1787_v52 = vld [vmem:[%s2866_s1 + $0x6f] ss:$0 sm:$0xff] }
 0x1c6   :  { %v1195_v57 = vadd.f32 %v1194_v55, %v1183_v54  ;;  %v1211_v59 = vpop.permute.xlu1 %1210  ;;  %v1350_v54 = vand.u32 2147483647, %v1349_v49 }
 0x1c7   :  { %v1217_v60 = vsub.f32 %v1211_v59, %v1775_v56  ;;  %v1379_v59 = vpop.permute.xlu0 %1378 }
 0x1c8   :  { %v1207_v1 = vadd.f32 %v1206_v58, %v1195_v57  ;;  %v1788_v57 = vld [vmem:[%s2866_s1 + $0x70] ss:$0 sm:$0xff]  ;;  %v1789_v58 = vld [vmem:[%s2866_s1 + $0x71] ss:$0 sm:$0xff] }
 0x1c9   :  { %v1218_v2 = vand.u32 2147483647, %v1217_v60 }
 0x1cb   :  { %v1223_v3 = vpop.permute.xlu1 %1222  ;;  %v1219_v6 = vadd.f32 %v1218_v2, %v1207_v1  ;;  %v1385_v1 = vsub.f32 %v1379_v59, %v1789_v58 }
 0x1cc   :  { %v1229_v4 = vsub.f32 %v1223_v3, %v1776_v61 }
 0x1ce   :  { %v1230_v7 = vand.u32 2147483647, %v1229_v4  ;;  %v1790_v4 = vld [vmem:[%s2866_s1 + $0x72] ss:$0 sm:$0xff] }
 0x1d0   :  { %v1231_v9 = vadd.f32 %v1230_v7, %v1219_v6  ;;  %v1247_v11 = vpop.permute.xlu1 %1246  ;;  %v1386_v6 = vand.u32 2147483647, %v1385_v1 }
 0x1d1   :  { %v1253_v12 = vsub.f32 %v1247_v11, %v1778_v8  ;;  %v1415_v11 = vpop.permute.xlu0 %1414 }
 0x1d2   :  { %v1243_v16 = vadd.f32 %v1242_v0, %v1231_v9  ;;  %v1791_v9 = vld [vmem:[%s2866_s1 + $0x73] ss:$0 sm:$0xff]  ;;  %v1792_v0 = vld [vmem:[%s2866_s1 + $0x74] ss:$0 sm:$0xff] }
 0x1d3   :  { %v1254_v17 = vand.u32 2147483647, %v1253_v12 }
 0x1d5   :  { %v1259_v40 = vpop.permute.xlu1 %1258  ;;  %v1255_v20 = vadd.f32 %v1254_v17, %v1243_v16  ;;  %v1421_v16 = vsub.f32 %v1415_v11, %v1792_v0 }
 0x1d6   :  { %v1265_v18 = vsub.f32 %v1259_v40, %v1779_v13 }
 0x1d8   :  { %v1266_v10 = vand.u32 2147483647, %v1265_v18  ;;  %v1793_v18 = vld [vmem:[%s2866_s1 + $0x75] ss:$0 sm:$0xff] }
 0x1da   :  { %v1267_v22 = vadd.f32 %v1266_v10, %v1255_v20  ;;  %v1283_v24 = vpop.permute.xlu1 %1282  ;;  %v1422_v20 = vand.u32 2147483647, %v1421_v16 }
 0x1db   :  { %v1289_v25 = vsub.f32 %v1283_v24, %v1781_v21  ;;  %v1451_v24 = vpop.permute.xlu0 %1450 }
 0x1dc   :  { %v1279_v29 = vadd.f32 %v1278_v23, %v1267_v22  ;;  %v1794_v22 = vld [vmem:[%s2866_s1 + $0x76] ss:$0 sm:$0xff]  ;;  %v1795_v23 = vld [vmem:[%s2866_s1 + $0x77] ss:$0 sm:$0xff] }
 0x1dd   :  { %v1290_v30 = vand.u32 2147483647, %v1289_v25 }
 0x1df   :  { %v1295_v31 = vpop.permute.xlu1 %1294  ;;  %v1291_v34 = vadd.f32 %v1290_v30, %v1279_v29  ;;  %v1457_v29 = vsub.f32 %v1451_v24, %v1795_v23 }
 0x1e0   :  { %v1301_v32 = vsub.f32 %v1295_v31, %v1782_v26 }
 0x1e2   :  { %v1302_v35 = vand.u32 2147483647, %v1301_v32  ;;  %v1796_v32 = vld [vmem:[%s2866_s1 + $0x78] ss:$0 sm:$0xff] }
 0x1e4   :  { %v1303_v37 = vadd.f32 %v1302_v35, %v1291_v34  ;;  %v1319_v39 = vpop.permute.xlu1 %1318  ;;  %v1458_v34 = vand.u32 2147483647, %v1457_v29 }
 0x1e5   :  { %v1325_v41 = vsub.f32 %v1319_v39, %v1784_v36  ;;  %v1487_v39 = vpop.permute.xlu0 %1486 }
 0x1e6   :  { %v1315_v45 = vadd.f32 %v1314_v38, %v1303_v37  ;;  %v1797_v37 = vld [vmem:[%s2866_s1 + $0x79] ss:$0 sm:$0xff]  ;;  %v1798_v38 = vld [vmem:[%s2866_s1 + $0x7a] ss:$0 sm:$0xff] }
 0x1e7   :  { %v1326_v46 = vand.u32 2147483647, %v1325_v41 }
 0x1e9   :  { %v1331_v47 = vpop.permute.xlu1 %1330  ;;  %v1327_v50 = vadd.f32 %v1326_v46, %v1315_v45  ;;  %v1493_v45 = vsub.f32 %v1487_v39, %v1798_v38 }
 0x1ea   :  { %v1337_v48 = vsub.f32 %v1331_v47, %v1785_v42 }
 0x1ec   :  { %v1338_v51 = vand.u32 2147483647, %v1337_v48  ;;  %v1799_v48 = vld [vmem:[%s2866_s1 + $0x7b] ss:$0 sm:$0xff] }
 0x1ee   :  { %v1339_v53 = vadd.f32 %v1338_v51, %v1327_v50  ;;  %v1355_v55 = vpop.permute.xlu1 %1354  ;;  %v1494_v50 = vand.u32 2147483647, %v1493_v45 }
 0x1ef   :  { %v1361_v56 = vsub.f32 %v1355_v55, %v1787_v52  ;;  %v1523_v55 = vpop.permute.xlu0 %1522 }
 0x1f0   :  { %v1351_v60 = vadd.f32 %v1350_v54, %v1339_v53  ;;  %v1800_v53 = vld [vmem:[%s2866_s1 + $0x7c] ss:$0 sm:$0xff]  ;;  %v1801_v54 = vld [vmem:[%s2866_s1 + $0x7d] ss:$0 sm:$0xff] }
 0x1f1   :  { %v1362_v61 = vand.u32 2147483647, %v1361_v56 }
 0x1f3   :  { %v1367_v62 = vpop.permute.xlu1 %1366  ;;  %v1363_v2 = vadd.f32 %v1362_v61, %v1351_v60  ;;  %v1529_v60 = vsub.f32 %v1523_v55, %v1801_v54 }
 0x1f4   :  { %v1373_v63 = vsub.f32 %v1367_v62, %v1788_v57 }
 0x1f6   :  { %v1374_v3 = vand.u32 2147483647, %v1373_v63  ;;  %v1802_v63 = vld [vmem:[%s2866_s1 + $0x7e] ss:$0 sm:$0xff] }
 0x1f8   :  { %v1375_v5 = vadd.f32 %v1374_v3, %v1363_v2  ;;  %v1391_v7 = vpop.permute.xlu1 %1390  ;;  %v1530_v2 = vand.u32 2147483647, %v1529_v60 }
 0x1f9   :  { %v1397_v8 = vsub.f32 %v1391_v7, %v1790_v4 }
 0x1fa   :  { %v1387_v12 = vadd.f32 %v1386_v6, %v1375_v5  ;;  %v1803_v5 = vld [vmem:[%s2866_s1 + $0x7f] ss:$0 sm:$0xff]  ;;  %s2828_s1 = smov 0  }
 0x1fb   :  { %v1398_v13 = vand.u32 2147483647, %v1397_v8 }
 0x1fd   :  { %v1403_v14 = vpop.permute.xlu1 %1402  ;;  %v1399_v17 = vadd.f32 %v1398_v13, %v1387_v12  ;;  %v1556_v12 = vld [vmem:[#allocation2] sm:$0xff] }
 0x1fe   :  { %v1409_v15 = vsub.f32 %v1403_v14, %v1791_v9 }
 0x200   :  { %v1410_v40 = vand.u32 2147483647, %v1409_v15 }
 0x202   :  { %v1411_v19 = vadd.f32 %v1410_v40, %v1399_v17  ;;  %v1427_v10 = vpop.permute.xlu1 %1426 }
 0x203   :  { %v1433_v21 = vsub.f32 %v1427_v10, %v1793_v18 }
 0x204   :  { %v1423_v25 = vadd.f32 %v1422_v20, %v1411_v19  ;;  %v2830_v19 = vmov 0.0   ;;  %v2832_v20 = vmov 0.0  }
 0x205   :  { %v1434_v26 = vand.u32 2147483647, %v1433_v21 }
 0x207   :  { %v1439_v27 = vpop.permute.xlu1 %1438  ;;  %v1435_v30 = vadd.f32 %v1434_v26, %v1423_v25 }
 0x208   :  { %v1445_v28 = vsub.f32 %v1439_v27, %v1794_v22 }
 0x20a   :  { %v1446_v31 = vand.u32 2147483647, %v1445_v28 }
 0x20c   :  { %v1447_v33 = vadd.f32 %v1446_v31, %v1435_v30  ;;  %v1463_v35 = vpop.permute.xlu1 %1462 }
 0x20d   :  { %v1469_v36 = vsub.f32 %v1463_v35, %v1796_v32 }
 0x20e   :  { %v1459_v41 = vadd.f32 %v1458_v34, %v1447_v33 }
 0x20f   :  { %v1470_v42 = vand.u32 2147483647, %v1469_v36 }
 0x211   :  { %v1475_v43 = vpop.permute.xlu1 %1474  ;;  %v1471_v46 = vadd.f32 %v1470_v42, %v1459_v41 }
 0x212   :  { %v1481_v44 = vsub.f32 %v1475_v43, %v1797_v37 }
 0x214   :  { %v1482_v47 = vand.u32 2147483647, %v1481_v44 }
 0x216   :  { %v1483_v49 = vadd.f32 %v1482_v47, %v1471_v46  ;;  %v1499_v51 = vpop.permute.xlu1 %1498 }
 0x217   :  { %v1505_v52 = vsub.f32 %v1499_v51, %v1799_v48 }
 0x218   :  { %v1495_v56 = vadd.f32 %v1494_v50, %v1483_v49 }
 0x219   :  { %v1506_v57 = vand.u32 2147483647, %v1505_v52 }
 0x21b   :  { %v1511_v58 = vpop.permute.xlu1 %1510  ;;  %v1507_v61 = vadd.f32 %v1506_v57, %v1495_v56 }
 0x21c   :  { %v1517_v59 = vsub.f32 %v1511_v58, %v1800_v53 }
 0x21e   :  { %v1518_v62 = vand.u32 2147483647, %v1517_v59 }
 0x220   :  { %v1519_v1 = vadd.f32 %v1518_v62, %v1507_v61  ;;  %v1535_v3 = vpop.permute.xlu1 %1534 }
 0x221   :  { %v1541_v4 = vsub.f32 %v1535_v3, %v1802_v63 }
 0x222   :  { %v1531_v6 = vadd.f32 %v1530_v2, %v1519_v1 }
 0x223   :  { %v1542_v7 = vand.u32 2147483647, %v1541_v4 }
 0x225   :  { %v1547_v8 = vpop.permute.xlu1 %1546  ;;  %v1543_v0 = vadd.f32 %v1542_v7, %v1531_v6 }
 0x226   :  { %v1553_v9 = vsub.f32 %v1547_v8, %v1803_v5 }
 0x228   :  { %v1554_v11 = vand.u32 2147483647, %v1553_v9 }
 0x22a   :  { %v1555_v13 = vadd.f32 %v1554_v11, %v1543_v0 }
 0x22c   :  { %v1557_v14 = vadd.f32 %v1556_v12, %v1555_v13 }
 0x22e   :  { %1559 = vst.msk [vmem:[#allocation2] sm:$0xff] %vm16_vm0, %v1557_v14 }
 0x235   :  { %v2823_v15 = vld [vmem:[#allocation2] sm:$0xff] }
 0x236   :  { %v1564_v16 = vsub.f32 0.0, %v2823_v15 }
 0x238   :  { %v1565_v17 = vmul.f32 0.01, %v1564_v16 }
 0x23a   :  { %v1566_v40 = vmul.f32 1.442695, %v1565_v17 }
 0x23c   :  { %2089 = vpow2.f32 %v1566_v40 }
 0x246   :  { %v2826_v18 = vpop.eup %2089 }
 0x247 LB: > { %v1582_v10 = vmul.f32 0.01, %v2146_v19  ;;  %v1579_v25 = vmul.f32 0.01, %v2150_v20  ;;  %vm1616_vm1 = vcmask 7168   ;;  %s1627_s1 = sadd.s32 1, %s2142_s1   ;;  %v2150_v20 = vphi %v2832_v20, %v2869_v20   ;;  %v2146_v19 = vphi %v2830_v19, %v2868_v19   ;;  %s2142_s1 = sphi %s2828_s1, %s1627_s1  }
 0x248   : > { %p1573_p0 = scmp.lt.s32.totalorder %s1627_s1, 10 }
 0x249   : > { %v1583_v21 = vmul.f32 1.442695, %v1582_v10  ;;  %v1580_v26 = vmul.f32 1.442695, %v1579_v25 }
 0x24b   : > { %2092 = vpow2.f32 %v1583_v21 }
 0x24c   : > { %2094 = vpow2.f32 %v1580_v26 }
 0x255   : > { %v2093_v22 = vpop.eup %2092 }
 0x256   : > { %v1585_v23 = vmul.f32 %v2093_v22, %v2826_v18  ;;  %v2095_v27 = vpop.eup %2094 }
 0x258   : > { %v1586_v24 = vsel %vm16_vm0, %v1585_v23, 0.0 }
 0x259   : > { %1587 = vadd.xlane.f32.xlu0 %v1586_v24 }
 0x2e6   : > { %v1588_v28 = vpop.xlane.xlu0 %1587 }
 0x2e7   : > { %v1589_v29 = vmul.f32 %v2095_v27, %v1588_v28 }
 0x2e9   : > { %v1590_v30 = vadd.f32 1e-06, %v1589_v29 }
 0x2eb   : > { %2096 = vlog2.f32 %v1590_v30 }
 0x2f5   : > { %v2097_v31 = vpop.eup %2096 }
 0x2f6   : > { %v1592_v32 = vmul.f32 0.6931472, %v2097_v31 }
 0x2f8   : > { %v1593_v33 = vsub.f32 -2.0794415, %v1592_v32 }
 0x2fa   : > { %v1594_v34 = vmul.f32 100.0, %v1593_v33 }
 0x2fc   : > { %v1595_v35 = vadd.f32 %v2150_v20, %v1594_v34  }
 0x2fe   : > { %v1614_v36 = vsub.f32 %v1595_v35, %v2150_v20  ;;  %v1596_v37 = vmul.f32 0.01, %v1595_v35  ;;  %v2869_v20 = vmov %v1595_v35 }
 0x300   : > { %v1615_v38 = vand.u32 2147483647, %v1614_v36  ;;  %v1597_v39 = vmul.f32 1.442695, %v1596_v37 }
 0x302   : > { %v1617_v41 = vsel %vm1616_vm1, %v1615_v38, 0.0  ;;  %2098 = vpow2.f32 %v1597_v39 }
 0x303   : > { %1618 = vadd.xlane.f32.xlu0 %v1617_v41 }
 0x30c   : > { %v2099_v42 = vpop.eup %2098 }
 0x30d   : > { %v1599_v43 = vmul.f32 %v2099_v42, %v2826_v18 }
 0x30f   : > { %v1600_v44 = vsel %vm16_vm0, %v1599_v43, 0.0 }
 0x310   : > { %v1601_v45 = vrot.slane %v1600_v44, 4 }
 0x312   : > { %v1602_v46 = vadd.f32 %v1601_v45, %v1600_v44 }
 0x314   : > { %v1603_v47 = vrot.slane %v1602_v46, 2 }
 0x316   : > { %v1604_v48 = vadd.f32 %v1603_v47, %v1602_v46 }
 0x318   : > { %v1605_v49 = vrot.slane %v1604_v48, 1 }
 0x31a   : > { %v1606_v50 = vadd.f32 %v1605_v49, %v1604_v48 }
 0x31c   : > { %v1607_v51 = vmul.f32 %v2093_v22, %v1606_v50 }
 0x31e   : > { %v1608_v52 = vadd.f32 1e-06, %v1607_v51 }
 0x320   : > { %2100 = vlog2.f32 %v1608_v52 }
 0x32a   : > { %v2101_v53 = vpop.eup %2100 }
 0x32b   : > { %v1610_v54 = vmul.f32 0.6931472, %v2101_v53 }
 0x32d   : > { %v1611_v55 = vsub.f32 -2.0794415, %v1610_v54 }
 0x32f   : > { %v1612_v56 = vmul.f32 100.0, %v1611_v55 }
 0x331   : > { %v1613_v57 = vadd.f32 %v2146_v19, %v1612_v56  }
 0x333   : > { %v2868_v19 = vmov %v1613_v57 }
 0x390   : > { %v1619_v58 = vpop.xlane.xlu0 %1618 }
 0x391   : > { %v1620_v59 = vrot.slane %v1619_v58, 4 }
 0x393   : > { %v1621_v60 = vadd.f32 %v1620_v59, %v1619_v58 }
 0x395   : > { %v1622_v61 = vrot.slane %v1621_v60, 2 }
 0x397   : > { %v1623_v62 = vadd.f32 %v1622_v61, %v1621_v60 }
 0x399   : > { %v1624_v63 = vrot.slane %v1623_v62, 1 }
 0x39b   : > { %v1625_v1 = vadd.f32 %v1624_v63, %v1623_v62 }
 0x39d   : > { %1804 = vpush %v1625_v1 }
 0x3ce   : > { %s1805_s11 = spop %1804 }
 0x3cf   : > { %p1574_p1 = scmp.ge.f32.partialorder %s1805_s11, 0.1 }
 0x3d1   : > { %p1575_p2 = pnand %p1574_p1, %p1573_p0 }
 0x3d2   :  { %v1631_v2 = vmul.f32 (%p1575_p2), 0.01, %v1613_v57  ;;  %v1634_v4 = vmul.f32 (%p1575_p2), %v2826_v18, %v2823_v15  ;;  %s2281_s12 = smov (%p1575_p2), [#allocation3]   ;;  %vm1646_vm2 = vcmask (%p1575_p2), 0  }
 0x3d3   :  { %1578 = sbr.rel (!%p1575_p2) target bundleno = 583 (0x247), region = 43  ;;  %s1654_s13 = sshll.u32 (%p1575_p2), %s2281_s12, 4  ;;  %s1655_s13 = int_to_ptr.vmem [resolvable:$true] %s1654_s13 }
 0x3d4   :  { %v1632_v3 = vmul.f32 (%p1575_p2), 1.442695, %v1631_v2  ;;  %s2104_s14 = scalar_lea.vmem (%p1575_p2), %s1655_s13, 16  ;;  %s2108_s15 = scalar_lea.vmem (%p1575_p2), %s1655_s13, 32 }
 0x3d5   :  { %p2105_p3 = scmp.ne.s32.totalorder (%p1575_p2), %s1655_s13, %s2104_s14  ;;  %p2109_p4 = scmp.lt.s32.totalorder (%p1575_p2), %s1655_s13, %s1655_s13 }
 0x3d6   :  { %2102 = vpow2.f32 (%p1575_p2), %v1632_v3  ;;  %p2110_p5 = scmp.lt.s32.totalorder (%p1575_p2), %s2108_s15, %s2104_s14 }
 0x3d8   :  { %p2111_p6 = por (%p1575_p2), %p2110_p5, %p2109_p4 }
 0x3da   :  { %p2112_p7 = pnand %p2111_p6, %p2105_p3 }
 0x3e0   :  { %v2103_v5 = vpop.eup %2102 }
 0x3e1   :  { %v1635_v6 = vmul.f32 %v2103_v5, %v1634_v4 }
 0x3e3   :  { %v1636_v7 = vsel %vm16_vm0, %v1635_v6, 0.0 }
 0x3e4   :  { %1637 = vadd.xlane.f32.xlu0 %v1636_v7 }
 0x471   :  { %v1638_v8 = vpop.xlane.xlu0 %1637 }
 0x472   :  { %v1639_v9 = vmul.f32 %v2099_v42, %v1638_v8 }
 0x474   :  { %v1640_v0 = vrot.slane %v1639_v9, 4 }
 0x476   :  { %v1641_v11 = vadd.f32 %v1640_v0, %v1639_v9 }
 0x478   :  { %v1642_v12 = vrot.slane %v1641_v11, 2 }
 0x47a   :  { %v1643_v13 = vadd.f32 %v1642_v12, %v1641_v11 }
 0x47c   :  { %v1644_v14 = vrot.slane %v1643_v13, 1 }
 0x47e   :  { %v1645_v16 = vadd.f32 %v1644_v14, %v1643_v13 }
 0x480   :  { %1647 = vst.msk [vmem:[#allocation3] sm:$0x1] %vm1646_vm2, %v1645_v16 }
 0x481   :  { %2115 = shalt.err (!%p2112_p7)
}
 0x482   :  { %s2116_s18 = scalar_lea.hbm %s2867_s2, 16 }
 0x483   :  { %p2117_p8 = scmp.ne.s32.totalorder %s2867_s2, %s2116_s18  ;;  %p2120_p9 = scmp.lt.u32.totalorder %s2116_s18, %s2867_s2 }
 0x485   :  { %p2122_p10 = pnand %p2120_p9, %p2117_p8 }
 0x487   :  { %2125 = shalt.err (!%p2122_p10)
}
 0x488   :  { %1657 = dma.vmem_to_hbm [thread:$0]  %s1655_s13, 16, %s2867_s2, [#allocation4]  }
 0x489   :  { %2138 = dma.done.wait [#allocation4], 16  }
 0x48a   :  { %2139 = vsyncadd [#allocation4], 4294967280 }
 0x48b   :  { %1661 = vsyncpa [#allocation4], 1 }

</bundles_post_ra>
